<compile_context>
chip_gen: v7x
topology: tpu7x:2x2x1
jax: 0.10.0
libtpu: 0.0.40
codegen_flags: <defaults>
</compile_context>

<pallas_src>
import math
import functools

import jax
import jax.numpy as jnp
import numpy as np
from jax import lax
from jax.experimental import pallas as pl
from jax.experimental.pallas import tpu as pltpu

_F32 = jnp.float32
_BF16 = jnp.bfloat16
_NEG_INF = -1e30


def _layer_norm(x, gamma, beta, eps=1e-5):
    mean = jnp.mean(x, axis=-1, keepdims=True)
    var = jnp.mean((x - mean) ** 2, axis=-1, keepdims=True)
    return (x - mean) * lax.rsqrt(var + eps) * gamma + beta


def block_kernel(x_ref,
                 ln1_g_ref, ln1_b_ref,
                 w_attn_ref, b_attn_ref,
                 w_aproj_ref, b_aproj_ref,
                 ln2_g_ref, ln2_b_ref,
                 w_fc_ref, b_fc_ref,
                 w_mproj_ref, b_mproj_ref,
                 o_ref,
                 q_scr, k_scr, v_scr,
                 *, n_head, tile, mlp_chunk):
    Tp, C = x_ref.shape           # padded sequence length, embed dim
    H = n_head
    D = C // H
    scale = 1.0 / math.sqrt(D)
    qt = pl.program_id(1)         # query-tile index (axis marked "arbitrary")

    # -------- once per batch element: LN1 + qkv projection into persistent scratch
    @pl.when(qt == 0)
    def _compute_qkv():
        xf = x_ref[...].astype(_F32)                              # (Tp, C)
        h1 = _layer_norm(xf, ln1_g_ref[...], ln1_b_ref[...])
        qkv = jnp.dot(h1.astype(_BF16), w_attn_ref[...],
                      preferred_element_type=_F32) + b_attn_ref[...]   # (Tp, 3C)
        # one-time head split into (H, Tp, D) bf16 scratch (q pre-scaled)
        for hd in range(H):
            q_scr[hd] = (qkv[:, hd * D:(hd + 1) * D] * scale).astype(_BF16)
            k_scr[hd] = qkv[:, C + hd * D:C + (hd + 1) * D].astype(_BF16)
            v_scr[hd] = qkv[:, 2 * C + hd * D:2 * C + (hd + 1) * D].astype(_BF16)

    # -------- flash-style causal attention for this query tile
    q_off = pl.multiple_of(qt * tile, tile)
    q_blk = q_scr[:, pl.ds(q_off, tile), :]                       # (H, tq, D) bf16

    def kv_body(kt, carry):
        m, l, acc = carry
        k_off = pl.multiple_of(kt * tile, tile)
        k_blk = k_scr[:, pl.ds(k_off, tile), :]                   # (H, tk, D)
        v_blk = v_scr[:, pl.ds(k_off, tile), :]
        s = jnp.einsum('hqd,hkd->hqk', q_blk, k_blk,
                       preferred_element_type=_F32)               # (H, tq, tk)
        row = q_off + lax.broadcasted_iota(jnp.int32, (tile, tile), 0)
        col = k_off + lax.broadcasted_iota(jnp.int32, (tile, tile), 1)
        s = jnp.where((col <= row)[None], s, _NEG_INF)
        m_new = jnp.maximum(m, jnp.max(s, axis=-1, keepdims=True))
        alpha = jnp.exp(m - m_new)
        p = jnp.exp(s - m_new)
        l_new = alpha * l + jnp.sum(p, axis=-1, keepdims=True)
        acc_new = alpha * acc + jnp.einsum('hqk,hkd->hqd', p.astype(_BF16),
                                           v_blk, preferred_element_type=_F32)
        return m_new, l_new, acc_new

    m0 = jnp.full((H, tile, 1), _NEG_INF, _F32)
    l0 = jnp.zeros((H, tile, 1), _F32)
    a0 = jnp.zeros((H, tile, D), _F32)
    # causal bound: only KV tiles 0..qt are ever needed (tile_k == tile_q)
    m, l, acc = lax.fori_loop(0, qt + 1, kv_body, (m0, l0, a0))

    y_h = (acc * pl.reciprocal(l, approx=False)).astype(_BF16)    # (H, tq, D)

    # head merge fused into the output projection: sum_h y_h[h] @ W_proj[h]
    proj = jnp.dot(y_h[0], w_aproj_ref[0], preferred_element_type=_F32)
    for hd in range(1, H):
        proj = proj + jnp.dot(y_h[hd], w_aproj_ref[hd],
                              preferred_element_type=_F32)
    attn_out = proj + b_aproj_ref[...]                            # (tq, C)

    x_t = x_ref[pl.ds(q_off, tile), :].astype(_F32)
    x2 = x_t + attn_out                                           # first residual

    # -------- MLP branch (hidden dim chunked so (tq, 4C) f32 never fully lives)
    h2 = _layer_norm(x2, ln2_g_ref[...], ln2_b_ref[...]).astype(_BF16)
    Fh = 4 * C
    n_chunk = Fh // mlp_chunk
    inv_sqrt2 = 1.0 / math.sqrt(2.0)
    mo = None
    for j in range(n_chunk):
        lo = j * mlp_chunk
        hi = lo + mlp_chunk
        f = jnp.dot(h2, w_fc_ref[:, lo:hi],
                    preferred_element_type=_F32) + b_fc_ref[:, lo:hi]
        f = 0.5 * f * (1.0 + lax.erf(f * inv_sqrt2))              # exact GELU
        c = jnp.dot(f.astype(_BF16), w_mproj_ref[lo:hi, :],
                    preferred_element_type=_F32)
        mo = c if mo is None else mo + c
    mo = mo + b_mproj_ref[...]

    # dropout layers are identity in eval mode.
    o_ref[...] = (x2 + mo).astype(o_ref.dtype)


def _round_up(a, b):
    return -(-a // b) * b


def _pick_tile(T):
    """128 on v5e/older (128-wide MXU), 256 on v6e/v7x (256-wide MXU)."""
    try:
        kind = jax.devices()[0].device_kind.lower()
    except Exception:
        kind = ""
    base = 256 if ("v6" in kind or "v7" in kind) else 128
    if T >= base:
        tile = base
        Tp = _round_up(T, tile)
    else:
        Tp = _round_up(T, 8)
        tile = Tp
    return tile, Tp


def _pick_mlp_chunk(Fh):
    for ch in (2048, 1024, 512):
        if Fh > ch and Fh % ch == 0:
            return ch
    return Fh


def _vmem_limit_bytes(C, H, D, Tp, tile, mlp_chunk):
    """Derive a per-generation VMEM budget instead of a fixed constant."""
    bf, f32 = 2, 4
    weights = 12 * C * C * bf                       # single-buffered bf16 weights
    biases = 13 * C * f32
    scratch = 3 * H * Tp * max(D, 128) * bf         # q/k/v scratch (lane-padded)
    io = 2 * Tp * C * f32 + 2 * tile * C * f32      # x + out double buffers
    acts = (Tp * 3 * C + H * tile * tile + tile * mlp_chunk + 6 * tile * C) * f32
    need = weights + biases + scratch + io + acts
    try:
        cap = pltpu.get_tpu_info().vmem_capacity_bytes
    except Exception:
        cap = 128 * 1024 * 1024
    limit = int(need * 1.5) + (8 << 20)
    return max(32 << 20, min(limit, cap - (16 << 20)))


def block_forward(x, params, n_head):
    B, T, C = x.shape
    assert C % n_head == 0
    D = C // n_head

    tile, Tp = _pick_tile(T)
    nq = Tp // tile
    mlp_chunk = _pick_mlp_chunk(4 * C)

    # pad T to a tile multiple (padded rows are garbage and sliced off; the
    # causal mask keeps padded keys out of every real query row).
    xp = x if Tp == T else jnp.pad(x, ((0, 0), (0, Tp - T), (0, 0)))

    # bf16 weights (half HBM/VMEM footprint); w_aproj pre-split per head so the
    # kernel never re-concats heads.
    w_attn = params["w_attn"].astype(_BF16)                       # (C, 3C)
    w_aproj = params["w_aproj"].astype(_BF16).reshape(n_head, D, C)
    w_fc = params["w_fc"].astype(_BF16)                           # (C, 4C)
    w_mproj = params["w_mproj"].astype(_BF16)                     # (4C, C)

    args = (xp,
            params["ln1_g"], params["ln1_b"],
            w_attn, params["b_attn"],
            w_aproj, params["b_aproj"],
            params["ln2_g"], params["ln2_b"],
            w_fc, params["b_fc"],
            w_mproj, params["b_mproj"])

    kernel = functools.partial(block_kernel, n_head=n_head, tile=tile,
                               mlp_chunk=mlp_chunk)

    flops = int(B * (24 * T * C * C + 2 * T * T * C))
    transcendentals = int(B * (n_head * T * T // 2 + 4 * T * C + 2 * T))
    bytes_accessed = int(2 * B * T * C * 4 + 12 * C * C * 2 + 13 * C * 4)
    vmem_limit = _vmem_limit_bytes(C, n_head, D, Tp, tile, mlp_chunk)

    def build(single_buffer_weights):
        def inv(shape):
            n = len(shape)
            imap = lambda b, q: (0,) * n
            if single_buffer_weights:
                # grid-invariant operand: no double-buffering needed.
                return pl.BlockSpec(shape, imap, pipeline_mode=pl.Buffered(1))
            return pl.BlockSpec(shape, imap)

        in_specs = [
            pl.BlockSpec((None, Tp, C), lambda b, q: (b, 0, 0)),  # x (resident over qt)
            inv((1, C)), inv((1, C)),                             # ln1 gamma / beta
            inv((C, 3 * C)), inv((1, 3 * C)),                     # c_attn
            inv((n_head, D, C)), inv((1, C)),                     # attn c_proj (per head)
            inv((1, C)), inv((1, C)),                             # ln2 gamma / beta
            inv((C, 4 * C)), inv((1, 4 * C)),                     # mlp c_fc
            inv((4 * C, C)), inv((1, C)),                         # mlp c_proj
        ]
        return pl.pallas_call(
            kernel,
            out_shape=jax.ShapeDtypeStruct((B, Tp, C), x.dtype),
            grid=(B, nq),
            in_specs=in_specs,
            out_specs=pl.BlockSpec((None, tile, C), lambda b, q: (b, q, 0)),
            scratch_shapes=[
                pltpu.VMEM((n_head, Tp, D), _BF16),   # q (pre-scaled)
                pltpu.VMEM((n_head, Tp, D), _BF16),   # k
                pltpu.VMEM((n_head, Tp, D), _BF16),   # v
            ],
            compiler_params=pltpu.CompilerParams(
                dimension_semantics=("parallel", "arbitrary"),
                vmem_limit_bytes=vmem_limit),
            cost_estimate=pl.CostEstimate(flops=flops,
                                          transcendentals=transcendentals,
                                          bytes_accessed=bytes_accessed),
        )

    use_single = hasattr(pl, "Buffered")
    try:
        out = build(use_single)(*args)
    except Exception:
        if not use_single:
            raise
        # fallback if this JAX build rejects pipeline_mode=pl.Buffered(1)
        out = build(False)(*args)

    return out if Tp == T else out[:, :T, :]


def ref_block(x, p, n_head):
    """Pure-JAX f32 reference of Block.forward (eval mode, dropout=0)."""
    def ln(z, g, b):
        mu = z.mean(-1, keepdims=True)
        var = ((z - mu) ** 2).mean(-1, keepdims=True)
        return (z - mu) / jnp.sqrt(var + 1e-5) * g[0] + b[0]

    B, T, C = x.shape
    D = C // n_head
    h = ln(x, p["ln1_g"], p["ln1_b"])
    qkv = h @ p["w_attn"] + p["b_attn"][0]
    q, k, v = jnp.split(qkv, 3, axis=-1)
    q = q.reshape(B, T, n_head, D).transpose(0, 2, 1, 3)
    k = k.reshape(B, T, n_head, D).transpose(0, 2, 1, 3)
    v = v.reshape(B, T, n_head, D).transpose(0, 2, 1, 3)
    att = jnp.einsum("bhqd,bhkd->bhqk", q, k) / math.sqrt(D)
    mask = jnp.tril(jnp.ones((T, T), dtype=bool))
    att = jnp.where(mask, att, -1e30)
    att = jax.nn.softmax(att, axis=-1)
    y = jnp.einsum("bhqk,bhkd->bhqd", att, v)
    y = y.transpose(0, 2, 1, 3).reshape(B, T, C)
    y = y @ p["w_aproj"] + p["b_aproj"][0]
    x = x + y
    h2 = ln(x, p["ln2_g"], p["ln2_b"])
    f = h2 @ p["w_fc"] + p["b_fc"][0]
    f = 0.5 * f * (1.0 + jax.lax.erf(f / math.sqrt(2.0)))
    m = f @ p["w_mproj"] + p["b_mproj"][0]
    return x + m


def make_params(key, n_embd):
    C = n_embd
    keys = jax.random.split(key, 6)
    s = 0.02
    return {
        "ln1_g": jnp.ones((1, C), jnp.float32),
        "ln1_b": jnp.zeros((1, C), jnp.float32),
        "w_attn": s * jax.random.normal(keys[0], (C, 3 * C), jnp.float32),
        "b_attn": s * jax.random.normal(keys[1], (1, 3 * C), jnp.float32),
        "w_aproj": s * jax.random.normal(keys[2], (C, C), jnp.float32),
        "b_aproj": jnp.zeros((1, C), jnp.float32),
        "ln2_g": jnp.ones((1, C), jnp.float32),
        "ln2_b": jnp.zeros((1, C), jnp.float32),
        "w_fc": s * jax.random.normal(keys[3], (C, 4 * C), jnp.float32),
        "b_fc": s * jax.random.normal(keys[4], (1, 4 * C), jnp.float32),
        "w_mproj": s * jax.random.normal(keys[5], (4 * C, C), jnp.float32),
        "b_mproj": jnp.zeros((1, C), jnp.float32),
    }


if __name__ == "__main__":
    B, T, C, n_head = 2, 8, 32, 4
    key = jax.random.PRNGKey(0)
    kx, kp = jax.random.split(key)
    x = jax.random.normal(kx, (B, T, C), jnp.float32)
    params = make_params(kp, C)

    out = jax.block_until_ready(block_forward(x, params, n_head))

    ref = ref_block(x, params, n_head)
    # bf16 matmul inputs (f32 accumulation) -> slightly looser tolerance
    np.testing.assert_allclose(np.asarray(out), np.asarray(ref),
                               rtol=2e-2, atol=2e-2)

    print("KERNEL_OK")
</pallas_src>

<mosaic_0001>
module attributes {stable_mosaic.version = 11 : i64} {
  func.func @block_kernel(%arg0: i32, %arg1: i32, %arg2: memref<1x8x32xf32, #tpu.memory_space<vmem>>, %arg3: memref<1x32xf32, #tpu.memory_space<vmem>>, %arg4: memref<1x32xf32, #tpu.memory_space<vmem>>, %arg5: memref<32x96xbf16, #tpu.memory_space<vmem>>, %arg6: memref<1x96xf32, #tpu.memory_space<vmem>>, %arg7: memref<4x8x32xbf16, #tpu.memory_space<vmem>>, %arg8: memref<1x32xf32, #tpu.memory_space<vmem>>, %arg9: memref<1x32xf32, #tpu.memory_space<vmem>>, %arg10: memref<1x32xf32, #tpu.memory_space<vmem>>, %arg11: memref<32x128xbf16, #tpu.memory_space<vmem>>, %arg12: memref<1x128xf32, #tpu.memory_space<vmem>>, %arg13: memref<128x32xbf16, #tpu.memory_space<vmem>>, %arg14: memref<1x32xf32, #tpu.memory_space<vmem>>, %arg15: memref<1x8x32xf32, #tpu.memory_space<vmem>>, %arg16: memref<4x8x8xbf16, #tpu.memory_space<vmem>>, %arg17: memref<4x8x8xbf16, #tpu.memory_space<vmem>>, %arg18: memref<4x8x8xbf16, #tpu.memory_space<vmem>>) attributes {dimension_semantics = [#tpu.dimension_semantics<parallel>, #tpu.dimension_semantics<arbitrary>], iteration_bounds = array<i64: 2, 1>, scalar_prefetch = 0 : i64, scratch_operands = 3 : i64, tpu.core_type = #tpu.core_type<tc>, window_params = [{transform_indices = @transform_0, window_bounds = array<i64: 1, 8, 32>}, {pipeline_mode = #tpu.pipeline_mode<synchronous>, transform_indices = @transform_1, window_bounds = array<i64: 1, 32>}, {pipeline_mode = #tpu.pipeline_mode<synchronous>, transform_indices = @transform_2, window_bounds = array<i64: 1, 32>}, {pipeline_mode = #tpu.pipeline_mode<synchronous>, transform_indices = @transform_3, window_bounds = array<i64: 32, 96>}, {pipeline_mode = #tpu.pipeline_mode<synchronous>, transform_indices = @transform_4, window_bounds = array<i64: 1, 96>}, {pipeline_mode = #tpu.pipeline_mode<synchronous>, transform_indices = @transform_5, window_bounds = array<i64: 4, 8, 32>}, {pipeline_mode = #tpu.pipeline_mode<synchronous>, transform_indices = @transform_6, window_bounds = array<i64: 1, 32>}, {pipeline_mode = #tpu.pipeline_mode<synchronous>, transform_indices = @transform_7, window_bounds = array<i64: 1, 32>}, {pipeline_mode = #tpu.pipeline_mode<synchronous>, transform_indices = @transform_8, window_bounds = array<i64: 1, 32>}, {pipeline_mode = #tpu.pipeline_mode<synchronous>, transform_indices = @transform_9, window_bounds = array<i64: 32, 128>}, {pipeline_mode = #tpu.pipeline_mode<synchronous>, transform_indices = @transform_10, window_bounds = array<i64: 1, 128>}, {pipeline_mode = #tpu.pipeline_mode<synchronous>, transform_indices = @transform_11, window_bounds = array<i64: 128, 32>}, {pipeline_mode = #tpu.pipeline_mode<synchronous>, transform_indices = @transform_12, window_bounds = array<i64: 1, 32>}, {transform_indices = @transform_13, window_bounds = array<i64: 1, 8, 32>}]} {
    %c0_i32 = arith.constant 0 : i32
    %0 = arith.cmpi eq, %arg1, %c0_i32 : i32
    %1 = arith.extui %0 : i1 to i32
    %c0_i32_0 = arith.constant 0 : i32
    %2 = arith.cmpi ne, %1, %c0_i32_0 : i32
    scf.if %2 {
      %c0_48 = arith.constant 0 : index
      %c0_49 = arith.constant 0 : index
      %c0_50 = arith.constant 0 : index
      %96 = vector.load %arg2[%c0_48, %c0_49, %c0_50] : memref<1x8x32xf32, #tpu.memory_space<vmem>>, vector<1x8x32xf32>
      %97 = vector.shape_cast %96 : vector<1x8x32xf32> to vector<8x32xf32>
      %c0_51 = arith.constant 0 : index
      %c0_52 = arith.constant 0 : index
      %98 = vector.load %arg3[%c0_51, %c0_52] : memref<1x32xf32, #tpu.memory_space<vmem>>, vector<1x32xf32>
      %c0_53 = arith.constant 0 : index
      %c0_54 = arith.constant 0 : index
      %99 = vector.load %arg4[%c0_53, %c0_54] : memref<1x32xf32, #tpu.memory_space<vmem>>, vector<1x32xf32>
      %cst_55 = arith.constant dense<0.000000e+00> : vector<8xf32>
      %100 = vector.multi_reduction <add>, %97, %cst_55 [1] : vector<8x32xf32> to vector<8xf32>
      %101 = vector.shape_cast %100 : vector<8xf32> to vector<8x1xf32>
      %cst_56 = arith.constant 3.200000e+01 : f32
      %102 = vector.broadcast %cst_56 : f32 to vector<8x1xf32>
      %103 = arith.divf %101, %102 : vector<8x1xf32>
      %104 = vector.broadcast %103 : vector<8x1xf32> to vector<8x32xf32>
      %105 = arith.subf %97, %104 : vector<8x32xf32>
      %106 = arith.mulf %105, %105 : vector<8x32xf32>
      %cst_57 = arith.constant dense<0.000000e+00> : vector<8xf32>
      %107 = vector.multi_reduction <add>, %106, %cst_57 [1] : vector<8x32xf32> to vector<8xf32>
      %108 = vector.shape_cast %107 : vector<8xf32> to vector<8x1xf32>
      %cst_58 = arith.constant 3.200000e+01 : f32
      %109 = vector.broadcast %cst_58 : f32 to vector<8x1xf32>
      %110 = arith.divf %108, %109 : vector<8x1xf32>
      %111 = vector.broadcast %103 : vector<8x1xf32> to vector<8x32xf32>
      %112 = arith.subf %97, %111 : vector<8x32xf32>
      %cst_59 = arith.constant 9.99999974E-6 : f32
      %113 = vector.broadcast %cst_59 : f32 to vector<8x1xf32>
      %114 = arith.addf %110, %113 : vector<8x1xf32>
      %115 = math.rsqrt %114 : vector<8x1xf32>
      %116 = vector.broadcast %115 : vector<8x1xf32> to vector<8x32xf32>
      %117 = arith.mulf %112, %116 : vector<8x32xf32>
      %118 = vector.broadcast %98 : vector<1x32xf32> to vector<8x32xf32>
      %119 = arith.mulf %117, %118 : vector<8x32xf32>
      %120 = vector.broadcast %99 : vector<1x32xf32> to vector<8x32xf32>
      %121 = arith.addf %119, %120 : vector<8x32xf32>
      %122 = arith.truncf %121 : vector<8x32xf32> to vector<8x32xbf16>
      %c0_60 = arith.constant 0 : index
      %c0_61 = arith.constant 0 : index
      %123 = vector.load %arg5[%c0_60, %c0_61] : memref<32x96xbf16, #tpu.memory_space<vmem>>, vector<32x96xbf16>
      %cst_62 = arith.constant dense<0.000000e+00> : vector<8x96xf32>
      %124 = tpu.matmul %122, %123, %cst_62 {dimension_numbers = #tpu.dot_dimension_numbers<[1], [0], [0], [1], [0, 0, 1, 1], [], []>} : vector<8x32xbf16>, vector<32x96xbf16>, vector<8x96xf32> -> vector<8x96xf32>
      %c0_63 = arith.constant 0 : index
      %c0_64 = arith.constant 0 : index
      %125 = vector.load %arg6[%c0_63, %c0_64] : memref<1x96xf32, #tpu.memory_space<vmem>>, vector<1x96xf32>
      %126 = vector.broadcast %125 : vector<1x96xf32> to vector<8x96xf32>
      %127 = arith.addf %124, %126 : vector<8x96xf32>
      %128 = vector.extract_strided_slice %127 {offsets = [0, 0], sizes = [8, 8], strides = [1, 1]} : vector<8x96xf32> to vector<8x8xf32>
      %cst_65 = arith.constant 0.353553385 : f32
      %129 = vector.broadcast %cst_65 : f32 to vector<8x8xf32>
      %130 = arith.mulf %128, %129 : vector<8x8xf32>
      %131 = arith.truncf %130 : vector<8x8xf32> to vector<8x8xbf16>
      %c0_66 = arith.constant 0 : index
      %c0_67 = arith.constant 0 : index
      %c0_68 = arith.constant 0 : index
      %132 = vector.load %arg16[%c0_66, %c0_67, %c0_68] : memref<4x8x8xbf16, #tpu.memory_space<vmem>>, vector<1x8x8xbf16>
      %133 = vector.shape_cast %132 : vector<1x8x8xbf16> to vector<8x8xbf16>
      %134 = vector.shape_cast %131 : vector<8x8xbf16> to vector<1x8x8xbf16>
      tpu.vector_store %arg16[%c0_66, %c0_67, %c0_68], %134 {strides = array<i32>} : memref<4x8x8xbf16, #tpu.memory_space<vmem>>, vector<1x8x8xbf16>,
      %135 = vector.extract_strided_slice %127 {offsets = [0, 32], sizes = [8, 8], strides = [1, 1]} : vector<8x96xf32> to vector<8x8xf32>
      %136 = arith.truncf %135 : vector<8x8xf32> to vector<8x8xbf16>
      %c0_69 = arith.constant 0 : index
      %c0_70 = arith.constant 0 : index
      %c0_71 = arith.constant 0 : index
      %137 = vector.load %arg17[%c0_69, %c0_70, %c0_71] : memref<4x8x8xbf16, #tpu.memory_space<vmem>>, vector<1x8x8xbf16>
      %138 = vector.shape_cast %137 : vector<1x8x8xbf16> to vector<8x8xbf16>
      %139 = vector.shape_cast %136 : vector<8x8xbf16> to vector<1x8x8xbf16>
      tpu.vector_store %arg17[%c0_69, %c0_70, %c0_71], %139 {strides = array<i32>} : memref<4x8x8xbf16, #tpu.memory_space<vmem>>, vector<1x8x8xbf16>,
      %140 = vector.extract_strided_slice %127 {offsets = [0, 64], sizes = [8, 8], strides = [1, 1]} : vector<8x96xf32> to vector<8x8xf32>
      %141 = arith.truncf %140 : vector<8x8xf32> to vector<8x8xbf16>
      %c0_72 = arith.constant 0 : index
      %c0_73 = arith.constant 0 : index
      %c0_74 = arith.constant 0 : index
      %142 = vector.load %arg18[%c0_72, %c0_73, %c0_74] : memref<4x8x8xbf16, #tpu.memory_space<vmem>>, vector<1x8x8xbf16>
      %143 = vector.shape_cast %142 : vector<1x8x8xbf16> to vector<8x8xbf16>
      %144 = vector.shape_cast %141 : vector<8x8xbf16> to vector<1x8x8xbf16>
      tpu.vector_store %arg18[%c0_72, %c0_73, %c0_74], %144 {strides = array<i32>} : memref<4x8x8xbf16, #tpu.memory_space<vmem>>, vector<1x8x8xbf16>,
      %145 = vector.extract_strided_slice %127 {offsets = [0, 8], sizes = [8, 8], strides = [1, 1]} : vector<8x96xf32> to vector<8x8xf32>
      %cst_75 = arith.constant 0.353553385 : f32
      %146 = vector.broadcast %cst_75 : f32 to vector<8x8xf32>
      %147 = arith.mulf %145, %146 : vector<8x8xf32>
      %148 = arith.truncf %147 : vector<8x8xf32> to vector<8x8xbf16>
      %c1_76 = arith.constant 1 : index
      %c0_77 = arith.constant 0 : index
      %c0_78 = arith.constant 0 : index
      %149 = vector.load %arg16[%c1_76, %c0_77, %c0_78] : memref<4x8x8xbf16, #tpu.memory_space<vmem>>, vector<1x8x8xbf16>
      %150 = vector.shape_cast %149 : vector<1x8x8xbf16> to vector<8x8xbf16>
      %151 = vector.shape_cast %148 : vector<8x8xbf16> to vector<1x8x8xbf16>
      tpu.vector_store %arg16[%c1_76, %c0_77, %c0_78], %151 {strides = array<i32>} : memref<4x8x8xbf16, #tpu.memory_space<vmem>>, vector<1x8x8xbf16>,
      %152 = vector.extract_strided_slice %127 {offsets = [0, 40], sizes = [8, 8], strides = [1, 1]} : vector<8x96xf32> to vector<8x8xf32>
      %153 = arith.truncf %152 : vector<8x8xf32> to vector<8x8xbf16>
      %c1_79 = arith.constant 1 : index
      %c0_80 = arith.constant 0 : index
      %c0_81 = arith.constant 0 : index
      %154 = vector.load %arg17[%c1_79, %c0_80, %c0_81] : memref<4x8x8xbf16, #tpu.memory_space<vmem>>, vector<1x8x8xbf16>
      %155 = vector.shape_cast %154 : vector<1x8x8xbf16> to vector<8x8xbf16>
      %156 = vector.shape_cast %153 : vector<8x8xbf16> to vector<1x8x8xbf16>
      tpu.vector_store %arg17[%c1_79, %c0_80, %c0_81], %156 {strides = array<i32>} : memref<4x8x8xbf16, #tpu.memory_space<vmem>>, vector<1x8x8xbf16>,
      %157 = vector.extract_strided_slice %127 {offsets = [0, 72], sizes = [8, 8], strides = [1, 1]} : vector<8x96xf32> to vector<8x8xf32>
      %158 = arith.truncf %157 : vector<8x8xf32> to vector<8x8xbf16>
      %c1_82 = arith.constant 1 : index
      %c0_83 = arith.constant 0 : index
      %c0_84 = arith.constant 0 : index
      %159 = vector.load %arg18[%c1_82, %c0_83, %c0_84] : memref<4x8x8xbf16, #tpu.memory_space<vmem>>, vector<1x8x8xbf16>
      %160 = vector.shape_cast %159 : vector<1x8x8xbf16> to vector<8x8xbf16>
      %161 = vector.shape_cast %158 : vector<8x8xbf16> to vector<1x8x8xbf16>
      tpu.vector_store %arg18[%c1_82, %c0_83, %c0_84], %161 {strides = array<i32>} : memref<4x8x8xbf16, #tpu.memory_space<vmem>>, vector<1x8x8xbf16>,
      %162 = vector.extract_strided_slice %127 {offsets = [0, 16], sizes = [8, 8], strides = [1, 1]} : vector<8x96xf32> to vector<8x8xf32>
      %cst_85 = arith.constant 0.353553385 : f32
      %163 = vector.broadcast %cst_85 : f32 to vector<8x8xf32>
      %164 = arith.mulf %162, %163 : vector<8x8xf32>
      %165 = arith.truncf %164 : vector<8x8xf32> to vector<8x8xbf16>
      %c2_86 = arith.constant 2 : index
      %c0_87 = arith.constant 0 : index
      %c0_88 = arith.constant 0 : index
      %166 = vector.load %arg16[%c2_86, %c0_87, %c0_88] : memref<4x8x8xbf16, #tpu.memory_space<vmem>>, vector<1x8x8xbf16>
      %167 = vector.shape_cast %166 : vector<1x8x8xbf16> to vector<8x8xbf16>
      %168 = vector.shape_cast %165 : vector<8x8xbf16> to vector<1x8x8xbf16>
      tpu.vector_store %arg16[%c2_86, %c0_87, %c0_88], %168 {strides = array<i32>} : memref<4x8x8xbf16, #tpu.memory_space<vmem>>, vector<1x8x8xbf16>,
      %169 = vector.extract_strided_slice %127 {offsets = [0, 48], sizes = [8, 8], strides = [1, 1]} : vector<8x96xf32> to vector<8x8xf32>
      %170 = arith.truncf %169 : vector<8x8xf32> to vector<8x8xbf16>
      %c2_89 = arith.constant 2 : index
      %c0_90 = arith.constant 0 : index
      %c0_91 = arith.constant 0 : index
      %171 = vector.load %arg17[%c2_89, %c0_90, %c0_91] : memref<4x8x8xbf16, #tpu.memory_space<vmem>>, vector<1x8x8xbf16>
      %172 = vector.shape_cast %171 : vector<1x8x8xbf16> to vector<8x8xbf16>
      %173 = vector.shape_cast %170 : vector<8x8xbf16> to vector<1x8x8xbf16>
      tpu.vector_store %arg17[%c2_89, %c0_90, %c0_91], %173 {strides = array<i32>} : memref<4x8x8xbf16, #tpu.memory_space<vmem>>, vector<1x8x8xbf16>,
      %174 = vector.extract_strided_slice %127 {offsets = [0, 80], sizes = [8, 8], strides = [1, 1]} : vector<8x96xf32> to vector<8x8xf32>
      %175 = arith.truncf %174 : vector<8x8xf32> to vector<8x8xbf16>
      %c2_92 = arith.constant 2 : index
      %c0_93 = arith.constant 0 : index
      %c0_94 = arith.constant 0 : index
      %176 = vector.load %arg18[%c2_92, %c0_93, %c0_94] : memref<4x8x8xbf16, #tpu.memory_space<vmem>>, vector<1x8x8xbf16>
      %177 = vector.shape_cast %176 : vector<1x8x8xbf16> to vector<8x8xbf16>
      %178 = vector.shape_cast %175 : vector<8x8xbf16> to vector<1x8x8xbf16>
      tpu.vector_store %arg18[%c2_92, %c0_93, %c0_94], %178 {strides = array<i32>} : memref<4x8x8xbf16, #tpu.memory_space<vmem>>, vector<1x8x8xbf16>,
      %179 = vector.extract_strided_slice %127 {offsets = [0, 24], sizes = [8, 8], strides = [1, 1]} : vector<8x96xf32> to vector<8x8xf32>
      %cst_95 = arith.constant 0.353553385 : f32
      %180 = vector.broadcast %cst_95 : f32 to vector<8x8xf32>
      %181 = arith.mulf %179, %180 : vector<8x8xf32>
      %182 = arith.truncf %181 : vector<8x8xf32> to vector<8x8xbf16>
      %c3_96 = arith.constant 3 : index
      %c0_97 = arith.constant 0 : index
      %c0_98 = arith.constant 0 : index
      %183 = vector.load %arg16[%c3_96, %c0_97, %c0_98] : memref<4x8x8xbf16, #tpu.memory_space<vmem>>, vector<1x8x8xbf16>
      %184 = vector.shape_cast %183 : vector<1x8x8xbf16> to vector<8x8xbf16>
      %185 = vector.shape_cast %182 : vector<8x8xbf16> to vector<1x8x8xbf16>
      tpu.vector_store %arg16[%c3_96, %c0_97, %c0_98], %185 {strides = array<i32>} : memref<4x8x8xbf16, #tpu.memory_space<vmem>>, vector<1x8x8xbf16>,
      %186 = vector.extract_strided_slice %127 {offsets = [0, 56], sizes = [8, 8], strides = [1, 1]} : vector<8x96xf32> to vector<8x8xf32>
      %187 = arith.truncf %186 : vector<8x8xf32> to vector<8x8xbf16>
      %c3_99 = arith.constant 3 : index
      %c0_100 = arith.constant 0 : index
      %c0_101 = arith.constant 0 : index
      %188 = vector.load %arg17[%c3_99, %c0_100, %c0_101] : memref<4x8x8xbf16, #tpu.memory_space<vmem>>, vector<1x8x8xbf16>
      %189 = vector.shape_cast %188 : vector<1x8x8xbf16> to vector<8x8xbf16>
      %190 = vector.shape_cast %187 : vector<8x8xbf16> to vector<1x8x8xbf16>
      tpu.vector_store %arg17[%c3_99, %c0_100, %c0_101], %190 {strides = array<i32>} : memref<4x8x8xbf16, #tpu.memory_space<vmem>>, vector<1x8x8xbf16>,
      %191 = vector.extract_strided_slice %127 {offsets = [0, 88], sizes = [8, 8], strides = [1, 1]} : vector<8x96xf32> to vector<8x8xf32>
      %192 = arith.truncf %191 : vector<8x8xf32> to vector<8x8xbf16>
      %c3_102 = arith.constant 3 : index
      %c0_103 = arith.constant 0 : index
      %c0_104 = arith.constant 0 : index
      %193 = vector.load %arg18[%c3_102, %c0_103, %c0_104] : memref<4x8x8xbf16, #tpu.memory_space<vmem>>, vector<1x8x8xbf16>
      %194 = vector.shape_cast %193 : vector<1x8x8xbf16> to vector<8x8xbf16>
      %195 = vector.shape_cast %192 : vector<8x8xbf16> to vector<1x8x8xbf16>
      tpu.vector_store %arg18[%c3_102, %c0_103, %c0_104], %195 {strides = array<i32>} : memref<4x8x8xbf16, #tpu.memory_space<vmem>>, vector<1x8x8xbf16>,
    } else {
    }
    %c8_i32 = arith.constant 8 : i32
    %3 = arith.muli %arg1, %c8_i32 : i32
    %4 = tpu.assume_multiple %3, 8 : i32
    %c0 = arith.constant 0 : index
    %5 = arith.index_cast %4 : i32 to index
    %c0_1 = arith.constant 0 : index
    %6 = vector.load %arg16[%c0, %5, %c0_1] : memref<4x8x8xbf16, #tpu.memory_space<vmem>>, vector<4x8x8xbf16>
    %cst = arith.constant -1.000000e+30 : f32
    %7 = vector.broadcast %cst : f32 to vector<4x8x1xf32>
    %cst_2 = arith.constant 0.000000e+00 : f32
    %8 = vector.broadcast %cst_2 : f32 to vector<4x8x1xf32>
    %cst_3 = arith.constant 0.000000e+00 : f32
    %9 = vector.broadcast %cst_3 : f32 to vector<4x8x8xf32>
    %c1_i32 = arith.constant 1 : i32
    %10 = arith.addi %arg1, %c1_i32 : i32
    %c0_i32_4 = arith.constant 0 : i32
    %11 = arith.subi %10, %c0_i32_4 : i32
    %12 = arith.addi %c0_i32_4, %11 : i32
    %c1_i32_5 = arith.constant 1 : i32
    %13:3 = scf.for %arg19 = %c0_i32_4 to %12 step %c1_i32_5 iter_args(%arg20 = %7, %arg21 = %8, %arg22 = %9) -> (vector<4x8x1xf32>, vector<4x8x1xf32>, vector<4x8x8xf32>)  : i32 {
      %c8_i32_48 = arith.constant 8 : i32
      %96 = arith.muli %arg19, %c8_i32_48 : i32
      %97 = tpu.assume_multiple %96, 8 : i32
      %c0_49 = arith.constant 0 : index
      %98 = arith.index_cast %97 : i32 to index
      %c0_50 = arith.constant 0 : index
      %99 = vector.load %arg17[%c0_49, %98, %c0_50] : memref<4x8x8xbf16, #tpu.memory_space<vmem>>, vector<4x8x8xbf16>
      %c0_51 = arith.constant 0 : index
      %100 = arith.index_cast %97 : i32 to index
      %c0_52 = arith.constant 0 : index
      %101 = vector.load %arg18[%c0_51, %100, %c0_52] : memref<4x8x8xbf16, #tpu.memory_space<vmem>>, vector<4x8x8xbf16>
      "tpu.trace_start"() <{level = 10 : i32, message = "hqd,hkd->hqk"}> : () -> ()
      %cst_53 = arith.constant dense<0.000000e+00> : vector<4x8x8xf32>
      %102 = tpu.matmul %6, %99, %cst_53 {dimension_numbers = #tpu.dot_dimension_numbers<[2], [2], [1], [1], [0, 0, 0, 1, 1, 1], [0], [0]>} : vector<4x8x8xbf16>, vector<4x8x8xbf16>, vector<4x8x8xf32> -> vector<4x8x8xf32>
      "tpu.trace_stop"() : () -> ()
      %103 = tpu.iota {dimensions = array<i32: 0>} : vector<8x8xi32>
      %104 = vector.broadcast %4 : i32 to vector<8x8xi32>
      %105 = arith.addi %104, %103 : vector<8x8xi32>
      %106 = tpu.iota {dimensions = array<i32: 1>} : vector<8x8xi32>
      %107 = vector.broadcast %97 : i32 to vector<8x8xi32>
      %108 = arith.addi %107, %106 : vector<8x8xi32>
      %109 = arith.cmpi sle, %108, %105 : vector<8x8xi32>
      %110 = vector.shape_cast %109 : vector<8x8xi1> to vector<1x8x8xi1>
      %cst_54 = arith.constant -1.000000e+30 : f32
      %111 = vector.shape_cast %110 : vector<1x8x8xi1> to vector<1x8x8xi1>
      %112 = vector.broadcast %111 : vector<1x8x8xi1> to vector<4x8x8xi1>
      %113 = vector.broadcast %cst_54 : f32 to vector<4x8x8xf32>
      %114 = arith.select %112, %102, %113 : vector<4x8x8xi1>, vector<4x8x8xf32>
      %cst_55 = arith.constant dense<0xFF800000> : vector<4x8xf32>
      %115 = vector.multi_reduction <maximumf>, %114, %cst_55 [2] : vector<4x8x8xf32> to vector<4x8xf32>
      %116 = vector.shape_cast %115 : vector<4x8xf32> to vector<4x8x1xf32>
      %117 = arith.maximumf %arg20, %116 : vector<4x8x1xf32>
      %118 = arith.subf %arg20, %117 : vector<4x8x1xf32>
      %119 = math.exp %118 : vector<4x8x1xf32>
      %120 = vector.broadcast %117 : vector<4x8x1xf32> to vector<4x8x8xf32>
      %121 = arith.subf %114, %120 : vector<4x8x8xf32>
      %122 = math.exp %121 : vector<4x8x8xf32>
      %123 = arith.mulf %119, %arg21 : vector<4x8x1xf32>
      %cst_56 = arith.constant dense<0.000000e+00> : vector<4x8xf32>
      %124 = vector.multi_reduction <add>, %122, %cst_56 [2] : vector<4x8x8xf32> to vector<4x8xf32>
      %125 = vector.shape_cast %124 : vector<4x8xf32> to vector<4x8x1xf32>
      %126 = arith.addf %123, %125 : vector<4x8x1xf32>
      %127 = vector.broadcast %119 : vector<4x8x1xf32> to vector<4x8x8xf32>
      %128 = arith.mulf %127, %arg22 : vector<4x8x8xf32>
      %129 = arith.truncf %122 : vector<4x8x8xf32> to vector<4x8x8xbf16>
      "tpu.trace_start"() <{level = 10 : i32, message = "hqk,hkd->hqd"}> : () -> ()
      %cst_57 = arith.constant dense<0.000000e+00> : vector<4x8x8xf32>
      %130 = tpu.matmul %129, %101, %cst_57 {dimension_numbers = #tpu.dot_dimension_numbers<[2], [1], [1], [2], [0, 0, 0, 1, 1, 2], [0], [0]>} : vector<4x8x8xbf16>, vector<4x8x8xbf16>, vector<4x8x8xf32> -> vector<4x8x8xf32>
      "tpu.trace_stop"() : () -> ()
      %131 = arith.addf %128, %130 : vector<4x8x8xf32>
      scf.yield %117, %126, %131 : vector<4x8x1xf32>, vector<4x8x1xf32>, vector<4x8x8xf32>
    }
    %14 = tpu.reciprocal %13#1 : vector<4x8x1xf32> -> vector<4x8x1xf32>
    %15 = vector.broadcast %14 : vector<4x8x1xf32> to vector<4x8x8xf32>
    %16 = arith.mulf %13#2, %15 : vector<4x8x8xf32>
    %17 = arith.truncf %16 : vector<4x8x8xf32> to vector<4x8x8xbf16>
    %18 = vector.extract_strided_slice %17 {offsets = [0, 0, 0], sizes = [1, 8, 8], strides = [1, 1, 1]} : vector<4x8x8xbf16> to vector<1x8x8xbf16>
    %19 = vector.shape_cast %18 : vector<1x8x8xbf16> to vector<8x8xbf16>
    %c0_6 = arith.constant 0 : index
    %c0_7 = arith.constant 0 : index
    %c0_8 = arith.constant 0 : index
    %20 = vector.load %arg7[%c0_6, %c0_7, %c0_8] : memref<4x8x32xbf16, #tpu.memory_space<vmem>>, vector<1x8x32xbf16>
    %21 = vector.shape_cast %20 : vector<1x8x32xbf16> to vector<8x32xbf16>
    %cst_9 = arith.constant dense<0.000000e+00> : vector<8x32xf32>
    %22 = tpu.matmul %19, %21, %cst_9 {dimension_numbers = #tpu.dot_dimension_numbers<[1], [0], [0], [1], [0, 0, 1, 1], [], []>} : vector<8x8xbf16>, vector<8x32xbf16>, vector<8x32xf32> -> vector<8x32xf32>
    %23 = vector.extract_strided_slice %17 {offsets = [1, 0, 0], sizes = [1, 8, 8], strides = [1, 1, 1]} : vector<4x8x8xbf16> to vector<1x8x8xbf16>
    %24 = vector.shape_cast %23 : vector<1x8x8xbf16> to vector<8x8xbf16>
    %c1 = arith.constant 1 : index
    %c0_10 = arith.constant 0 : index
    %c0_11 = arith.constant 0 : index
    %25 = vector.load %arg7[%c1, %c0_10, %c0_11] : memref<4x8x32xbf16, #tpu.memory_space<vmem>>, vector<1x8x32xbf16>
    %26 = vector.shape_cast %25 : vector<1x8x32xbf16> to vector<8x32xbf16>
    %cst_12 = arith.constant dense<0.000000e+00> : vector<8x32xf32>
    %27 = tpu.matmul %24, %26, %cst_12 {dimension_numbers = #tpu.dot_dimension_numbers<[1], [0], [0], [1], [0, 0, 1, 1], [], []>} : vector<8x8xbf16>, vector<8x32xbf16>, vector<8x32xf32> -> vector<8x32xf32>
    %28 = arith.addf %22, %27 : vector<8x32xf32>
    %29 = vector.extract_strided_slice %17 {offsets = [2, 0, 0], sizes = [1, 8, 8], strides = [1, 1, 1]} : vector<4x8x8xbf16> to vector<1x8x8xbf16>
    %30 = vector.shape_cast %29 : vector<1x8x8xbf16> to vector<8x8xbf16>
    %c2 = arith.constant 2 : index
    %c0_13 = arith.constant 0 : index
    %c0_14 = arith.constant 0 : index
    %31 = vector.load %arg7[%c2, %c0_13, %c0_14] : memref<4x8x32xbf16, #tpu.memory_space<vmem>>, vector<1x8x32xbf16>
    %32 = vector.shape_cast %31 : vector<1x8x32xbf16> to vector<8x32xbf16>
    %cst_15 = arith.constant dense<0.000000e+00> : vector<8x32xf32>
    %33 = tpu.matmul %30, %32, %cst_15 {dimension_numbers = #tpu.dot_dimension_numbers<[1], [0], [0], [1], [0, 0, 1, 1], [], []>} : vector<8x8xbf16>, vector<8x32xbf16>, vector<8x32xf32> -> vector<8x32xf32>
    %34 = arith.addf %28, %33 : vector<8x32xf32>
    %35 = vector.extract_strided_slice %17 {offsets = [3, 0, 0], sizes = [1, 8, 8], strides = [1, 1, 1]} : vector<4x8x8xbf16> to vector<1x8x8xbf16>
    %36 = vector.shape_cast %35 : vector<1x8x8xbf16> to vector<8x8xbf16>
    %c3 = arith.constant 3 : index
    %c0_16 = arith.constant 0 : index
    %c0_17 = arith.constant 0 : index
    %37 = vector.load %arg7[%c3, %c0_16, %c0_17] : memref<4x8x32xbf16, #tpu.memory_space<vmem>>, vector<1x8x32xbf16>
    %38 = vector.shape_cast %37 : vector<1x8x32xbf16> to vector<8x32xbf16>
    %cst_18 = arith.constant dense<0.000000e+00> : vector<8x32xf32>
    %39 = tpu.matmul %36, %38, %cst_18 {dimension_numbers = #tpu.dot_dimension_numbers<[1], [0], [0], [1], [0, 0, 1, 1], [], []>} : vector<8x8xbf16>, vector<8x32xbf16>, vector<8x32xf32> -> vector<8x32xf32>
    %40 = arith.addf %34, %39 : vector<8x32xf32>
    %c0_19 = arith.constant 0 : index
    %c0_20 = arith.constant 0 : index
    %41 = vector.load %arg8[%c0_19, %c0_20] : memref<1x32xf32, #tpu.memory_space<vmem>>, vector<1x32xf32>
    %42 = vector.broadcast %41 : vector<1x32xf32> to vector<8x32xf32>
    %43 = arith.addf %40, %42 : vector<8x32xf32>
    %c0_21 = arith.constant 0 : index
    %44 = arith.index_cast %4 : i32 to index
    %c0_22 = arith.constant 0 : index
    %45 = vector.load %arg2[%c0_21, %44, %c0_22] : memref<1x8x32xf32, #tpu.memory_space<vmem>>, vector<1x8x32xf32>
    %46 = vector.shape_cast %45 : vector<1x8x32xf32> to vector<8x32xf32>
    %47 = arith.addf %46, %43 : vector<8x32xf32>
    %c0_23 = arith.constant 0 : index
    %c0_24 = arith.constant 0 : index
    %48 = vector.load %arg9[%c0_23, %c0_24] : memref<1x32xf32, #tpu.memory_space<vmem>>, vector<1x32xf32>
    %c0_25 = arith.constant 0 : index
    %c0_26 = arith.constant 0 : index
    %49 = vector.load %arg10[%c0_25, %c0_26] : memref<1x32xf32, #tpu.memory_space<vmem>>, vector<1x32xf32>
    %cst_27 = arith.constant dense<0.000000e+00> : vector<8xf32>
    %50 = vector.multi_reduction <add>, %47, %cst_27 [1] : vector<8x32xf32> to vector<8xf32>
    %51 = vector.shape_cast %50 : vector<8xf32> to vector<8x1xf32>
    %cst_28 = arith.constant 3.200000e+01 : f32
    %52 = vector.broadcast %cst_28 : f32 to vector<8x1xf32>
    %53 = arith.divf %51, %52 : vector<8x1xf32>
    %54 = vector.broadcast %53 : vector<8x1xf32> to vector<8x32xf32>
    %55 = arith.subf %47, %54 : vector<8x32xf32>
    %56 = arith.mulf %55, %55 : vector<8x32xf32>
    %cst_29 = arith.constant dense<0.000000e+00> : vector<8xf32>
    %57 = vector.multi_reduction <add>, %56, %cst_29 [1] : vector<8x32xf32> to vector<8xf32>
    %58 = vector.shape_cast %57 : vector<8xf32> to vector<8x1xf32>
    %cst_30 = arith.constant 3.200000e+01 : f32
    %59 = vector.broadcast %cst_30 : f32 to vector<8x1xf32>
    %60 = arith.divf %58, %59 : vector<8x1xf32>
    %61 = vector.broadcast %53 : vector<8x1xf32> to vector<8x32xf32>
    %62 = arith.subf %47, %61 : vector<8x32xf32>
    %cst_31 = arith.constant 9.99999974E-6 : f32
    %63 = vector.broadcast %cst_31 : f32 to vector<8x1xf32>
    %64 = arith.addf %60, %63 : vector<8x1xf32>
    %65 = math.rsqrt %64 : vector<8x1xf32>
    %66 = vector.broadcast %65 : vector<8x1xf32> to vector<8x32xf32>
    %67 = arith.mulf %62, %66 : vector<8x32xf32>
    %68 = vector.broadcast %48 : vector<1x32xf32> to vector<8x32xf32>
    %69 = arith.mulf %67, %68 : vector<8x32xf32>
    %70 = vector.broadcast %49 : vector<1x32xf32> to vector<8x32xf32>
    %71 = arith.addf %69, %70 : vector<8x32xf32>
    %72 = arith.truncf %71 : vector<8x32xf32> to vector<8x32xbf16>
    %c0_32 = arith.constant 0 : index
    %c0_33 = arith.constant 0 : index
    %73 = vector.load %arg11[%c0_32, %c0_33] : memref<32x128xbf16, #tpu.memory_space<vmem>>, vector<32x128xbf16>
    %cst_34 = arith.constant dense<0.000000e+00> : vector<8x128xf32>
    %74 = tpu.matmul %72, %73, %cst_34 {dimension_numbers = #tpu.dot_dimension_numbers<[1], [0], [0], [1], [0, 0, 1, 1], [], []>} : vector<8x32xbf16>, vector<32x128xbf16>, vector<8x128xf32> -> vector<8x128xf32>
    %c0_35 = arith.constant 0 : index
    %c0_36 = arith.constant 0 : index
    %75 = vector.load %arg12[%c0_35, %c0_36] : memref<1x128xf32, #tpu.memory_space<vmem>>, vector<1x128xf32>
    %76 = vector.broadcast %75 : vector<1x128xf32> to vector<8x128xf32>
    %77 = arith.addf %74, %76 : vector<8x128xf32>
    %cst_37 = arith.constant 5.000000e-01 : f32
    %78 = vector.broadcast %cst_37 : f32 to vector<8x128xf32>
    %79 = arith.mulf %78, %77 : vector<8x128xf32>
    %cst_38 = arith.constant 0.707106769 : f32
    %80 = vector.broadcast %cst_38 : f32 to vector<8x128xf32>
    %81 = arith.mulf %77, %80 : vector<8x128xf32>
    %82 = math.erf %81 : vector<8x128xf32>
    %cst_39 = arith.constant 1.000000e+00 : f32
    %83 = vector.broadcast %cst_39 : f32 to vector<8x128xf32>
    %84 = arith.addf %83, %82 : vector<8x128xf32>
    %85 = arith.mulf %79, %84 : vector<8x128xf32>
    %86 = arith.truncf %85 : vector<8x128xf32> to vector<8x128xbf16>
    %c0_40 = arith.constant 0 : index
    %c0_41 = arith.constant 0 : index
    %87 = vector.load %arg13[%c0_40, %c0_41] : memref<128x32xbf16, #tpu.memory_space<vmem>>, vector<128x32xbf16>
    %cst_42 = arith.constant dense<0.000000e+00> : vector<8x32xf32>
    %88 = tpu.matmul %86, %87, %cst_42 {dimension_numbers = #tpu.dot_dimension_numbers<[1], [0], [0], [1], [0, 0, 1, 1], [], []>} : vector<8x128xbf16>, vector<128x32xbf16>, vector<8x32xf32> -> vector<8x32xf32>
    %c0_43 = arith.constant 0 : index
    %c0_44 = arith.constant 0 : index
    %89 = vector.load %arg14[%c0_43, %c0_44] : memref<1x32xf32, #tpu.memory_space<vmem>>, vector<1x32xf32>
    %90 = vector.broadcast %89 : vector<1x32xf32> to vector<8x32xf32>
    %91 = arith.addf %88, %90 : vector<8x32xf32>
    %92 = arith.addf %47, %91 : vector<8x32xf32>
    %c0_45 = arith.constant 0 : index
    %c0_46 = arith.constant 0 : index
    %c0_47 = arith.constant 0 : index
    %93 = vector.load %arg15[%c0_45, %c0_46, %c0_47] : memref<1x8x32xf32, #tpu.memory_space<vmem>>, vector<1x8x32xf32>
    %94 = vector.shape_cast %93 : vector<1x8x32xf32> to vector<8x32xf32>
    %95 = vector.shape_cast %92 : vector<8x32xf32> to vector<1x8x32xf32>
    tpu.vector_store %arg15[%c0_45, %c0_46, %c0_47], %95 {strides = array<i32>} : memref<1x8x32xf32, #tpu.memory_space<vmem>>, vector<1x8x32xf32>,
    return
  }
  func.func @transform_0(%arg0: i32, %arg1: i32) -> (i32, i32, i32) {
    %c0_i32 = arith.constant 0 : i32
    %c0_i32_0 = arith.constant 0 : i32
    %c0_i32_1 = arith.constant 0 : i32
    return %arg0, %c0_i32, %c0_i32_0 : i32, i32, i32
  }
  func.func @transform_1(%arg0: i32, %arg1: i32) -> (i32, i32) {
    %c0_i32 = arith.constant 0 : i32
    %c0_i32_0 = arith.constant 0 : i32
    %c0_i32_1 = arith.constant 0 : i32
    return %c0_i32, %c0_i32_0 : i32, i32
  }
  func.func @transform_2(%arg0: i32, %arg1: i32) -> (i32, i32) {
    %c0_i32 = arith.constant 0 : i32
    %c0_i32_0 = arith.constant 0 : i32
    %c0_i32_1 = arith.constant 0 : i32
    return %c0_i32, %c0_i32_0 : i32, i32
  }
  func.func @transform_3(%arg0: i32, %arg1: i32) -> (i32, i32) {
    %c0_i32 = arith.constant 0 : i32
    %c0_i32_0 = arith.constant 0 : i32
    %c0_i32_1 = arith.constant 0 : i32
    return %c0_i32, %c0_i32_0 : i32, i32
  }
  func.func @transform_4(%arg0: i32, %arg1: i32) -> (i32, i32) {
    %c0_i32 = arith.constant 0 : i32
    %c0_i32_0 = arith.constant 0 : i32
    %c0_i32_1 = arith.constant 0 : i32
    return %c0_i32, %c0_i32_0 : i32, i32
  }
  func.func @transform_5(%arg0: i32, %arg1: i32) -> (i32, i32, i32) {
    %c0_i32 = arith.constant 0 : i32
    %c0_i32_0 = arith.constant 0 : i32
    %c0_i32_1 = arith.constant 0 : i32
    %c0_i32_2 = arith.constant 0 : i32
    return %c0_i32, %c0_i32_0, %c0_i32_1 : i32, i32, i32
  }
  func.func @transform_6(%arg0: i32, %arg1: i32) -> (i32, i32) {
    %c0_i32 = arith.constant 0 : i32
    %c0_i32_0 = arith.constant 0 : i32
    %c0_i32_1 = arith.constant 0 : i32
    return %c0_i32, %c0_i32_0 : i32, i32
  }
  func.func @transform_7(%arg0: i32, %arg1: i32) -> (i32, i32) {
    %c0_i32 = arith.constant 0 : i32
    %c0_i32_0 = arith.constant 0 : i32
    %c0_i32_1 = arith.constant 0 : i32
    return %c0_i32, %c0_i32_0 : i32, i32
  }
  func.func @transform_8(%arg0: i32, %arg1: i32) -> (i32, i32) {
    %c0_i32 = arith.constant 0 : i32
    %c0_i32_0 = arith.constant 0 : i32
    %c0_i32_1 = arith.constant 0 : i32
    return %c0_i32, %c0_i32_0 : i32, i32
  }
  func.func @transform_9(%arg0: i32, %arg1: i32) -> (i32, i32) {
    %c0_i32 = arith.constant 0 : i32
    %c0_i32_0 = arith.constant 0 : i32
    %c0_i32_1 = arith.constant 0 : i32
    return %c0_i32, %c0_i32_0 : i32, i32
  }
  func.func @transform_10(%arg0: i32, %arg1: i32) -> (i32, i32) {
    %c0_i32 = arith.constant 0 : i32
    %c0_i32_0 = arith.constant 0 : i32
    %c0_i32_1 = arith.constant 0 : i32
    return %c0_i32, %c0_i32_0 : i32, i32
  }
  func.func @transform_11(%arg0: i32, %arg1: i32) -> (i32, i32) {
    %c0_i32 = arith.constant 0 : i32
    %c0_i32_0 = arith.constant 0 : i32
    %c0_i32_1 = arith.constant 0 : i32
    return %c0_i32, %c0_i32_0 : i32, i32
  }
  func.func @transform_12(%arg0: i32, %arg1: i32) -> (i32, i32) {
    %c0_i32 = arith.constant 0 : i32
    %c0_i32_0 = arith.constant 0 : i32
    %c0_i32_1 = arith.constant 0 : i32
    return %c0_i32, %c0_i32_0 : i32, i32
  }
  func.func @transform_13(%arg0: i32, %arg1: i32) -> (i32, i32, i32) {
    %c0_i32 = arith.constant 0 : i32
    %c0_i32_0 = arith.constant 0 : i32
    return %arg0, %arg1, %c0_i32 : i32, i32, i32
  }
}

module attributes {stable_mosaic.version = 11 : i64} {
  func.func @block_kernel(%arg0: i32, %arg1: i32, %arg2: memref<1x8x32xf32, #tpu.memory_space<vmem>>, %arg3: memref<1x32xf32, #tpu.memory_space<vmem>>, %arg4: memref<1x32xf32, #tpu.memory_space<vmem>>, %arg5: memref<32x96xbf16, #tpu.memory_space<vmem>>, %arg6: memref<1x96xf32, #tpu.memory_space<vmem>>, %arg7: memref<4x8x32xbf16, #tpu.memory_space<vmem>>, %arg8: memref<1x32xf32, #tpu.memory_space<vmem>>, %arg9: memref<1x32xf32, #tpu.memory_space<vmem>>, %arg10: memref<1x32xf32, #tpu.memory_space<vmem>>, %arg11: memref<32x128xbf16, #tpu.memory_space<vmem>>, %arg12: memref<1x128xf32, #tpu.memory_space<vmem>>, %arg13: memref<128x32xbf16, #tpu.memory_space<vmem>>, %arg14: memref<1x32xf32, #tpu.memory_space<vmem>>, %arg15: memref<1x8x32xf32, #tpu.memory_space<vmem>>, %arg16: memref<4x8x8xbf16, #tpu.memory_space<vmem>>, %arg17: memref<4x8x8xbf16, #tpu.memory_space<vmem>>, %arg18: memref<4x8x8xbf16, #tpu.memory_space<vmem>>) attributes {dimension_semantics = [#tpu.dimension_semantics<parallel>, #tpu.dimension_semantics<arbitrary>], iteration_bounds = array<i64: 2, 1>, scalar_prefetch = 0 : i64, scratch_operands = 3 : i64, tpu.core_type = #tpu.core_type<tc>, window_params = [{transform_indices = @transform_0, window_bounds = array<i64: 1, 8, 32>}, {pipeline_mode = #tpu.pipeline_mode<synchronous>, transform_indices = @transform_1, window_bounds = array<i64: 1, 32>}, {pipeline_mode = #tpu.pipeline_mode<synchronous>, transform_indices = @transform_2, window_bounds = array<i64: 1, 32>}, {pipeline_mode = #tpu.pipeline_mode<synchronous>, transform_indices = @transform_3, window_bounds = array<i64: 32, 96>}, {pipeline_mode = #tpu.pipeline_mode<synchronous>, transform_indices = @transform_4, window_bounds = array<i64: 1, 96>}, {pipeline_mode = #tpu.pipeline_mode<synchronous>, transform_indices = @transform_5, window_bounds = array<i64: 4, 8, 32>}, {pipeline_mode = #tpu.pipeline_mode<synchronous>, transform_indices = @transform_6, window_bounds = array<i64: 1, 32>}, {pipeline_mode = #tpu.pipeline_mode<synchronous>, transform_indices = @transform_7, window_bounds = array<i64: 1, 32>}, {pipeline_mode = #tpu.pipeline_mode<synchronous>, transform_indices = @transform_8, window_bounds = array<i64: 1, 32>}, {pipeline_mode = #tpu.pipeline_mode<synchronous>, transform_indices = @transform_9, window_bounds = array<i64: 32, 128>}, {pipeline_mode = #tpu.pipeline_mode<synchronous>, transform_indices = @transform_10, window_bounds = array<i64: 1, 128>}, {pipeline_mode = #tpu.pipeline_mode<synchronous>, transform_indices = @transform_11, window_bounds = array<i64: 128, 32>}, {pipeline_mode = #tpu.pipeline_mode<synchronous>, transform_indices = @transform_12, window_bounds = array<i64: 1, 32>}, {transform_indices = @transform_13, window_bounds = array<i64: 1, 8, 32>}]} {
    %c0_i32 = arith.constant 0 : i32
    %0 = arith.cmpi eq, %arg1, %c0_i32 : i32
    %1 = arith.extui %0 : i1 to i32
    %c0_i32_0 = arith.constant 0 : i32
    %2 = arith.cmpi ne, %1, %c0_i32_0 : i32
    scf.if %2 {
      %c0_48 = arith.constant 0 : index
      %c0_49 = arith.constant 0 : index
      %c0_50 = arith.constant 0 : index
      %96 = vector.load %arg2[%c0_48, %c0_49, %c0_50] : memref<1x8x32xf32, #tpu.memory_space<vmem>>, vector<1x8x32xf32>
      %97 = vector.shape_cast %96 : vector<1x8x32xf32> to vector<8x32xf32>
      %c0_51 = arith.constant 0 : index
      %c0_52 = arith.constant 0 : index
      %98 = vector.load %arg3[%c0_51, %c0_52] : memref<1x32xf32, #tpu.memory_space<vmem>>, vector<1x32xf32>
      %c0_53 = arith.constant 0 : index
      %c0_54 = arith.constant 0 : index
      %99 = vector.load %arg4[%c0_53, %c0_54] : memref<1x32xf32, #tpu.memory_space<vmem>>, vector<1x32xf32>
      %cst_55 = arith.constant dense<0.000000e+00> : vector<8xf32>
      %100 = vector.multi_reduction <add>, %97, %cst_55 [1] : vector<8x32xf32> to vector<8xf32>
      %101 = vector.shape_cast %100 : vector<8xf32> to vector<8x1xf32>
      %cst_56 = arith.constant 3.200000e+01 : f32
      %102 = vector.broadcast %cst_56 : f32 to vector<8x1xf32>
      %103 = arith.divf %101, %102 : vector<8x1xf32>
      %104 = vector.broadcast %103 : vector<8x1xf32> to vector<8x32xf32>
      %105 = arith.subf %97, %104 : vector<8x32xf32>
      %106 = arith.mulf %105, %105 : vector<8x32xf32>
      %cst_57 = arith.constant dense<0.000000e+00> : vector<8xf32>
      %107 = vector.multi_reduction <add>, %106, %cst_57 [1] : vector<8x32xf32> to vector<8xf32>
      %108 = vector.shape_cast %107 : vector<8xf32> to vector<8x1xf32>
      %cst_58 = arith.constant 3.200000e+01 : f32
      %109 = vector.broadcast %cst_58 : f32 to vector<8x1xf32>
      %110 = arith.divf %108, %109 : vector<8x1xf32>
      %111 = vector.broadcast %103 : vector<8x1xf32> to vector<8x32xf32>
      %112 = arith.subf %97, %111 : vector<8x32xf32>
      %cst_59 = arith.constant 9.99999974E-6 : f32
      %113 = vector.broadcast %cst_59 : f32 to vector<8x1xf32>
      %114 = arith.addf %110, %113 : vector<8x1xf32>
      %115 = math.rsqrt %114 : vector<8x1xf32>
      %116 = vector.broadcast %115 : vector<8x1xf32> to vector<8x32xf32>
      %117 = arith.mulf %112, %116 : vector<8x32xf32>
      %118 = vector.broadcast %98 : vector<1x32xf32> to vector<8x32xf32>
      %119 = arith.mulf %117, %118 : vector<8x32xf32>
      %120 = vector.broadcast %99 : vector<1x32xf32> to vector<8x32xf32>
      %121 = arith.addf %119, %120 : vector<8x32xf32>
      %122 = arith.truncf %121 : vector<8x32xf32> to vector<8x32xbf16>
      %c0_60 = arith.constant 0 : index
      %c0_61 = arith.constant 0 : index
      %123 = vector.load %arg5[%c0_60, %c0_61] : memref<32x96xbf16, #tpu.memory_space<vmem>>, vector<32x96xbf16>
      %cst_62 = arith.constant dense<0.000000e+00> : vector<8x96xf32>
      %124 = tpu.matmul %122, %123, %cst_62 {dimension_numbers = #tpu.dot_dimension_numbers<[1], [0], [0], [1], [0, 0, 1, 1], [], []>} : vector<8x32xbf16>, vector<32x96xbf16>, vector<8x96xf32> -> vector<8x96xf32>
      %c0_63 = arith.constant 0 : index
      %c0_64 = arith.constant 0 : index
      %125 = vector.load %arg6[%c0_63, %c0_64] : memref<1x96xf32, #tpu.memory_space<vmem>>, vector<1x96xf32>
      %126 = vector.broadcast %125 : vector<1x96xf32> to vector<8x96xf32>
      %127 = arith.addf %124, %126 : vector<8x96xf32>
      %128 = vector.extract_strided_slice %127 {offsets = [0, 0], sizes = [8, 8], strides = [1, 1]} : vector<8x96xf32> to vector<8x8xf32>
      %cst_65 = arith.constant 0.353553385 : f32
      %129 = vector.broadcast %cst_65 : f32 to vector<8x8xf32>
      %130 = arith.mulf %128, %129 : vector<8x8xf32>
      %131 = arith.truncf %130 : vector<8x8xf32> to vector<8x8xbf16>
      %c0_66 = arith.constant 0 : index
      %c0_67 = arith.constant 0 : index
      %c0_68 = arith.constant 0 : index
      %132 = vector.load %arg16[%c0_66, %c0_67, %c0_68] : memref<4x8x8xbf16, #tpu.memory_space<vmem>>, vector<1x8x8xbf16>
      %133 = vector.shape_cast %132 : vector<1x8x8xbf16> to vector<8x8xbf16>
      %134 = vector.shape_cast %131 : vector<8x8xbf16> to vector<1x8x8xbf16>
      tpu.vector_store %arg16[%c0_66, %c0_67, %c0_68], %134 {strides = array<i32>} : memref<4x8x8xbf16, #tpu.memory_space<vmem>>, vector<1x8x8xbf16>,
      %135 = vector.extract_strided_slice %127 {offsets = [0, 32], sizes = [8, 8], strides = [1, 1]} : vector<8x96xf32> to vector<8x8xf32>
      %136 = arith.truncf %135 : vector<8x8xf32> to vector<8x8xbf16>
      %c0_69 = arith.constant 0 : index
      %c0_70 = arith.constant 0 : index
      %c0_71 = arith.constant 0 : index
      %137 = vector.load %arg17[%c0_69, %c0_70, %c0_71] : memref<4x8x8xbf16, #tpu.memory_space<vmem>>, vector<1x8x8xbf16>
      %138 = vector.shape_cast %137 : vector<1x8x8xbf16> to vector<8x8xbf16>
      %139 = vector.shape_cast %136 : vector<8x8xbf16> to vector<1x8x8xbf16>
      tpu.vector_store %arg17[%c0_69, %c0_70, %c0_71], %139 {strides = array<i32>} : memref<4x8x8xbf16, #tpu.memory_space<vmem>>, vector<1x8x8xbf16>,
      %140 = vector.extract_strided_slice %127 {offsets = [0, 64], sizes = [8, 8], strides = [1, 1]} : vector<8x96xf32> to vector<8x8xf32>
      %141 = arith.truncf %140 : vector<8x8xf32> to vector<8x8xbf16>
      %c0_72 = arith.constant 0 : index
      %c0_73 = arith.constant 0 : index
      %c0_74 = arith.constant 0 : index
      %142 = vector.load %arg18[%c0_72, %c0_73, %c0_74] : memref<4x8x8xbf16, #tpu.memory_space<vmem>>, vector<1x8x8xbf16>
      %143 = vector.shape_cast %142 : vector<1x8x8xbf16> to vector<8x8xbf16>
      %144 = vector.shape_cast %141 : vector<8x8xbf16> to vector<1x8x8xbf16>
      tpu.vector_store %arg18[%c0_72, %c0_73, %c0_74], %144 {strides = array<i32>} : memref<4x8x8xbf16, #tpu.memory_space<vmem>>, vector<1x8x8xbf16>,
      %145 = vector.extract_strided_slice %127 {offsets = [0, 8], sizes = [8, 8], strides = [1, 1]} : vector<8x96xf32> to vector<8x8xf32>
      %cst_75 = arith.constant 0.353553385 : f32
      %146 = vector.broadcast %cst_75 : f32 to vector<8x8xf32>
      %147 = arith.mulf %145, %146 : vector<8x8xf32>
      %148 = arith.truncf %147 : vector<8x8xf32> to vector<8x8xbf16>
      %c1_76 = arith.constant 1 : index
      %c0_77 = arith.constant 0 : index
      %c0_78 = arith.constant 0 : index
      %149 = vector.load %arg16[%c1_76, %c0_77, %c0_78] : memref<4x8x8xbf16, #tpu.memory_space<vmem>>, vector<1x8x8xbf16>
      %150 = vector.shape_cast %149 : vector<1x8x8xbf16> to vector<8x8xbf16>
      %151 = vector.shape_cast %148 : vector<8x8xbf16> to vector<1x8x8xbf16>
      tpu.vector_store %arg16[%c1_76, %c0_77, %c0_78], %151 {strides = array<i32>} : memref<4x8x8xbf16, #tpu.memory_space<vmem>>, vector<1x8x8xbf16>,
      %152 = vector.extract_strided_slice %127 {offsets = [0, 40], sizes = [8, 8], strides = [1, 1]} : vector<8x96xf32> to vector<8x8xf32>
      %153 = arith.truncf %152 : vector<8x8xf32> to vector<8x8xbf16>
      %c1_79 = arith.constant 1 : index
      %c0_80 = arith.constant 0 : index
      %c0_81 = arith.constant 0 : index
      %154 = vector.load %arg17[%c1_79, %c0_80, %c0_81] : memref<4x8x8xbf16, #tpu.memory_space<vmem>>, vector<1x8x8xbf16>
      %155 = vector.shape_cast %154 : vector<1x8x8xbf16> to vector<8x8xbf16>
      %156 = vector.shape_cast %153 : vector<8x8xbf16> to vector<1x8x8xbf16>
      tpu.vector_store %arg17[%c1_79, %c0_80, %c0_81], %156 {strides = array<i32>} : memref<4x8x8xbf16, #tpu.memory_space<vmem>>, vector<1x8x8xbf16>,
      %157 = vector.extract_strided_slice %127 {offsets = [0, 72], sizes = [8, 8], strides = [1, 1]} : vector<8x96xf32> to vector<8x8xf32>
      %158 = arith.truncf %157 : vector<8x8xf32> to vector<8x8xbf16>
      %c1_82 = arith.constant 1 : index
      %c0_83 = arith.constant 0 : index
      %c0_84 = arith.constant 0 : index
      %159 = vector.load %arg18[%c1_82, %c0_83, %c0_84] : memref<4x8x8xbf16, #tpu.memory_space<vmem>>, vector<1x8x8xbf16>
      %160 = vector.shape_cast %159 : vector<1x8x8xbf16> to vector<8x8xbf16>
      %161 = vector.shape_cast %158 : vector<8x8xbf16> to vector<1x8x8xbf16>
      tpu.vector_store %arg18[%c1_82, %c0_83, %c0_84], %161 {strides = array<i32>} : memref<4x8x8xbf16, #tpu.memory_space<vmem>>, vector<1x8x8xbf16>,
      %162 = vector.extract_strided_slice %127 {offsets = [0, 16], sizes = [8, 8], strides = [1, 1]} : vector<8x96xf32> to vector<8x8xf32>
      %cst_85 = arith.constant 0.353553385 : f32
      %163 = vector.broadcast %cst_85 : f32 to vector<8x8xf32>
      %164 = arith.mulf %162, %163 : vector<8x8xf32>
      %165 = arith.truncf %164 : vector<8x8xf32> to vector<8x8xbf16>
      %c2_86 = arith.constant 2 : index
      %c0_87 = arith.constant 0 : index
      %c0_88 = arith.constant 0 : index
      %166 = vector.load %arg16[%c2_86, %c0_87, %c0_88] : memref<4x8x8xbf16, #tpu.memory_space<vmem>>, vector<1x8x8xbf16>
      %167 = vector.shape_cast %166 : vector<1x8x8xbf16> to vector<8x8xbf16>
      %168 = vector.shape_cast %165 : vector<8x8xbf16> to vector<1x8x8xbf16>
      tpu.vector_store %arg16[%c2_86, %c0_87, %c0_88], %168 {strides = array<i32>} : memref<4x8x8xbf16, #tpu.memory_space<vmem>>, vector<1x8x8xbf16>,
      %169 = vector.extract_strided_slice %127 {offsets = [0, 48], sizes = [8, 8], strides = [1, 1]} : vector<8x96xf32> to vector<8x8xf32>
      %170 = arith.truncf %169 : vector<8x8xf32> to vector<8x8xbf16>
      %c2_89 = arith.constant 2 : index
      %c0_90 = arith.constant 0 : index
      %c0_91 = arith.constant 0 : index
      %171 = vector.load %arg17[%c2_89, %c0_90, %c0_91] : memref<4x8x8xbf16, #tpu.memory_space<vmem>>, vector<1x8x8xbf16>
      %172 = vector.shape_cast %171 : vector<1x8x8xbf16> to vector<8x8xbf16>
      %173 = vector.shape_cast %170 : vector<8x8xbf16> to vector<1x8x8xbf16>
      tpu.vector_store %arg17[%c2_89, %c0_90, %c0_91], %173 {strides = array<i32>} : memref<4x8x8xbf16, #tpu.memory_space<vmem>>, vector<1x8x8xbf16>,
      %174 = vector.extract_strided_slice %127 {offsets = [0, 80], sizes = [8, 8], strides = [1, 1]} : vector<8x96xf32> to vector<8x8xf32>
      %175 = arith.truncf %174 : vector<8x8xf32> to vector<8x8xbf16>
      %c2_92 = arith.constant 2 : index
      %c0_93 = arith.constant 0 : index
      %c0_94 = arith.constant 0 : index
      %176 = vector.load %arg18[%c2_92, %c0_93, %c0_94] : memref<4x8x8xbf16, #tpu.memory_space<vmem>>, vector<1x8x8xbf16>
      %177 = vector.shape_cast %176 : vector<1x8x8xbf16> to vector<8x8xbf16>
      %178 = vector.shape_cast %175 : vector<8x8xbf16> to vector<1x8x8xbf16>
      tpu.vector_store %arg18[%c2_92, %c0_93, %c0_94], %178 {strides = array<i32>} : memref<4x8x8xbf16, #tpu.memory_space<vmem>>, vector<1x8x8xbf16>,
      %179 = vector.extract_strided_slice %127 {offsets = [0, 24], sizes = [8, 8], strides = [1, 1]} : vector<8x96xf32> to vector<8x8xf32>
      %cst_95 = arith.constant 0.353553385 : f32
      %180 = vector.broadcast %cst_95 : f32 to vector<8x8xf32>
      %181 = arith.mulf %179, %180 : vector<8x8xf32>
      %182 = arith.truncf %181 : vector<8x8xf32> to vector<8x8xbf16>
      %c3_96 = arith.constant 3 : index
      %c0_97 = arith.constant 0 : index
      %c0_98 = arith.constant 0 : index
      %183 = vector.load %arg16[%c3_96, %c0_97, %c0_98] : memref<4x8x8xbf16, #tpu.memory_space<vmem>>, vector<1x8x8xbf16>
      %184 = vector.shape_cast %183 : vector<1x8x8xbf16> to vector<8x8xbf16>
      %185 = vector.shape_cast %182 : vector<8x8xbf16> to vector<1x8x8xbf16>
      tpu.vector_store %arg16[%c3_96, %c0_97, %c0_98], %185 {strides = array<i32>} : memref<4x8x8xbf16, #tpu.memory_space<vmem>>, vector<1x8x8xbf16>,
      %186 = vector.extract_strided_slice %127 {offsets = [0, 56], sizes = [8, 8], strides = [1, 1]} : vector<8x96xf32> to vector<8x8xf32>
      %187 = arith.truncf %186 : vector<8x8xf32> to vector<8x8xbf16>
      %c3_99 = arith.constant 3 : index
      %c0_100 = arith.constant 0 : index
      %c0_101 = arith.constant 0 : index
      %188 = vector.load %arg17[%c3_99, %c0_100, %c0_101] : memref<4x8x8xbf16, #tpu.memory_space<vmem>>, vector<1x8x8xbf16>
      %189 = vector.shape_cast %188 : vector<1x8x8xbf16> to vector<8x8xbf16>
      %190 = vector.shape_cast %187 : vector<8x8xbf16> to vector<1x8x8xbf16>
      tpu.vector_store %arg17[%c3_99, %c0_100, %c0_101], %190 {strides = array<i32>} : memref<4x8x8xbf16, #tpu.memory_space<vmem>>, vector<1x8x8xbf16>,
      %191 = vector.extract_strided_slice %127 {offsets = [0, 88], sizes = [8, 8], strides = [1, 1]} : vector<8x96xf32> to vector<8x8xf32>
      %192 = arith.truncf %191 : vector<8x8xf32> to vector<8x8xbf16>
      %c3_102 = arith.constant 3 : index
      %c0_103 = arith.constant 0 : index
      %c0_104 = arith.constant 0 : index
      %193 = vector.load %arg18[%c3_102, %c0_103, %c0_104] : memref<4x8x8xbf16, #tpu.memory_space<vmem>>, vector<1x8x8xbf16>
      %194 = vector.shape_cast %193 : vector<1x8x8xbf16> to vector<8x8xbf16>
      %195 = vector.shape_cast %192 : vector<8x8xbf16> to vector<1x8x8xbf16>
      tpu.vector_store %arg18[%c3_102, %c0_103, %c0_104], %195 {strides = array<i32>} : memref<4x8x8xbf16, #tpu.memory_space<vmem>>, vector<1x8x8xbf16>,
    } else {
    }
    %c8_i32 = arith.constant 8 : i32
    %3 = arith.muli %arg1, %c8_i32 : i32
    %4 = tpu.assume_multiple %3, 8 : i32
    %c0 = arith.constant 0 : index
    %5 = arith.index_cast %4 : i32 to index
    %c0_1 = arith.constant 0 : index
    %6 = vector.load %arg16[%c0, %5, %c0_1] : memref<4x8x8xbf16, #tpu.memory_space<vmem>>, vector<4x8x8xbf16>
    %cst = arith.constant -1.000000e+30 : f32
    %7 = vector.broadcast %cst : f32 to vector<4x8x1xf32>
    %cst_2 = arith.constant 0.000000e+00 : f32
    %8 = vector.broadcast %cst_2 : f32 to vector<4x8x1xf32>
    %cst_3 = arith.constant 0.000000e+00 : f32
    %9 = vector.broadcast %cst_3 : f32 to vector<4x8x8xf32>
    %c1_i32 = arith.constant 1 : i32
    %10 = arith.addi %arg1, %c1_i32 : i32
    %c0_i32_4 = arith.constant 0 : i32
    %11 = arith.subi %10, %c0_i32_4 : i32
    %12 = arith.addi %c0_i32_4, %11 : i32
    %c1_i32_5 = arith.constant 1 : i32
    %13:3 = scf.for %arg19 = %c0_i32_4 to %12 step %c1_i32_5 iter_args(%arg20 = %7, %arg21 = %8, %arg22 = %9) -> (vector<4x8x1xf32>, vector<4x8x1xf32>, vector<4x8x8xf32>)  : i32 {
      %c8_i32_48 = arith.constant 8 : i32
      %96 = arith.muli %arg19, %c8_i32_48 : i32
      %97 = tpu.assume_multiple %96, 8 : i32
      %c0_49 = arith.constant 0 : index
      %98 = arith.index_cast %97 : i32 to index
      %c0_50 = arith.constant 0 : index
      %99 = vector.load %arg17[%c0_49, %98, %c0_50] : memref<4x8x8xbf16, #tpu.memory_space<vmem>>, vector<4x8x8xbf16>
      %c0_51 = arith.constant 0 : index
      %100 = arith.index_cast %97 : i32 to index
      %c0_52 = arith.constant 0 : index
      %101 = vector.load %arg18[%c0_51, %100, %c0_52] : memref<4x8x8xbf16, #tpu.memory_space<vmem>>, vector<4x8x8xbf16>
      "tpu.trace_start"() <{level = 10 : i32, message = "hqd,hkd->hqk"}> : () -> ()
      %cst_53 = arith.constant dense<0.000000e+00> : vector<4x8x8xf32>
      %102 = tpu.matmul %6, %99, %cst_53 {dimension_numbers = #tpu.dot_dimension_numbers<[2], [2], [1], [1], [0, 0, 0, 1, 1, 1], [0], [0]>} : vector<4x8x8xbf16>, vector<4x8x8xbf16>, vector<4x8x8xf32> -> vector<4x8x8xf32>
      "tpu.trace_stop"() : () -> ()
      %103 = tpu.iota {dimensions = array<i32: 0>} : vector<8x8xi32>
      %104 = vector.broadcast %4 : i32 to vector<8x8xi32>
      %105 = arith.addi %104, %103 : vector<8x8xi32>
      %106 = tpu.iota {dimensions = array<i32: 1>} : vector<8x8xi32>
      %107 = vector.broadcast %97 : i32 to vector<8x8xi32>
      %108 = arith.addi %107, %106 : vector<8x8xi32>
      %109 = arith.cmpi sle, %108, %105 : vector<8x8xi32>
      %110 = vector.shape_cast %109 : vector<8x8xi1> to vector<1x8x8xi1>
      %cst_54 = arith.constant -1.000000e+30 : f32
      %111 = vector.shape_cast %110 : vector<1x8x8xi1> to vector<1x8x8xi1>
      %112 = vector.broadcast %111 : vector<1x8x8xi1> to vector<4x8x8xi1>
      %113 = vector.broadcast %cst_54 : f32 to vector<4x8x8xf32>
      %114 = arith.select %112, %102, %113 : vector<4x8x8xi1>, vector<4x8x8xf32>
      %cst_55 = arith.constant dense<0xFF800000> : vector<4x8xf32>
      %115 = vector.multi_reduction <maximumf>, %114, %cst_55 [2] : vector<4x8x8xf32> to vector<4x8xf32>
      %116 = vector.shape_cast %115 : vector<4x8xf32> to vector<4x8x1xf32>
      %117 = arith.maximumf %arg20, %116 : vector<4x8x1xf32>
      %118 = arith.subf %arg20, %117 : vector<4x8x1xf32>
      %119 = math.exp %118 : vector<4x8x1xf32>
      %120 = vector.broadcast %117 : vector<4x8x1xf32> to vector<4x8x8xf32>
      %121 = arith.subf %114, %120 : vector<4x8x8xf32>
      %122 = math.exp %121 : vector<4x8x8xf32>
      %123 = arith.mulf %119, %arg21 : vector<4x8x1xf32>
      %cst_56 = arith.constant dense<0.000000e+00> : vector<4x8xf32>
      %124 = vector.multi_reduction <add>, %122, %cst_56 [2] : vector<4x8x8xf32> to vector<4x8xf32>
      %125 = vector.shape_cast %124 : vector<4x8xf32> to vector<4x8x1xf32>
      %126 = arith.addf %123, %125 : vector<4x8x1xf32>
      %127 = vector.broadcast %119 : vector<4x8x1xf32> to vector<4x8x8xf32>
      %128 = arith.mulf %127, %arg22 : vector<4x8x8xf32>
      %129 = arith.truncf %122 : vector<4x8x8xf32> to vector<4x8x8xbf16>
      "tpu.trace_start"() <{level = 10 : i32, message = "hqk,hkd->hqd"}> : () -> ()
      %cst_57 = arith.constant dense<0.000000e+00> : vector<4x8x8xf32>
      %130 = tpu.matmul %129, %101, %cst_57 {dimension_numbers = #tpu.dot_dimension_numbers<[2], [1], [1], [2], [0, 0, 0, 1, 1, 2], [0], [0]>} : vector<4x8x8xbf16>, vector<4x8x8xbf16>, vector<4x8x8xf32> -> vector<4x8x8xf32>
      "tpu.trace_stop"() : () -> ()
      %131 = arith.addf %128, %130 : vector<4x8x8xf32>
      scf.yield %117, %126, %131 : vector<4x8x1xf32>, vector<4x8x1xf32>, vector<4x8x8xf32>
    }
    %14 = tpu.reciprocal %13#1 : vector<4x8x1xf32> -> vector<4x8x1xf32>
    %15 = vector.broadcast %14 : vector<4x8x1xf32> to vector<4x8x8xf32>
    %16 = arith.mulf %13#2, %15 : vector<4x8x8xf32>
    %17 = arith.truncf %16 : vector<4x8x8xf32> to vector<4x8x8xbf16>
    %18 = vector.extract_strided_slice %17 {offsets = [0, 0, 0], sizes = [1, 8, 8], strides = [1, 1, 1]} : vector<4x8x8xbf16> to vector<1x8x8xbf16>
    %19 = vector.shape_cast %18 : vector<1x8x8xbf16> to vector<8x8xbf16>
    %c0_6 = arith.constant 0 : index
    %c0_7 = arith.constant 0 : index
    %c0_8 = arith.constant 0 : index
    %20 = vector.load %arg7[%c0_6, %c0_7, %c0_8] : memref<4x8x32xbf16, #tpu.memory_space<vmem>>, vector<1x8x32xbf16>
    %21 = vector.shape_cast %20 : vector<1x8x32xbf16> to vector<8x32xbf16>
    %cst_9 = arith.constant dense<0.000000e+00> : vector<8x32xf32>
    %22 = tpu.matmul %19, %21, %cst_9 {dimension_numbers = #tpu.dot_dimension_numbers<[1], [0], [0], [1], [0, 0, 1, 1], [], []>} : vector<8x8xbf16>, vector<8x32xbf16>, vector<8x32xf32> -> vector<8x32xf32>
    %23 = vector.extract_strided_slice %17 {offsets = [1, 0, 0], sizes = [1, 8, 8], strides = [1, 1, 1]} : vector<4x8x8xbf16> to vector<1x8x8xbf16>
    %24 = vector.shape_cast %23 : vector<1x8x8xbf16> to vector<8x8xbf16>
    %c1 = arith.constant 1 : index
    %c0_10 = arith.constant 0 : index
    %c0_11 = arith.constant 0 : index
    %25 = vector.load %arg7[%c1, %c0_10, %c0_11] : memref<4x8x32xbf16, #tpu.memory_space<vmem>>, vector<1x8x32xbf16>
    %26 = vector.shape_cast %25 : vector<1x8x32xbf16> to vector<8x32xbf16>
    %cst_12 = arith.constant dense<0.000000e+00> : vector<8x32xf32>
    %27 = tpu.matmul %24, %26, %cst_12 {dimension_numbers = #tpu.dot_dimension_numbers<[1], [0], [0], [1], [0, 0, 1, 1], [], []>} : vector<8x8xbf16>, vector<8x32xbf16>, vector<8x32xf32> -> vector<8x32xf32>
    %28 = arith.addf %22, %27 : vector<8x32xf32>
    %29 = vector.extract_strided_slice %17 {offsets = [2, 0, 0], sizes = [1, 8, 8], strides = [1, 1, 1]} : vector<4x8x8xbf16> to vector<1x8x8xbf16>
    %30 = vector.shape_cast %29 : vector<1x8x8xbf16> to vector<8x8xbf16>
    %c2 = arith.constant 2 : index
    %c0_13 = arith.constant 0 : index
    %c0_14 = arith.constant 0 : index
    %31 = vector.load %arg7[%c2, %c0_13, %c0_14] : memref<4x8x32xbf16, #tpu.memory_space<vmem>>, vector<1x8x32xbf16>
    %32 = vector.shape_cast %31 : vector<1x8x32xbf16> to vector<8x32xbf16>
    %cst_15 = arith.constant dense<0.000000e+00> : vector<8x32xf32>
    %33 = tpu.matmul %30, %32, %cst_15 {dimension_numbers = #tpu.dot_dimension_numbers<[1], [0], [0], [1], [0, 0, 1, 1], [], []>} : vector<8x8xbf16>, vector<8x32xbf16>, vector<8x32xf32> -> vector<8x32xf32>
    %34 = arith.addf %28, %33 : vector<8x32xf32>
    %35 = vector.extract_strided_slice %17 {offsets = [3, 0, 0], sizes = [1, 8, 8], strides = [1, 1, 1]} : vector<4x8x8xbf16> to vector<1x8x8xbf16>
    %36 = vector.shape_cast %35 : vector<1x8x8xbf16> to vector<8x8xbf16>
    %c3 = arith.constant 3 : index
    %c0_16 = arith.constant 0 : index
    %c0_17 = arith.constant 0 : index
    %37 = vector.load %arg7[%c3, %c0_16, %c0_17] : memref<4x8x32xbf16, #tpu.memory_space<vmem>>, vector<1x8x32xbf16>
    %38 = vector.shape_cast %37 : vector<1x8x32xbf16> to vector<8x32xbf16>
    %cst_18 = arith.constant dense<0.000000e+00> : vector<8x32xf32>
    %39 = tpu.matmul %36, %38, %cst_18 {dimension_numbers = #tpu.dot_dimension_numbers<[1], [0], [0], [1], [0, 0, 1, 1], [], []>} : vector<8x8xbf16>, vector<8x32xbf16>, vector<8x32xf32> -> vector<8x32xf32>
    %40 = arith.addf %34, %39 : vector<8x32xf32>
    %c0_19 = arith.constant 0 : index
    %c0_20 = arith.constant 0 : index
    %41 = vector.load %arg8[%c0_19, %c0_20] : memref<1x32xf32, #tpu.memory_space<vmem>>, vector<1x32xf32>
    %42 = vector.broadcast %41 : vector<1x32xf32> to vector<8x32xf32>
    %43 = arith.addf %40, %42 : vector<8x32xf32>
    %c0_21 = arith.constant 0 : index
    %44 = arith.index_cast %4 : i32 to index
    %c0_22 = arith.constant 0 : index
    %45 = vector.load %arg2[%c0_21, %44, %c0_22] : memref<1x8x32xf32, #tpu.memory_space<vmem>>, vector<1x8x32xf32>
    %46 = vector.shape_cast %45 : vector<1x8x32xf32> to vector<8x32xf32>
    %47 = arith.addf %46, %43 : vector<8x32xf32>
    %c0_23 = arith.constant 0 : index
    %c0_24 = arith.constant 0 : index
    %48 = vector.load %arg9[%c0_23, %c0_24] : memref<1x32xf32, #tpu.memory_space<vmem>>, vector<1x32xf32>
    %c0_25 = arith.constant 0 : index
    %c0_26 = arith.constant 0 : index
    %49 = vector.load %arg10[%c0_25, %c0_26] : memref<1x32xf32, #tpu.memory_space<vmem>>, vector<1x32xf32>
    %cst_27 = arith.constant dense<0.000000e+00> : vector<8xf32>
    %50 = vector.multi_reduction <add>, %47, %cst_27 [1] : vector<8x32xf32> to vector<8xf32>
    %51 = vector.shape_cast %50 : vector<8xf32> to vector<8x1xf32>
    %cst_28 = arith.constant 3.200000e+01 : f32
    %52 = vector.broadcast %cst_28 : f32 to vector<8x1xf32>
    %53 = arith.divf %51, %52 : vector<8x1xf32>
    %54 = vector.broadcast %53 : vector<8x1xf32> to vector<8x32xf32>
    %55 = arith.subf %47, %54 : vector<8x32xf32>
    %56 = arith.mulf %55, %55 : vector<8x32xf32>
    %cst_29 = arith.constant dense<0.000000e+00> : vector<8xf32>
    %57 = vector.multi_reduction <add>, %56, %cst_29 [1] : vector<8x32xf32> to vector<8xf32>
    %58 = vector.shape_cast %57 : vector<8xf32> to vector<8x1xf32>
    %cst_30 = arith.constant 3.200000e+01 : f32
    %59 = vector.broadcast %cst_30 : f32 to vector<8x1xf32>
    %60 = arith.divf %58, %59 : vector<8x1xf32>
    %61 = vector.broadcast %53 : vector<8x1xf32> to vector<8x32xf32>
    %62 = arith.subf %47, %61 : vector<8x32xf32>
    %cst_31 = arith.constant 9.99999974E-6 : f32
    %63 = vector.broadcast %cst_31 : f32 to vector<8x1xf32>
    %64 = arith.addf %60, %63 : vector<8x1xf32>
    %65 = math.rsqrt %64 : vector<8x1xf32>
    %66 = vector.broadcast %65 : vector<8x1xf32> to vector<8x32xf32>
    %67 = arith.mulf %62, %66 : vector<8x32xf32>
    %68 = vector.broadcast %48 : vector<1x32xf32> to vector<8x32xf32>
    %69 = arith.mulf %67, %68 : vector<8x32xf32>
    %70 = vector.broadcast %49 : vector<1x32xf32> to vector<8x32xf32>
    %71 = arith.addf %69, %70 : vector<8x32xf32>
    %72 = arith.truncf %71 : vector<8x32xf32> to vector<8x32xbf16>
    %c0_32 = arith.constant 0 : index
    %c0_33 = arith.constant 0 : index
    %73 = vector.load %arg11[%c0_32, %c0_33] : memref<32x128xbf16, #tpu.memory_space<vmem>>, vector<32x128xbf16>
    %cst_34 = arith.constant dense<0.000000e+00> : vector<8x128xf32>
    %74 = tpu.matmul %72, %73, %cst_34 {dimension_numbers = #tpu.dot_dimension_numbers<[1], [0], [0], [1], [0, 0, 1, 1], [], []>} : vector<8x32xbf16>, vector<32x128xbf16>, vector<8x128xf32> -> vector<8x128xf32>
    %c0_35 = arith.constant 0 : index
    %c0_36 = arith.constant 0 : index
    %75 = vector.load %arg12[%c0_35, %c0_36] : memref<1x128xf32, #tpu.memory_space<vmem>>, vector<1x128xf32>
    %76 = vector.broadcast %75 : vector<1x128xf32> to vector<8x128xf32>
    %77 = arith.addf %74, %76 : vector<8x128xf32>
    %cst_37 = arith.constant 5.000000e-01 : f32
    %78 = vector.broadcast %cst_37 : f32 to vector<8x128xf32>
    %79 = arith.mulf %78, %77 : vector<8x128xf32>
    %cst_38 = arith.constant 0.707106769 : f32
    %80 = vector.broadcast %cst_38 : f32 to vector<8x128xf32>
    %81 = arith.mulf %77, %80 : vector<8x128xf32>
    %82 = math.erf %81 : vector<8x128xf32>
    %cst_39 = arith.constant 1.000000e+00 : f32
    %83 = vector.broadcast %cst_39 : f32 to vector<8x128xf32>
    %84 = arith.addf %83, %82 : vector<8x128xf32>
    %85 = arith.mulf %79, %84 : vector<8x128xf32>
    %86 = arith.truncf %85 : vector<8x128xf32> to vector<8x128xbf16>
    %c0_40 = arith.constant 0 : index
    %c0_41 = arith.constant 0 : index
    %87 = vector.load %arg13[%c0_40, %c0_41] : memref<128x32xbf16, #tpu.memory_space<vmem>>, vector<128x32xbf16>
    %cst_42 = arith.constant dense<0.000000e+00> : vector<8x32xf32>
    %88 = tpu.matmul %86, %87, %cst_42 {dimension_numbers = #tpu.dot_dimension_numbers<[1], [0], [0], [1], [0, 0, 1, 1], [], []>} : vector<8x128xbf16>, vector<128x32xbf16>, vector<8x32xf32> -> vector<8x32xf32>
    %c0_43 = arith.constant 0 : index
    %c0_44 = arith.constant 0 : index
    %89 = vector.load %arg14[%c0_43, %c0_44] : memref<1x32xf32, #tpu.memory_space<vmem>>, vector<1x32xf32>
    %90 = vector.broadcast %89 : vector<1x32xf32> to vector<8x32xf32>
    %91 = arith.addf %88, %90 : vector<8x32xf32>
    %92 = arith.addf %47, %91 : vector<8x32xf32>
    %c0_45 = arith.constant 0 : index
    %c0_46 = arith.constant 0 : index
    %c0_47 = arith.constant 0 : index
    %93 = vector.load %arg15[%c0_45, %c0_46, %c0_47] : memref<1x8x32xf32, #tpu.memory_space<vmem>>, vector<1x8x32xf32>
    %94 = vector.shape_cast %93 : vector<1x8x32xf32> to vector<8x32xf32>
    %95 = vector.shape_cast %92 : vector<8x32xf32> to vector<1x8x32xf32>
    tpu.vector_store %arg15[%c0_45, %c0_46, %c0_47], %95 {strides = array<i32>} : memref<1x8x32xf32, #tpu.memory_space<vmem>>, vector<1x8x32xf32>,
    return
  }
  func.func @transform_0(%arg0: i32, %arg1: i32) -> (i32, i32, i32) {
    %c0_i32 = arith.constant 0 : i32
    %c0_i32_0 = arith.constant 0 : i32
    %c0_i32_1 = arith.constant 0 : i32
    return %arg0, %c0_i32, %c0_i32_0 : i32, i32, i32
  }
  func.func @transform_1(%arg0: i32, %arg1: i32) -> (i32, i32) {
    %c0_i32 = arith.constant 0 : i32
    %c0_i32_0 = arith.constant 0 : i32
    %c0_i32_1 = arith.constant 0 : i32
    return %c0_i32, %c0_i32_0 : i32, i32
  }
  func.func @transform_2(%arg0: i32, %arg1: i32) -> (i32, i32) {
    %c0_i32 = arith.constant 0 : i32
    %c0_i32_0 = arith.constant 0 : i32
    %c0_i32_1 = arith.constant 0 : i32
    return %c0_i32, %c0_i32_0 : i32, i32
  }
  func.func @transform_3(%arg0: i32, %arg1: i32) -> (i32, i32) {
    %c0_i32 = arith.constant 0 : i32
    %c0_i32_0 = arith.constant 0 : i32
    %c0_i32_1 = arith.constant 0 : i32
    return %c0_i32, %c0_i32_0 : i32, i32
  }
  func.func @transform_4(%arg0: i32, %arg1: i32) -> (i32, i32) {
    %c0_i32 = arith.constant 0 : i32
    %c0_i32_0 = arith.constant 0 : i32
    %c0_i32_1 = arith.constant 0 : i32
    return %c0_i32, %c0_i32_0 : i32, i32
  }
  func.func @transform_5(%arg0: i32, %arg1: i32) -> (i32, i32, i32) {
    %c0_i32 = arith.constant 0 : i32
    %c0_i32_0 = arith.constant 0 : i32
    %c0_i32_1 = arith.constant 0 : i32
    %c0_i32_2 = arith.constant 0 : i32
    return %c0_i32, %c0_i32_0, %c0_i32_1 : i32, i32, i32
  }
  func.func @transform_6(%arg0: i32, %arg1: i32) -> (i32, i32) {
    %c0_i32 = arith.constant 0 : i32
    %c0_i32_0 = arith.constant 0 : i32
    %c0_i32_1 = arith.constant 0 : i32
    return %c0_i32, %c0_i32_0 : i32, i32
  }
  func.func @transform_7(%arg0: i32, %arg1: i32) -> (i32, i32) {
    %c0_i32 = arith.constant 0 : i32
    %c0_i32_0 = arith.constant 0 : i32
    %c0_i32_1 = arith.constant 0 : i32
    return %c0_i32, %c0_i32_0 : i32, i32
  }
  func.func @transform_8(%arg0: i32, %arg1: i32) -> (i32, i32) {
    %c0_i32 = arith.constant 0 : i32
    %c0_i32_0 = arith.constant 0 : i32
    %c0_i32_1 = arith.constant 0 : i32
    return %c0_i32, %c0_i32_0 : i32, i32
  }
  func.func @transform_9(%arg0: i32, %arg1: i32) -> (i32, i32) {
    %c0_i32 = arith.constant 0 : i32
    %c0_i32_0 = arith.constant 0 : i32
    %c0_i32_1 = arith.constant 0 : i32
    return %c0_i32, %c0_i32_0 : i32, i32
  }
  func.func @transform_10(%arg0: i32, %arg1: i32) -> (i32, i32) {
    %c0_i32 = arith.constant 0 : i32
    %c0_i32_0 = arith.constant 0 : i32
    %c0_i32_1 = arith.constant 0 : i32
    return %c0_i32, %c0_i32_0 : i32, i32
  }
  func.func @transform_11(%arg0: i32, %arg1: i32) -> (i32, i32) {
    %c0_i32 = arith.constant 0 : i32
    %c0_i32_0 = arith.constant 0 : i32
    %c0_i32_1 = arith.constant 0 : i32
    return %c0_i32, %c0_i32_0 : i32, i32
  }
  func.func @transform_12(%arg0: i32, %arg1: i32) -> (i32, i32) {
    %c0_i32 = arith.constant 0 : i32
    %c0_i32_0 = arith.constant 0 : i32
    %c0_i32_1 = arith.constant 0 : i32
    return %c0_i32, %c0_i32_0 : i32, i32
  }
  func.func @transform_13(%arg0: i32, %arg1: i32) -> (i32, i32, i32) {
    %c0_i32 = arith.constant 0 : i32
    %c0_i32_0 = arith.constant 0 : i32
    return %arg0, %arg1, %c0_i32 : i32, i32, i32
  }
}

</mosaic_0001>

<bundles_post_ra>
// kernel: tpu_custom_call.1
= control target key start
LH: loop header
LB: loop body
LE: loop exit
PB: predicated region body
PF: predicated region fallthrough
CT: control target
= control target key end

     0   :  { %s2852_s0 = inlined_call_operand.vmem [shape: f32[2,8,32], index: 0, kind: input, shape index: {}]   ;;  %s2853_s1 = inlined_call_operand.vmem [shape: f32[1,32], index: 1, kind: input, shape index: {}]   ;;  %s2854_s2 = inlined_call_operand.vmem [shape: f32[1,32], index: 2, kind: input, shape index: {}]   ;;  %s2855_s3 = inlined_call_operand.vmem [shape: bf16[32,96], index: 3, kind: input, shape index: {}]   ;;  %s2856_s4 = inlined_call_operand.vmem [shape: f32[1,96], index: 4, kind: input, shape index: {}]   ;;  %s2857_s5 = inlined_call_operand.vmem [shape: bf16[4,8,32], index: 5, kind: input, shape index: {}]   ;;  %s2858_s6 = inlined_call_operand.vmem [shape: f32[1,32], index: 6, kind: input, shape index: {}]   ;;  %s2859_s7 = inlined_call_operand.vmem [shape: f32[1,32], index: 7, kind: input, shape index: {}]   ;;  %s2860_s8 = inlined_call_operand.vmem [shape: f32[1,32], index: 8, kind: input, shape index: {}]   ;;  %s2861_s9 = inlined_call_operand.vmem [shape: bf16[32,128], index: 9, kind: input, shape index: {}]   ;;  %s2862_s10 = inlined_call_operand.vmem [shape: f32[1,128], index: 10, kind: input, shape index: {}]   ;;  %s2863_s11 = inlined_call_operand.vmem [shape: bf16[128,32], index: 11, kind: input, shape index: {}]   ;;  %s2864_s12 = inlined_call_operand.vmem [shape: f32[1,32], index: 12, kind: input, shape index: {}]   ;;  %s2865_s13 = inlined_call_operand.hbm [shape: f32[2,8,32], index: 13, kind: output, shape index: {}]  }
   0x1   :  { %2867 = sst [smem:[#allocation8_spill]] %s2852_s0 }
   0x2   :  { %2868 = sst [smem:[#allocation9_spill]] %s2853_s1 }
   0x3   :  { %2869 = sst [smem:[#allocation10_spill]] %s2854_s2 }
   0x4   :  { %2870 = sst [smem:[#allocation11_spill]] %s2855_s3 }
   0x5   :  { %18 = vsyncpa [#allocation6], 0 }
   0x6   :  { %20 = vsyncpa [#allocation6 + $0x1], 0  ;;  %s2373_s25 = smov 0   ;;  %s2375_s26 = smov 0  }
   0x7   :  { %s2377_s27 = smov 0   ;;  %s2379_s28 = smov 0  }
   0x8   :  { %s2381_s29 = smov 0   ;;  %s2383_s30 = smov 0  }
   0x9 LB: > { %s1685_s14 = sadd.s32 4294967295, %s2233_s30   ;;  %s1686_s15 = sadd.s32 4294967294, %s2233_s30   ;;  %s2233_s30 = sphi %s2383_s30, %s26_s30   ;;  %s2229_s29 = sphi %s2381_s29, %s2897_s29   ;;  %s2225_s28 = sphi %s2379_s28, %s2896_s28   ;;  %s2221_s27 = sphi %s2377_s27, %s2895_s27   ;;  %s2217_s26 = sphi %s2375_s26, %s2894_s26   ;;  %s2213_s25 = sphi %s2373_s25, %s2893_s25  }
   0xa   : > { %s38_s16 = sadd.s32 1, %s2229_s29  ;;  %s325_s17 = sadd.s32 1, %s2221_s27 }
   0xb   : > { %p40_p0 = scmp.ge.s32.totalorder %s38_s16, 2  ;;  %p335_p1 = scmp.ne.s32.totalorder %s2221_s27, %s2217_s26 }
   0xc   : > { %p336_p2 = scmp.eq.s32.totalorder %s1685_s14, 1  ;;  %p341_p3 = scmp.ne.s32.totalorder %s2217_s26, %s2213_s25 }
   0xd   : > { %s2899_s16 = smov (%p40_p0, %s38_s16), 0  ;;  %p342_p5 = scmp.eq.s32.totalorder %s1686_s15, 1 }
   0xe   : > { %p2413_p4 = por %p336_p2, %p335_p1  ;;  %s320_s19 = ssub.s32 %s2229_s29, %s2899_s16 }
   0xf   : > { %p1689_p6 = scmp.ge.s32.totalorder %s2233_s30, 1  ;;  %p323_p7 = scmp.eq.s32.totalorder %s320_s19, 0 }
  0x10   : > { %p2420_p8 = por %p342_p5, %p341_p3  ;;  %p403_p9 = scmp.lt.s32.totalorder %s2233_s30, 3 }
  0x11   : > { %s2426_s21 = scalar_select %p323_p7, %s2221_s27, %s325_s17  }
  0x12   : > { %p404_p10 = pnand %p1689_p6, %p403_p9 }
  0x13   : > { %p446_p11 = scmp.lt.s32.totalorder (!%p404_p10), %s2225_s28, 1  ;;  %vm458_vm0 = vcmask (!%p404_p10), 261120   ;;  %s2873_s0 = sld [smem:[#allocation8_spill]] (!%p404_p10)  ;;  %v2287_v8 = vmov (!%p404_p10), 0.0   ;;  %vm2288_vm1 = vmmov (!%p404_p10), 0   ;;  %vm556_vm2 = vcmask (!%p404_p10), 60416  }
  0x14   : > { %407 = sbr.rel (%p404_p10) target bundleno = 2346 (0x92a), region = 72  ;;  %s2866_s17 = sand.u32 (!%p404_p10), 1, %s2217_s26   ;;  %1779 = vmatprep.subr.bf16.mxu0 (!%p404_p10), %v2287_v8  ;;  %1783 = vmatprep.mubr.msk.bf16.mxu0 (!%p404_p10), %vm2288_vm1, %v2287_v8  ;;  %v1694_v20 = vld [vmem:[%s2856_s4] ss:$0 sm:$0xff] (!%p404_p10)  ;;  %v2484_v44 = vmov (!%p404_p10), 0.0   ;;  %v2486_v45 = vmov (!%p404_p10), 0.0  }
  0x15   : > { %s2874_s3 = sld [smem:[#allocation11_spill]] (!%p404_p10)  ;;  %s2875_s1 = sld [smem:[#allocation9_spill]] (!%p404_p10)  ;;  %v2488_v46 = vmov (!%p404_p10), 0.0   ;;  %v2490_v47 = vmov (!%p404_p10), 0.0   ;;  %v2492_v48 = vmov (!%p404_p10), 0.0   ;;  %v2494_v49 = vmov (!%p404_p10), 0.0  }
  0x16   : > { %s2876_s2 = sld [smem:[#allocation10_spill]] (!%p404_p10)  ;;  %s2291_s19 = smov (!%p404_p10), 72   ;;  %v2496_v50 = vmov (!%p404_p10), 0.0   ;;  %v2498_v51 = vmov (!%p404_p10), 0.0   ;;  %v2500_v52 = vmov (!%p404_p10), -1e+30  }
  0x17   : > { %s2293_s24 = smov (!%p404_p10), 96   ;;  %s2294_s14 = smov (!%p404_p10), 64   ;;  %v2502_v53 = vmov (!%p404_p10), -1e+30   ;;  %v2504_v54 = vmov (!%p404_p10), -1e+30  }
  0x18   : > { %v2506_v55 = vmov (!%p404_p10), -1e+30  }
  0x1b   : > { %s447_s22 = scalar_select %p446_p11, %s2225_s28, 1  ;;  %v2061_v7 = vld [vmem:[%s2874_s3] sm:$0xff]   ;;  %v2062_v9 = vld [vmem:[%s2874_s3 + $0x8] sm:$0xff]  }
  0x1c   : > { %1780 = vmatpush3.bf16.msra.mxu0 %v2061_v7  ;;  %v1692_v14 = vld [vmem:[%s2875_s1] ss:$0 sm:$0xff]  ;;  %s2295_s1 = smov 88   ;;  %s2297_s3 = smov 80  }
  0x1d   : > { %s1691_s23 = sshll.u32 %s447_s22, 3  ;;  %1781 = vmatprep.subr.bf16.mxu0 %v2287_v8  ;;  %v1693_v16 = vld [vmem:[%s2876_s2] ss:$0 sm:$0xff]  ;;  %s2292_s22 = smov 112  }
  0x1e   : > { %s2433_s15 = scalar_lea.vmem %s2873_s0, %s1691_s23  ;;  %s2444_s23 = sshll.u32 %s2866_s17, 3 }
  0x1f   : > { %v455_v0 = vld [vmem:[%s2433_s15] sm:$0xff]  ;;  %s2289_s0 = smov 104   ;;  %s2290_s17 = smov 120  }
  0x20   : > { %v459_v1 = vsel %vm458_vm0, %v455_v0, 0.0  ;;  %1782 = vmatpush3.bf16.msra.mxu0 %v2062_v9  ;;  %s2296_s2 = smov 56  }
  0x21   : > { %460 = vadd.xlane.f32.xlu0 %v459_v1 }
  0xae   : > { %v461_v2 = vpop.xlane.xlu0 %460 }
  0xaf   : > { %v463_v3 = vmul.f32 0.03125, %v461_v2 }
  0xb1   : > { %v464_v4 = vsub.f32 %v455_v0, %v463_v3 }
  0xb3   : > { %v465_v5 = vmul.f32 %v464_v4, %v464_v4 }
  0xb5   : > { %v466_v6 = vsel %vm458_vm0, %v465_v5, 0.0 }
  0xb6   : > { %467 = vadd.xlane.f32.xlu0 %v466_v6 }
 0x143   : > { %v468_v10 = vpop.xlane.xlu0 %467 }
 0x144   : > { %v469_v11 = vmul.f32 0.03125, %v468_v10 }
 0x146   : > { %v470_v12 = vadd.f32 1e-05, %v469_v11 }
 0x148   : > { %2063 = vrsqrt.f32 %v470_v12 }
 0x152   : > { %v2064_v13 = vpop.eup %2063 }
 0x153   : > { %v472_v15 = vmul.f32 %v2064_v13, %v464_v4 }
 0x155   : > { %v479_v17 = vmul.f32 %v1692_v14, %v472_v15 }
 0x157   : > { %v486_v18 = vadd.f32 %v1693_v16, %v479_v17 }
 0x159   : > { %v487_v19 = vpack.c.bf16 %v486_v18, %v486_v18 }
 0x15b   : > { %1784 = vmatmul.mubr.msk.bf16.vlgmr.msra.gmra.mrb[0].mxu0 %vm458_vm0, %v487_v19 }
 0x22e   : > { %v548_v21 = vpop.f32.mrb[0].mxu0 }
 0x22f   : > { %v549_v22 = vadd.f32 %v1694_v20, %v548_v21  ;;  %v1785_v23 = vpop.f32.mrb[1].mxu0 }
 0x230   : > { %v551_v24 = vpop.f32.mrb[2].mxu0 }
 0x231   : > { %v554_v25 = vmul.f32 0.35355338, %v549_v22  ;;  %v1786_v26 = vpop.f32.mrb[3].mxu0  ;;  %v1738_v28 = vpack.c.bf16 %v549_v22, %v549_v22 }
 0x233   : > { %v555_v27 = vpack.c.bf16 %v554_v25, %v554_v25 }
 0x235   : > { %557 = vst.msk [vmem:[#allocation2] sm:$0xf] %vm556_vm2, %v555_v27  ;;  %603 = vrot.lane.b32.xlu0 %v555_v27, %s2289_s0  ;;  %573 = vrot.lane.b32.xlu1 %v555_v27, %s2290_s17  ;;  %s2298_s0 = smov 48   ;;  %s2299_s17 = smov 40  }
 0x239   : > { %608 = vrot.lane.b32.xlu0 %v1738_v28, %s2291_s19  ;;  %588 = vrot.lane.b32.xlu1 %v555_v27, %s2292_s22 }
 0x23c   : > { %v2464_v29 = vld [vmem:[#allocation2] sm:$0xf] }
 0x23d   : > { %562 = vrot.lane.b32.xlu1 %v1738_v28, %s2293_s24 }
 0x241   : > { %566 = vrot.lane.b32.xlu1 %v1738_v28, %s2294_s14 }
 0x245   : > { %578 = vrot.lane.b32.xlu1 %v1738_v28, %s2295_s1  ;;  %s445_s1 = scalar_lea.vmem [#allocation5], %s2444_s23 }
 0x249   : > { %583 = vrot.lane.b32.xlu1 %v1738_v28, %s2296_s2  ;;  %s2508_s2 = smov 0  }
 0x24d   : > { %593 = vrot.lane.b32.xlu1 %v1738_v28, %s2297_s3 }
 0x251   : > { %598 = vrot.lane.b32.xlu1 %v1738_v28, %s2298_s0 }
 0x255   : > { %613 = vrot.lane.b32.xlu1 %v1738_v28, %s2299_s17 }
 0x2a7   : > { %v604_v30 = vpop.permute.xlu0 %603  ;;  %v574_v31 = vpop.permute.xlu1 %573 }
 0x2a8   : > { %607 = vst.msk [vmem:[#allocation2 + $0xc] sm:$0xf] %vm556_vm2, %v604_v30  ;;  %577 = vst.msk [vmem:[#allocation2 + $0x4] sm:$0xf] %vm556_vm2, %v574_v31 }
 0x2ab   : > { %v609_v32 = vpop.permute.xlu0 %608  ;;  %v589_v33 = vpop.permute.xlu1 %588 }
 0x2ac   : > { %612 = vst.msk [vmem:[#allocation3 + $0xc] sm:$0xf] %vm556_vm2, %v609_v32  ;;  %592 = vst.msk [vmem:[#allocation2 + $0x8] sm:$0xf] %vm556_vm2, %v589_v33 }
 0x2af   : > { %v2470_v34 = vld [vmem:[#allocation2 + $0xc] sm:$0xf]  ;;  %v2472_v35 = vld [vmem:[#allocation2 + $0x4] sm:$0xf]  ;;  %v563_v36 = vpop.permute.xlu1 %562 }
 0x2b0   : > { %565 = vst.msk [vmem:[#allocation3] sm:$0xf] %vm556_vm2, %v563_v36 }
 0x2b3   : > { %v2475_v37 = vld [vmem:[#allocation2 + $0x8] sm:$0xf]  ;;  %v567_v38 = vpop.permute.xlu1 %566 }
 0x2b4   : > { %569 = vst.msk [vmem:[#allocation4] sm:$0xf] %vm556_vm2, %v567_v38 }
 0x2b7   : > { %v579_v39 = vpop.permute.xlu1 %578 }
 0x2b8   : > { %582 = vst.msk [vmem:[#allocation3 + $0x4] sm:$0xf] %vm556_vm2, %v579_v39 }
 0x2bb   : > { %v584_v40 = vpop.permute.xlu1 %583 }
 0x2bc   : > { %587 = vst.msk [vmem:[#allocation4 + $0x4] sm:$0xf] %vm556_vm2, %v584_v40 }
 0x2bf   : > { %v594_v41 = vpop.permute.xlu1 %593 }
 0x2c0   : > { %597 = vst.msk [vmem:[#allocation3 + $0x8] sm:$0xf] %vm556_vm2, %v594_v41 }
 0x2c3   : > { %v599_v42 = vpop.permute.xlu1 %598 }
 0x2c4   : > { %602 = vst.msk [vmem:[#allocation4 + $0x8] sm:$0xf] %vm556_vm2, %v599_v42 }
 0x2c7   : > { %v614_v43 = vpop.permute.xlu1 %613 }
 0x2c8   : > { %617 = vst.msk [vmem:[#allocation4 + $0xc] sm:$0xf] %vm556_vm2, %v614_v43 }
 0x2c9 LB: >> { %v2300_v56 = vmov 0.0   ;;  %s1700_s3 = sshll.u32 %s2285_s2, 3  ;;  %vm2301_vm3 = vmmov 0   ;;  %vm661_vm4 = vcmask 64512   ;;  %v846_v1 = vlaneseq  ;;  %s631_s2 = sadd.s32 1, %s2285_s2   ;;  %s2285_s2 = sphi %s2508_s2, %s631_s2   ;;  %v2281_v55 = vphi %v2506_v55, %v2891_v55   ;;  %v2277_v54 = vphi %v2504_v54, %v2890_v54   ;;  %v2273_v53 = vphi %v2502_v53, %v2889_v53   ;;  %v2269_v52 = vphi %v2500_v52, %v2888_v52   ;;  %v2265_v51 = vphi %v2498_v51, %v2887_v51   ;;  %v2261_v50 = vphi %v2496_v50, %v2886_v50   ;;  %v2257_v49 = vphi %v2494_v49, %v2885_v49   ;;  %v2253_v48 = vphi %v2492_v48, %v2884_v48   ;;  %v2249_v47 = vphi %v2490_v47, %v2883_v47   ;;  %v2245_v46 = vphi %v2488_v46, %v2882_v46   ;;  %v2241_v45 = vphi %v2486_v45, %v2881_v45   ;;  %v2237_v44 = vphi %v2484_v44, %v2880_v44  }
 0x2ca   : >> { %1787 = vmatprep.subr.bf16.mxu0 %v2300_v56  ;;  %1793 = vmatprep.subr.bf16.mxu1 %v2300_v56  ;;  %s2558_s19 = sshra.s32 %s1700_s3, 3  ;;  %v852_v3 = vstv %s1700_s3  ;;  %vm932_vm6 = vcmask 1043456   ;;  %p2654_p12 = scmp.ge.s32.totalorder %s631_s2, 1 }
 0x2cb   : >> { %1789 = vmatprep.mubr.msk.bf16.mxu0 %vm2301_vm3, %v2300_v56  ;;  %1795 = vmatprep.mubr.msk.bf16.mxu1 %vm2301_vm3, %v2300_v56  ;;  %s1701_s22 = sshll.u32 %s2558_s19, 2  ;;  %v851_v2 = vand.u32 127, %v846_v1  ;;  %v847_v4 = vshrl.u32 %v846_v1, 7  ;;  %s2302_s3 = smov (%p2654_p12), [#allocation5]  }
 0x2cc   : >> { %s650_s24 = scalar_lea.vmem [#allocation3], %s1701_s22  ;;  %s656_s14 = scalar_lea.vmem [#allocation4], %s1701_s22 }
 0x2cd   : >> { %v651_v57 = vld [vmem:[%s650_s24] sm:$0xf]  ;;  %v652_v58 = vld [vmem:[%s650_s24 + $0x4] sm:$0xf]  ;;  %v653_v61 = vld [vmem:[%s650_s24 + $0x8] sm:$0xf]  ;;  %v853_v5 = vadd.s32 %v852_v3, %v851_v2 }
 0x2ce   : >> { %v666_v59 = vsel %vm661_vm4, %v651_v57, 0  ;;  %v712_v60 = vsel %vm661_vm4, %v652_v58, 0  ;;  %v654_v62 = vld [vmem:[%s650_s24 + $0xc] sm:$0xf]  ;;  %v758_v63 = vsel %vm661_vm4, %v653_v61, 0  ;;  %s1735_s22 = sshll.u32 (%p2654_p12), %s2225_s28, 7 }
 0x2cf   : >> { %1788 = vmatpush3.bf16.xpose.msra.mxu0 %v666_v59  ;;  %1794 = vmatpush3.bf16.xpose.msra.mxu1 %v712_v60  ;;  %v804_v0 = vsel %vm661_vm4, %v654_v62, 0  ;;  %vm854_vm5 = vcmp.le.s32.totalorder %v853_v5, %v847_v4  ;;  %v657_v32 = vld [vmem:[%s656_s14] sm:$0xf]  ;;  %v658_v36 = vld [vmem:[%s656_s14 + $0x4] sm:$0xf]  ;;  %s2892_s28 = sand.u32 (%p2654_p12), 1, %s2217_s26  }
 0x2d0   : >> { %1799 = vmatprep.subr.bf16.mxu0 %v2300_v56  ;;  %1805 = vmatprep.subr.bf16.mxu1 %v2300_v56  ;;  %v934_v33 = vsel %vm932_vm6, %v657_v32, 0  ;;  %v980_v38 = vsel %vm932_vm6, %v658_v36, 0  ;;  %v659_v39 = vld [vmem:[%s656_s14 + $0x8] sm:$0xf]  ;;  %v660_v41 = vld [vmem:[%s656_s14 + $0xc] sm:$0xf]  ;;  %s2800_s14 = scalar_lea.hbm (%p2654_p12), %s2865_s13, %s1735_s22 }
 0x2d1   : >> { %v1026_v40 = vsel %vm932_vm6, %v659_v39, 0  ;;  %v1072_v42 = vsel %vm932_vm6, %v660_v41, 0  ;;  %s1554_s0 = scalar_lea.sflag (%p2654_p12), [#allocation6], %s2892_s28  ;;  %s2107_s19 = sshll.u32 (%p2654_p12), %s2302_s3, 4  ;;  %s2108_s19 = int_to_ptr.vmem [resolvable:$false] %s2107_s19 }
 0x2d2   : > { %s2109_s22 = scalar_lea.vmem (%p2654_p12), %s2108_s19, 256 }
 0x2d6   : >> { %1790 = vmatmul.mubr.msk.bf16.vlgmr.msra.gmra.mrb[0].mxu0 %vm661_vm4, %v2464_v29  ;;  %1796 = vmatmul.mubr.msk.bf16.vlgmr.msra.gmra.mrb[0].mxu1 %vm661_vm4, %v2472_v35  ;;  %v1130_v35 = vld [vmem:[%s2857_s5] sm:$0xf] (%p2654_p12) }
 0x2d7   : >> { %1800 = vmatpush3.bf16.xpose.msra.mxu0 %v758_v63  ;;  %1806 = vmatpush3.bf16.xpose.msra.mxu1 %v804_v0 }
 0x2d8   : >> { %1801 = vmatprep.mubr.msk.bf16.mxu0 %vm2301_vm3, %v2300_v56  ;;  %1807 = vmatprep.mubr.msk.bf16.mxu1 %vm2301_vm3, %v2300_v56 }
 0x2d9   : >> { %1811 = vmatprep.subr.bf16.mxu0 %v2300_v56  ;;  %1817 = vmatprep.subr.bf16.mxu1 %v2300_v56 }
 0x2de   : >> { %1802 = vmatmul.mubr.msk.bf16.vlgmr.msra.gmra.mrb[4].mxu0 %vm661_vm4, %v2475_v37  ;;  %1808 = vmatmul.mubr.msk.bf16.vlgmr.msra.gmra.mrb[4].mxu1 %vm661_vm4, %v2470_v34 }
 0x2df   : >> { %1813 = vmatprep.mubr.msk.bf16.mxu0 %vm2301_vm3, %v2300_v56  ;;  %1819 = vmatprep.mubr.msk.bf16.mxu1 %vm2301_vm3, %v2300_v56 }
 0x2e0   : >> { %1812 = vmatpush3.bf16.msra.mxu0 %v934_v33  ;;  %1818 = vmatpush3.bf16.msra.mxu1 %v980_v38 }
 0x2e1   : >> { %1823 = vmatprep.subr.bf16.mxu0 %v2300_v56  ;;  %1829 = vmatprep.subr.bf16.mxu1 %v2300_v56 }
 0x3a9   : >> { %v702_v6 = vpop.f32.mrb[0].mxu0  ;;  %v748_v7 = vpop.f32.mrb[0].mxu1 }
 0x3aa   : >> { %v857_v9 = vsel %vm854_vm5, %v702_v6, -1e+30  ;;  %v1791_v10 = vpop.f32.mrb[1].mxu0  ;;  %v858_v11 = vsel %vm854_vm5, %v748_v7, -1e+30  ;;  %v1797_v12 = vpop.f32.mrb[1].mxu1 }
 0x3ab   : >> { %v705_v13 = vpop.f32.mrb[2].mxu0  ;;  %v861_v14 = vsel %vm661_vm4, %v857_v9, -inf  ;;  %v751_v15 = vpop.f32.mrb[2].mxu1  ;;  %v864_v18 = vsel %vm661_vm4, %v858_v11, -inf }
 0x3ac   : >> { %862 = vmax.xlane.f32.xlu0 %v861_v14  ;;  %v1792_v16 = vpop.f32.mrb[3].mxu0  ;;  %v1798_v17 = vpop.f32.mrb[3].mxu1 }
 0x3b0   : >> { %865 = vmax.xlane.f32.xlu0 %v864_v18 }
 0x3b1   : >> { %v794_v19 = vpop.f32.mrb[4].mxu0  ;;  %v840_v20 = vpop.f32.mrb[4].mxu1 }
 0x3b2   : >> { %v859_v21 = vsel %vm854_vm5, %v794_v19, -1e+30  ;;  %v1803_v22 = vpop.f32.mrb[5].mxu0  ;;  %v860_v23 = vsel %vm854_vm5, %v840_v20, -1e+30  ;;  %v1809_v24 = vpop.f32.mrb[5].mxu1 }
 0x3b3   : >> { %v797_v25 = vpop.f32.mrb[6].mxu0  ;;  %v867_v26 = vsel %vm661_vm4, %v859_v21, -inf  ;;  %v843_v27 = vpop.f32.mrb[6].mxu1  ;;  %v870_v31 = vsel %vm661_vm4, %v860_v23, -inf }
 0x3b4   : >> { %868 = vmax.xlane.f32.xlu1 %v867_v26  ;;  %v1804_v28 = vpop.f32.mrb[7].mxu0  ;;  %v1810_v30 = vpop.f32.mrb[7].mxu1 }
 0x3b8   : >> { %871 = vmax.xlane.f32.xlu1 %v870_v31 }
 0x439   : >> { %v863_v43 = vpop.xlane.xlu0 %862 }
 0x43a   : >> { %v2606_v57 = vmax.f32 %v2281_v55, %v863_v43  }
 0x43c   : >> { %v877_v58 = vsub.f32 %v2281_v55, %v2606_v57  ;;  %v889_v59 = vsub.f32 %v857_v9, %v2606_v57 }
 0x43d   : >> { %v866_v60 = vpop.xlane.xlu0 %865 }
 0x43e   : >> { %v893_v61 = vmul.f32 1.442695, %v889_v59  ;;  %v2612_v62 = vmax.f32 %v2277_v54, %v866_v60  }
 0x440   : >> { %v878_v63 = vsub.f32 %v2277_v54, %v2612_v62  ;;  %v890_v0 = vsub.f32 %v858_v11, %v2612_v62  ;;  %2065 = vpow2.f32 %v893_v61 }
 0x441   : >> { %v869_v1 = vpop.xlane.xlu1 %868 }
 0x442   : >> { %v895_v2 = vmul.f32 1.442695, %v890_v0  ;;  %v2618_v3 = vmax.f32 %v2273_v53, %v869_v1   ;;  %v883_v22 = vmul.f32 1.442695, %v878_v63 }
 0x444   : >> { %v879_v55 = vsub.f32 %v2273_v53, %v2618_v3  ;;  %v891_v4 = vsub.f32 %v859_v21, %v2618_v3  ;;  %2067 = vpow2.f32 %v895_v2  ;;  %v881_v21 = vmul.f32 1.442695, %v877_v58 }
 0x445   : >> { %v872_v5 = vpop.xlane.xlu1 %871 }
 0x446   : >> { %v897_v6 = vmul.f32 1.442695, %v891_v4  ;;  %v2624_v7 = vmax.f32 %v2269_v52, %v872_v5  }
 0x448   : >> { %v880_v54 = vsub.f32 %v2269_v52, %v2624_v7  ;;  %v892_v9 = vsub.f32 %v860_v23, %v2624_v7  ;;  %2069 = vpow2.f32 %v897_v6  ;;  %v885_v23 = vmul.f32 1.442695, %v879_v55 }
 0x44a   : >> { %v899_v10 = vmul.f32 1.442695, %v892_v9  ;;  %v2066_v11 = vpop.eup %2065 }
 0x44b   : >> { %v905_v12 = vsel %vm661_vm4, %v2066_v11, 0.0  ;;  %v925_v13 = vpack.c.bf16 %v2066_v11, %v2066_v11 }
 0x44c   : >> { %2071 = vpow2.f32 %v899_v10  ;;  %906 = vadd.xlane.f32.xlu0 %v905_v12 }
 0x44d   : >> { %1814 = vmatmul.mubr.msk.bf16.vlgmr.msra.gmra.mrb[8].mxu0 %vm661_vm4, %v925_v13  ;;  %2073 = vpow2.f32 %v881_v21 }
 0x44e   : >> { %v2068_v53 = vpop.eup %2067  ;;  %1824 = vmatpush3.bf16.msra.mxu0 %v1026_v40  ;;  %1825 = vmatprep.mubr.msk.bf16.mxu0 %vm2301_vm3, %v2300_v56  ;;  %2075 = vpow2.f32 %v883_v22 }
 0x44f   : >> { %v908_v14 = vsel %vm661_vm4, %v2068_v53, 0.0  ;;  %v926_v52 = vpack.c.bf16 %v2068_v53, %v2068_v53  ;;  %2077 = vpow2.f32 %v885_v23  ;;  %v2889_v53 = vmov %v2618_v3  ;;  %1835 = vmatprep.subr.bf16.mxu0 (%p2654_p12), %v2287_v8 }
 0x450   : >> { %909 = vadd.xlane.f32.xlu1 %v908_v14  ;;  %v1711_v14 = vld [vmem:[%s2857_s5 + $0x4] sm:$0xf] (%p2654_p12) }
 0x451   : >> { %1820 = vmatmul.mubr.msk.bf16.vlgmr.msra.gmra.mrb[8].mxu1 %vm661_vm4, %v926_v52  ;;  %v2888_v52 = vmov %v2624_v7  ;;  %v1139_v3 = vsel (%p2654_p12), %vm932_vm6, %v1711_v14, 0  ;;  %v1185_v7 = vsel (%p2654_p12), %vm932_vm6, %v1130_v35, 0  ;;  %v2090_v35 = vld [vmem:[%s2863_s11 + $0x38] sm:$0xff] (%p2654_p12)  }
 0x452   : >> { %v2070_v15 = vpop.eup %2069  ;;  %1830 = vmatpush3.bf16.msra.mxu1 %v1072_v42  ;;  %1831 = vmatprep.mubr.msk.bf16.mxu1 %vm2301_vm3, %v2300_v56  ;;  %v887_v56 = vmul.f32 1.442695, %v880_v54 }
 0x453   : >> { %v911_v16 = vsel %vm661_vm4, %v2070_v15, 0.0  ;;  %v927_v17 = vpack.c.bf16 %v2070_v15, %v2070_v15  ;;  %1853 = vmatprep.subr.bf16.mxu1 (%p2654_p12), %v2287_v8 }
 0x454   : >> { %912 = vadd.xlane.f32.xlu0 %v911_v16  ;;  %2079 = vpow2.f32 %v887_v56  ;;  %v1714_v16 = vld [vmem:[%s2857_s5 + $0x8] sm:$0xf] (%p2654_p12) }
 0x455   : >> { %1826 = vmatmul.mubr.msk.bf16.vlgmr.msra.gmra.mrb[12].mxu0 %vm661_vm4, %v927_v17 }
 0x456   : >> { %v2072_v18 = vpop.eup %2071  ;;  %1837 = vmatprep.mubr.msk.bf16.mxu0 (%p2654_p12), %vm2288_vm1, %v2287_v8  ;;  %1836 = vmatpush3.bf16.msra.mxu0 (%p2654_p12), %v1139_v3  ;;  %v2086_v3 = vld [vmem:[%s2863_s11 + $0x18] sm:$0xff] (%p2654_p12)  }
 0x457   : >> { %v914_v19 = vsel %vm661_vm4, %v2072_v18, 0.0  ;;  %v928_v20 = vpack.c.bf16 %v2072_v18, %v2072_v18  ;;  %v2074_v24 = vpop.eup %2073  ;;  %1841 = vmatprep.subr.bf16.mxu0 (%p2654_p12), %v2287_v8 }
 0x458   : >> { %915 = vadd.xlane.f32.xlu1 %v914_v19  ;;  %v901_v25 = vmul.f32 %v2265_v51, %v2074_v24  ;;  %v2076_v26 = vpop.eup %2075  ;;  %v921_v58 = vmul.f32 %v2249_v47, %v2074_v24  ;;  %v1233_v19 = vsel (%p2654_p12), %vm932_vm6, %v1714_v16, 0 }
 0x459   : >> { %1832 = vmatmul.mubr.msk.bf16.vlgmr.msra.gmra.mrb[12].mxu1 %vm661_vm4, %v928_v20  ;;  %v902_v30 = vmul.f32 %v2261_v50, %v2076_v26  ;;  %v2078_v31 = vpop.eup %2077  ;;  %v922_v63 = vmul.f32 %v2245_v46, %v2076_v26 }
 0x45a   : >> { %v903_v36 = vmul.f32 %v2257_v49, %v2078_v31  ;;  %v923_v4 = vmul.f32 %v2241_v45, %v2078_v31  ;;  %1855 = vmatprep.mubr.msk.bf16.mxu1 (%p2654_p12), %vm2288_vm1, %v2287_v8 }
 0x45e   : >> { %v2080_v38 = vpop.eup %2079 }
 0x45f   : >> { %v904_v41 = vmul.f32 %v2253_v48, %v2080_v38 }
 0x4d9   : >> { %v907_v27 = vpop.xlane.xlu0 %906 }
 0x4da   : >> { %v917_v28 = vadd.f32 %v907_v27, %v901_v25  }
 0x4dd   : >> { %v910_v32 = vpop.xlane.xlu1 %909 }
 0x4de   : >> { %v918_v33 = vadd.f32 %v910_v32, %v902_v30  }
 0x4e0   : > { %2091 = vrcp.f32 (%p2654_p12), %v918_v33 }
 0x4e1   : >> { %v913_v39 = vpop.xlane.xlu0 %912  ;;  %2093 = vrcp.f32 (%p2654_p12), %v917_v28 }
 0x4e2   : >> { %v919_v40 = vadd.f32 %v913_v39, %v903_v36  }
 0x4e5   : >> { %v916_v42 = vpop.xlane.xlu1 %915 }
 0x4e6   : >> { %v920_v43 = vadd.f32 %v916_v42, %v904_v41   ;;  %v1718_v41 = vld [vmem:[%s2858_s6] ss:$0 sm:$0xff] (%p2654_p12) }
 0x4e8   : > { %2095 = vrcp.f32 (%p2654_p12), %v920_v43 }
 0x4e9   : > { %2097 = vrcp.f32 (%p2654_p12), %v919_v40 }
 0x4ea   : > { %v2092_v34 = vpop.eup (%p2654_p12), %2091 }
 0x4eb   : > { %v2094_v37 = vpop.eup (%p2654_p12), %2093 }
 0x520   : >> { %v970_v51 = vpop.f32.mrb[8].mxu0 }
 0x521   : >> { %v2646_v47 = vadd.f32 %v970_v51, %v921_v58   ;;  %v1815_v60 = vpop.f32.mrb[9].mxu0  ;;  %v2887_v51 = vmov %v917_v28 }
 0x522   : >> { %v973_v61 = vpop.f32.mrb[10].mxu0  ;;  %v1334_v51 = vld [vmem:[%s2433_s15] sm:$0xff] (%p2654_p12)  ;;  %s1568_s15 = sshll.u32 (%p2654_p12), %s445_s1, 4  ;;  %s2802_s15 = int_to_ptr.vmem [resolvable:$true] %s1568_s15 }
 0x523   : >> { %v2877_v59 = vmov %v2646_v47  ;;  %v1816_v50 = vpop.f32.mrb[11].mxu0  ;;  %v924_v47 = vmul.f32 %v2237_v44, %v2080_v38  ;;  %s2103_s17 = scalar_lea.vmem (%p2654_p12), %s2802_s15, 128  ;;  %p2110_p2 = scmp.lt.s32.totalorder (%p2654_p12), %s2802_s15, %s2108_s19 }
 0x524   : >> { %v1016_v0 = vpop.f32.mrb[8].mxu1  ;;  %v2886_v50 = vmov %v918_v33  ;;  %v1122_v52 = vmul.f32 (%p2654_p12), %v2094_v37, %v2877_v59  ;;  %v1721_v37 = vld [vmem:[%s2862_s10] ss:$0 sm:$0xff] (%p2654_p12)  ;;  %p2104_p13 = scmp.ne.s32.totalorder (%p2654_p12), %s2802_s15, %s2103_s17  ;;  %p2111_p3 = scmp.lt.s32.totalorder (%p2654_p12), %s2109_s22, %s2103_s17 }
 0x525   : >> { %v1115_v1 = vadd.f32 %v1016_v0, %v922_v63   ;;  %v1821_v49 = vpop.f32.mrb[9].mxu1 }
 0x526   : >> { %v1019_v2 = vpop.f32.mrb[10].mxu1  ;;  %v2885_v49 = vmov %v919_v40  ;;  %v1126_v17 = vpack.c.bf16 (%p2654_p12), %v1122_v52, %v1122_v52  ;;  %p2105_p0 = pnand (%p2654_p12), %p2104_p13, %p2413_p4  ;;  %p2112_p5 = por (%p2654_p12), %p2111_p3, %p2110_p2 }
 0x527   : >> { %v1822_v55 = vpop.f32.mrb[11].mxu1  ;;  %v2081_v2 = vld [vmem:[%s2861_s9] sm:$0xff] (%p2654_p12)  }
 0x528   : >> { %v1062_v48 = vpop.f32.mrb[12].mxu0  ;;  %v2891_v55 = vmov %v2606_v57  ;;  %v1716_v57 = vld [vmem:[%s2857_s5 + $0xc] sm:$0xf] (%p2654_p12)  ;;  %p2106_p1 = pneg (%p2654_p12), %p2105_p0 }
 0x529   : >> { %v2650_v45 = vadd.f32 %v1062_v48, %v923_v4   ;;  %v1827_v6 = vpop.f32.mrb[13].mxu0  ;;  %v2884_v48 = vmov %v920_v43  ;;  %v1282_v29 = vsel (%p2654_p12), %vm932_vm6, %v1716_v57, 0  ;;  %v2082_v55 = vld [vmem:[%s2861_s9 + $0x8] sm:$0xff] (%p2654_p12)   ;;  %v2083_v4 = vld [vmem:[%s2863_s11] sm:$0xff] (%p2654_p12)  }
 0x52a   : >> { %v1065_v54 = vpop.f32.mrb[14].mxu0  ;;  %633 = sbr.rel (!%p2654_p12) target bundleno = 713 (0x2c9), region = 134  ;;  %1854 = vmatpush3.bf16.msra.mxu1 (%p2654_p12), %v1282_v29  ;;  %v2084_v48 = vld [vmem:[%s2863_s11 + $0x8] sm:$0xff] (%p2654_p12)   ;;  %v2087_v57 = vld [vmem:[%s2863_s11 + $0x20] sm:$0xff] (%p2654_p12)   ;;  %p2113_p6 = pnand (%p2654_p12), %p2112_p5, %p2106_p1 }
 0x52b   : >> { %v2878_v5 = vmov %v2650_v45  ;;  %v1828_v9 = vpop.f32.mrb[15].mxu0  ;;  %v2890_v54 = vmov %v2612_v62  ;;  %1867 = vmatprep.subr.bf16.mxu1 (%p2654_p12), %v2287_v8  ;;  %v2088_v29 = vld [vmem:[%s2863_s11 + $0x28] sm:$0xff] (%p2654_p12)  }
 0x52c   : >> { %v1108_v10 = vpop.f32.mrb[12].mxu1  ;;  %v2881_v45 = vmov %v2878_v5 }
 0x52d   : >> { %v1117_v11 = vadd.f32 %v1108_v10, %v924_v47   ;;  %v1833_v12 = vpop.f32.mrb[13].mxu1  ;;  %v2883_v47 = vmov %v2877_v59  ;;  %v2096_v45 = vpop.eup (%p2654_p12), %2095  ;;  %v1719_v10 = vld [vmem:[%s2859_s7] ss:$0 sm:$0xff] (%p2654_p12) }
 0x52e   : >> { %v1111_v13 = vpop.f32.mrb[14].mxu1  ;;  %v2098_v18 = vpop.eup (%p2654_p12), %2097  ;;  %v1720_v12 = vld [vmem:[%s2860_s8] ss:$0 sm:$0xff] (%p2654_p12) }
 0x52f   : >> { %v1834_v46 = vpop.f32.mrb[15].mxu1  ;;  %v2880_v44 = vmov %v1117_v11  ;;  %v1125_v53 = vmul.f32 (%p2654_p12), %v2096_v45, %v1117_v11  ;;  %v1124_v20 = vmul.f32 (%p2654_p12), %v2098_v18, %v2878_v5  ;;  %v2085_v5 = vld [vmem:[%s2863_s11 + $0x10] sm:$0xff] (%p2654_p12)  }
 0x530   : >> { %v2882_v46 = vmov %v1115_v1  ;;  %v1123_v44 = vmul.f32 (%p2654_p12), %v2092_v34, %v1115_v1  ;;  %v2089_v34 = vld [vmem:[%s2863_s11 + $0x30] sm:$0xff] (%p2654_p12)  }
 0x531   : > { %v1129_v15 = vpack.c.bf16 %v1125_v53, %v1125_v53  ;;  %v1128_v21 = vpack.c.bf16 %v1124_v20, %v1124_v20 }
 0x532   : > { %v1127_v62 = vpack.c.bf16 %v1123_v44, %v1123_v44 }
 0x533   : > { %1856 = vmatmul.mubr.msk.bf16.vlgmr.msra.gmra.mrb[0].mxu1 %vm661_vm4, %v1129_v15 }
 0x534   : > { %1838 = vmatmul.mubr.msk.bf16.vlgmr.msra.gmra.mrb[0].mxu0 %vm661_vm4, %v1127_v62  ;;  %1883 = vmatprep.mubr.msk.bf16.mxu1 %vm2288_vm1, %v2287_v8 }
 0x535   : > { %1842 = vmatpush3.bf16.msra.mxu0 %v1185_v7  ;;  %1843 = vmatprep.mubr.msk.bf16.mxu0 %vm2288_vm1, %v2287_v8 }
 0x536   : > { %1847 = vmatprep.subr.bf16.mxu0 %v2287_v8  ;;  %1868 = vmatpush3.bf16.msra.mxu1 %v2083_v4 }
 0x537   : > { %1869 = vmatprep.subr.bf16.mxu1 %v2287_v8 }
 0x53a   : > { %1870 = vmatpush3.bf16.msra.mxu1 %v2084_v48 }
 0x53b   : > { %1871 = vmatprep.subr.bf16.mxu1 %v2287_v8 }
 0x53c   : > { %1844 = vmatmul.mubr.msk.bf16.vlgmr.msra.gmra.mrb[4].mxu0 %vm661_vm4, %v1126_v17 }
 0x53d   : > { %1848 = vmatpush3.bf16.msra.mxu0 %v1233_v19  ;;  %1849 = vmatprep.mubr.msk.bf16.mxu0 %vm2288_vm1, %v2287_v8  ;;  %v1725_v19 = vld [vmem:[%s2864_s12] ss:$0 sm:$0xff] }
 0x53e   : > { %1859 = vmatprep.subr.bf16.mxu0 %v2287_v8  ;;  %1872 = vmatpush3.bf16.msra.mxu1 %v2085_v5 }
 0x53f   : > { %1873 = vmatprep.subr.bf16.mxu1 %v2287_v8 }
 0x542   : > { %1874 = vmatpush3.bf16.msra.mxu1 %v2086_v3 }
 0x543   : > { %1875 = vmatprep.subr.bf16.mxu1 %v2287_v8 }
 0x544   : > { %1850 = vmatmul.mubr.msk.bf16.vlgmr.msra.gmra.mrb[8].mxu0 %vm661_vm4, %v1128_v21 }
 0x545   : > { %1863 = vmatprep.mubr.msk.bf16.mxu0 %vm2288_vm1, %v2287_v8  ;;  %1860 = vmatpush3.bf16.msra.mxu0 %v2081_v2 }
 0x546   : > { %1861 = vmatprep.subr.bf16.mxu0 %v2287_v8  ;;  %1876 = vmatpush3.bf16.msra.mxu1 %v2087_v57 }
 0x547   : > { %1877 = vmatprep.subr.bf16.mxu1 %v2287_v8 }
 0x549   : > { %1862 = vmatpush3.bf16.msra.mxu0 %v2082_v55 }
 0x54a   : > { %1878 = vmatpush3.bf16.msra.mxu1 %v2088_v29 }
 0x54b   : > { %1879 = vmatprep.subr.bf16.mxu1 %v2287_v8 }
 0x54e   : > { %1880 = vmatpush3.bf16.msra.mxu1 %v2089_v34 }
 0x54f   : > { %1881 = vmatprep.subr.bf16.mxu1 %v2287_v8 }
 0x552   : > { %1882 = vmatpush3.bf16.msra.mxu1 %v2090_v35 }
 0x606   : > { %v1318_v24 = vpop.f32.mrb[0].mxu1 }
 0x607   : > { %v1175_v22 = vpop.f32.mrb[0].mxu0  ;;  %v1857_v26 = vpop.f32.mrb[1].mxu1 }
 0x608   : > { %v1839_v23 = vpop.f32.mrb[1].mxu0  ;;  %v1321_v27 = vpop.f32.mrb[2].mxu1 }
 0x609   : > { %v1178_v56 = vpop.f32.mrb[2].mxu0  ;;  %v1858_v28 = vpop.f32.mrb[3].mxu1 }
 0x60a   : > { %v1840_v25 = vpop.f32.mrb[3].mxu0 }
 0x60f   : > { %v1221_v30 = vpop.f32.mrb[4].mxu0 }
 0x610   : > { %v1222_v31 = vadd.f32 %v1221_v30, %v1175_v22  ;;  %v1845_v32 = vpop.f32.mrb[5].mxu0 }
 0x611   : > { %v1224_v33 = vpop.f32.mrb[6].mxu0 }
 0x612   : > { %v1846_v36 = vpop.f32.mrb[7].mxu0 }
 0x617   : > { %v1269_v38 = vpop.f32.mrb[8].mxu0 }
 0x618   : > { %v1275_v39 = vadd.f32 %v1269_v38, %v1222_v31  ;;  %v1851_v40 = vpop.f32.mrb[9].mxu0 }
 0x619   : > { %v1272_v42 = vpop.f32.mrb[10].mxu0 }
 0x61a   : > { %v1324_v43 = vadd.f32 %v1318_v24, %v1275_v39  ;;  %v1852_v58 = vpop.f32.mrb[11].mxu0 }
 0x61c   : > { %v1332_v59 = vadd.f32 %v1718_v41, %v1324_v43 }
 0x61e   : > { %v2736_v60 = vadd.f32 %v1334_v51, %v1332_v59 }
 0x620   : > { %v1339_v61 = vsel %vm458_vm0, %v2736_v60, 0.0 }
 0x621   : > { %1340 = vadd.xlane.f32.xlu0 %v1339_v61 }
 0x6ae   : > { %v1341_v50 = vpop.xlane.xlu0 %1340 }
 0x6af   : > { %v1343_v63 = vmul.f32 0.03125, %v1341_v50 }
 0x6b1   : > { %v1344_v0 = vsub.f32 %v2736_v60, %v1343_v63 }
 0x6b3   : > { %v1345_v1 = vmul.f32 %v1344_v0, %v1344_v0 }
 0x6b5   : > { %v1346_v49 = vsel %vm458_vm0, %v1345_v1, 0.0 }
 0x6b6   : > { %1347 = vadd.xlane.f32.xlu0 %v1346_v49 }
 0x743   : > { %v1348_v6 = vpop.xlane.xlu0 %1347 }
 0x744   : > { %v1349_v54 = vmul.f32 0.03125, %v1348_v6 }
 0x746   : > { %v1350_v9 = vadd.f32 1e-05, %v1349_v54 }
 0x748   : > { %2099 = vrsqrt.f32 %v1350_v9 }
 0x752   : > { %v2100_v47 = vpop.eup %2099 }
 0x753   : > { %v1352_v11 = vmul.f32 %v2100_v47, %v1344_v0 }
 0x755   : > { %v1359_v13 = vmul.f32 %v1719_v10, %v1352_v11 }
 0x757   : > { %v1366_v46 = vadd.f32 %v1720_v12, %v1359_v13 }
 0x759   : > { %v1367_v14 = vpack.c.bf16 %v1366_v46, %v1366_v46 }
 0x75b   : > { %1864 = vmatmul.mubr.msk.bf16.vlgmr.msra.gmra.mrb[12].mxu0 %vm458_vm0, %v1367_v14 }
 0x82e   : > { %v1428_v44 = vpop.f32.mrb[12].mxu0 }
 0x82f   : > { %v1429_v45 = vadd.f32 %v1721_v37, %v1428_v44  ;;  %v1865_v62 = vpop.f32.mrb[13].mxu0 }
 0x830   : > { %v1431_v7 = vpop.f32.mrb[14].mxu0 }
 0x831   : > { %v1435_v53 = vmul.f32 0.70710677, %v1429_v45  ;;  %v1866_v52 = vpop.f32.mrb[15].mxu0  ;;  %v1434_v8 = vmul.f32 0.5, %v1429_v45 }
 0x833   : > { %2101 = verf.f32 %v1435_v53 }
 0x83d   : > { %v2102_v15 = vpop.eup %2101 }
 0x83e   : > { %v1437_v16 = vadd.f32 1.0, %v2102_v15 }
 0x840   : > { %v1438_v17 = vmul.f32 %v1437_v16, %v1434_v8 }
 0x842   : > { %v1439_v18 = vpack.c.bf16 %v1438_v17, %v1438_v17 }
 0x844   : > { %1884 = vmatmul.mubr.bf16.vlgmr.msra.gmra.mrb[4].mxu1 %v1439_v18 }
 0x917   : > { %v1545_v20 = vpop.f32.mrb[4].mxu1 }
 0x918   : > { %v1546_v21 = vadd.f32 %v1725_v19, %v1545_v20  ;;  %v1885_v22 = vpop.f32.mrb[5].mxu1 }
 0x919   : > { %v1548_v23 = vpop.f32.mrb[6].mxu1 }
 0x91a   : > { %v1551_v56 = vadd.f32 %v1546_v21, %v2736_v60  ;;  %v1886_v24 = vpop.f32.mrb[7].mxu1 }
 0x91c   : > { %1552 = vst.msk [vmem:[%s445_s1] sm:$0xff] %vm458_vm0, %v1551_v56 }
 0x91d   : > { %2116 = shalt.err (!%p2113_p6)
}
 0x91e   : > { %s2117_s23 = scalar_lea.hbm %s2800_s14, 128  ;;  %s2121_s24 = scalar_lea.hbm %s2865_s13, 256 }
 0x91f   : > { %p2118_p7 = scmp.ne.s32.totalorder %s2800_s14, %s2117_s23  ;;  %p2122_p11 = scmp.lt.u32.totalorder %s2800_s14, %s2865_s13 }
 0x920   : > { %p2123_p12 = scmp.lt.u32.totalorder %s2121_s24, %s2117_s23  ;;  %p2125_p0 = scmp.lt.u32.totalorder %s2117_s23, %s2800_s14 }
 0x921   : > { %p2119_p9 = pnand %p2118_p7, %p2413_p4 }
 0x922   : > { %p2124_p13 = por %p2123_p12, %p2122_p11 }
 0x923   : > { %p2120_p10 = pneg %p2119_p9 }
 0x924   : > { %p2126_p1 = por %p2125_p0, %p2124_p13 }
 0x926   : > { %p2127_p2 = pnand %p2126_p1, %p2120_p10 }
 0x928   : > { %2130 = shalt.err (!%p2127_p2)
}
 0x929   : > { %1887 = dma.vmem_to_hbm [thread:$0]  (%p2413_p4), %s2802_s15, 128, %s2800_s14, %s1554_s0  }
 0x92a PF: > { %p1893_p3 = scmp.ge.s32.totalorder %s2233_s30, 2  ;;  %s1580_s17 = sand.u32 1, %s2213_s25  }
 0x92b   : > { %s1581_s19 = scalar_lea.sflag [#allocation6], %s1580_s17 }
 0x92c   : > { %p1890_p5 = pnand %p1893_p3, %p2420_p8 }
 0x92e   : > { %2208 = dma.done.wait (!%p1890_p5), %s1581_s19, 128  }
 0x92f   : > { %2210 = vsyncadd (!%p1890_p5), %s1581_s19, 4294967168  ;;  %s26_s30 = sadd.s32 1, %s2233_s30   ;;  %s2893_s25 = smov %s2217_s26 }
 0x930   : > { %p23_p6 = scmp.ge.s32.totalorder %s26_s30, 4   ;;  %s2894_s26 = smov %s2221_s27 }
 0x931   : > { %s2895_s27 = smov %s2426_s21  ;;  %s2896_s28 = smov %s2229_s29 }
 0x932   : > { %s2897_s29 = smov %s2899_s16  ;;  %25 = sbr.rel (!%p23_p6) target bundleno = 9 (0x9), region = 145 }
 0x939   :  { %1586 = vsyncpa [#allocation6], 1 }
 0x93a   :  { %1588 = vsyncpa [#allocation6 + $0x1], 1 }

// kernel: tpu_custom_call.1
= control target key start
LH: loop header
LB: loop body
LE: loop exit
PB: predicated region body
PF: predicated region fallthrough
CT: control target
= control target key end

     0   :  { %s2852_s0 = inlined_call_operand.vmem [shape: f32[2,8,32], index: 0, kind: input, shape index: {}]   ;;  %s2853_s1 = inlined_call_operand.vmem [shape: f32[1,32], index: 1, kind: input, shape index: {}]   ;;  %s2854_s2 = inlined_call_operand.vmem [shape: f32[1,32], index: 2, kind: input, shape index: {}]   ;;  %s2855_s3 = inlined_call_operand.vmem [shape: bf16[32,96], index: 3, kind: input, shape index: {}]   ;;  %s2856_s4 = inlined_call_operand.vmem [shape: f32[1,96], index: 4, kind: input, shape index: {}]   ;;  %s2857_s5 = inlined_call_operand.vmem [shape: bf16[4,8,32], index: 5, kind: input, shape index: {}]   ;;  %s2858_s6 = inlined_call_operand.vmem [shape: f32[1,32], index: 6, kind: input, shape index: {}]   ;;  %s2859_s7 = inlined_call_operand.vmem [shape: f32[1,32], index: 7, kind: input, shape index: {}]   ;;  %s2860_s8 = inlined_call_operand.vmem [shape: f32[1,32], index: 8, kind: input, shape index: {}]   ;;  %s2861_s9 = inlined_call_operand.vmem [shape: bf16[32,128], index: 9, kind: input, shape index: {}]   ;;  %s2862_s10 = inlined_call_operand.vmem [shape: f32[1,128], index: 10, kind: input, shape index: {}]   ;;  %s2863_s11 = inlined_call_operand.vmem [shape: bf16[128,32], index: 11, kind: input, shape index: {}]   ;;  %s2864_s12 = inlined_call_operand.vmem [shape: f32[1,32], index: 12, kind: input, shape index: {}]   ;;  %s2865_s13 = inlined_call_operand.hbm [shape: f32[2,8,32], index: 13, kind: output, shape index: {}]  }
   0x1   :  { %2867 = sst [smem:[#allocation8_spill]] %s2852_s0 }
   0x2   :  { %2868 = sst [smem:[#allocation9_spill]] %s2853_s1 }
   0x3   :  { %2869 = sst [smem:[#allocation10_spill]] %s2854_s2 }
   0x4   :  { %2870 = sst [smem:[#allocation11_spill]] %s2855_s3 }
   0x5   :  { %18 = vsyncpa [#allocation6], 0 }
   0x6   :  { %20 = vsyncpa [#allocation6 + $0x1], 0  ;;  %s2373_s25 = smov 0   ;;  %s2375_s26 = smov 0  }
   0x7   :  { %s2377_s27 = smov 0   ;;  %s2379_s28 = smov 0  }
   0x8   :  { %s2381_s29 = smov 0   ;;  %s2383_s30 = smov 0  }
   0x9 LB: > { %s1685_s14 = sadd.s32 4294967295, %s2233_s30   ;;  %s1686_s15 = sadd.s32 4294967294, %s2233_s30   ;;  %s2233_s30 = sphi %s2383_s30, %s26_s30   ;;  %s2229_s29 = sphi %s2381_s29, %s2897_s29   ;;  %s2225_s28 = sphi %s2379_s28, %s2896_s28   ;;  %s2221_s27 = sphi %s2377_s27, %s2895_s27   ;;  %s2217_s26 = sphi %s2375_s26, %s2894_s26   ;;  %s2213_s25 = sphi %s2373_s25, %s2893_s25  }
   0xa   : > { %s38_s16 = sadd.s32 1, %s2229_s29  ;;  %s325_s17 = sadd.s32 1, %s2221_s27 }
   0xb   : > { %p40_p0 = scmp.ge.s32.totalorder %s38_s16, 2  ;;  %p335_p1 = scmp.ne.s32.totalorder %s2221_s27, %s2217_s26 }
   0xc   : > { %p336_p2 = scmp.eq.s32.totalorder %s1685_s14, 1  ;;  %p341_p3 = scmp.ne.s32.totalorder %s2217_s26, %s2213_s25 }
   0xd   : > { %s2899_s16 = smov (%p40_p0, %s38_s16), 0  ;;  %p342_p5 = scmp.eq.s32.totalorder %s1686_s15, 1 }
   0xe   : > { %p2413_p4 = por %p336_p2, %p335_p1  ;;  %s320_s19 = ssub.s32 %s2229_s29, %s2899_s16 }
   0xf   : > { %p1689_p6 = scmp.ge.s32.totalorder %s2233_s30, 1  ;;  %p323_p7 = scmp.eq.s32.totalorder %s320_s19, 0 }
  0x10   : > { %p2420_p8 = por %p342_p5, %p341_p3  ;;  %p403_p9 = scmp.lt.s32.totalorder %s2233_s30, 3 }
  0x11   : > { %s2426_s21 = scalar_select %p323_p7, %s2221_s27, %s325_s17  }
  0x12   : > { %p404_p10 = pnand %p1689_p6, %p403_p9 }
  0x13   : > { %p446_p11 = scmp.lt.s32.totalorder (!%p404_p10), %s2225_s28, 1  ;;  %vm458_vm0 = vcmask (!%p404_p10), 261120   ;;  %s2873_s0 = sld [smem:[#allocation8_spill]] (!%p404_p10)  ;;  %v2287_v8 = vmov (!%p404_p10), 0.0   ;;  %vm2288_vm1 = vmmov (!%p404_p10), 0   ;;  %vm556_vm2 = vcmask (!%p404_p10), 60416  }
  0x14   : > { %407 = sbr.rel (%p404_p10) target bundleno = 2346 (0x92a), region = 72  ;;  %s2866_s17 = sand.u32 (!%p404_p10), 1, %s2217_s26   ;;  %1779 = vmatprep.subr.bf16.mxu0 (!%p404_p10), %v2287_v8  ;;  %1783 = vmatprep.mubr.msk.bf16.mxu0 (!%p404_p10), %vm2288_vm1, %v2287_v8  ;;  %v1694_v20 = vld [vmem:[%s2856_s4] ss:$0 sm:$0xff] (!%p404_p10)  ;;  %v2484_v44 = vmov (!%p404_p10), 0.0   ;;  %v2486_v45 = vmov (!%p404_p10), 0.0  }
  0x15   : > { %s2874_s3 = sld [smem:[#allocation11_spill]] (!%p404_p10)  ;;  %s2875_s1 = sld [smem:[#allocation9_spill]] (!%p404_p10)  ;;  %v2488_v46 = vmov (!%p404_p10), 0.0   ;;  %v2490_v47 = vmov (!%p404_p10), 0.0   ;;  %v2492_v48 = vmov (!%p404_p10), 0.0   ;;  %v2494_v49 = vmov (!%p404_p10), 0.0  }
  0x16   : > { %s2876_s2 = sld [smem:[#allocation10_spill]] (!%p404_p10)  ;;  %s2291_s19 = smov (!%p404_p10), 72   ;;  %v2496_v50 = vmov (!%p404_p10), 0.0   ;;  %v2498_v51 = vmov (!%p404_p10), 0.0   ;;  %v2500_v52 = vmov (!%p404_p10), -1e+30  }
  0x17   : > { %s2293_s24 = smov (!%p404_p10), 96   ;;  %s2294_s14 = smov (!%p404_p10), 64   ;;  %v2502_v53 = vmov (!%p404_p10), -1e+30   ;;  %v2504_v54 = vmov (!%p404_p10), -1e+30  }
  0x18   : > { %v2506_v55 = vmov (!%p404_p10), -1e+30  }
  0x1b   : > { %s447_s22 = scalar_select %p446_p11, %s2225_s28, 1  ;;  %v2061_v7 = vld [vmem:[%s2874_s3] sm:$0xff]   ;;  %v2062_v9 = vld [vmem:[%s2874_s3 + $0x8] sm:$0xff]  }
  0x1c   : > { %1780 = vmatpush3.bf16.msra.mxu0 %v2061_v7  ;;  %v1692_v14 = vld [vmem:[%s2875_s1] ss:$0 sm:$0xff]  ;;  %s2295_s1 = smov 88   ;;  %s2297_s3 = smov 80  }
  0x1d   : > { %s1691_s23 = sshll.u32 %s447_s22, 3  ;;  %1781 = vmatprep.subr.bf16.mxu0 %v2287_v8  ;;  %v1693_v16 = vld [vmem:[%s2876_s2] ss:$0 sm:$0xff]  ;;  %s2292_s22 = smov 112  }
  0x1e   : > { %s2433_s15 = scalar_lea.vmem %s2873_s0, %s1691_s23  ;;  %s2444_s23 = sshll.u32 %s2866_s17, 3 }
  0x1f   : > { %v455_v0 = vld [vmem:[%s2433_s15] sm:$0xff]  ;;  %s2289_s0 = smov 104   ;;  %s2290_s17 = smov 120  }
  0x20   : > { %v459_v1 = vsel %vm458_vm0, %v455_v0, 0.0  ;;  %1782 = vmatpush3.bf16.msra.mxu0 %v2062_v9  ;;  %s2296_s2 = smov 56  }
  0x21   : > { %460 = vadd.xlane.f32.xlu0 %v459_v1 }
  0xae   : > { %v461_v2 = vpop.xlane.xlu0 %460 }
  0xaf   : > { %v463_v3 = vmul.f32 0.03125, %v461_v2 }
  0xb1   : > { %v464_v4 = vsub.f32 %v455_v0, %v463_v3 }
  0xb3   : > { %v465_v5 = vmul.f32 %v464_v4, %v464_v4 }
  0xb5   : > { %v466_v6 = vsel %vm458_vm0, %v465_v5, 0.0 }
  0xb6   : > { %467 = vadd.xlane.f32.xlu0 %v466_v6 }
 0x143   : > { %v468_v10 = vpop.xlane.xlu0 %467 }
 0x144   : > { %v469_v11 = vmul.f32 0.03125, %v468_v10 }
 0x146   : > { %v470_v12 = vadd.f32 1e-05, %v469_v11 }
 0x148   : > { %2063 = vrsqrt.f32 %v470_v12 }
 0x152   : > { %v2064_v13 = vpop.eup %2063 }
 0x153   : > { %v472_v15 = vmul.f32 %v2064_v13, %v464_v4 }
 0x155   : > { %v479_v17 = vmul.f32 %v1692_v14, %v472_v15 }
 0x157   : > { %v486_v18 = vadd.f32 %v1693_v16, %v479_v17 }
 0x159   : > { %v487_v19 = vpack.c.bf16 %v486_v18, %v486_v18 }
 0x15b   : > { %1784 = vmatmul.mubr.msk.bf16.vlgmr.msra.gmra.mrb[0].mxu0 %vm458_vm0, %v487_v19 }
 0x22e   : > { %v548_v21 = vpop.f32.mrb[0].mxu0 }
 0x22f   : > { %v549_v22 = vadd.f32 %v1694_v20, %v548_v21  ;;  %v1785_v23 = vpop.f32.mrb[1].mxu0 }
 0x230   : > { %v551_v24 = vpop.f32.mrb[2].mxu0 }
 0x231   : > { %v554_v25 = vmul.f32 0.35355338, %v549_v22  ;;  %v1786_v26 = vpop.f32.mrb[3].mxu0  ;;  %v1738_v28 = vpack.c.bf16 %v549_v22, %v549_v22 }
 0x233   : > { %v555_v27 = vpack.c.bf16 %v554_v25, %v554_v25 }
 0x235   : > { %557 = vst.msk [vmem:[#allocation2] sm:$0xf] %vm556_vm2, %v555_v27  ;;  %603 = vrot.lane.b32.xlu0 %v555_v27, %s2289_s0  ;;  %573 = vrot.lane.b32.xlu1 %v555_v27, %s2290_s17  ;;  %s2298_s0 = smov 48   ;;  %s2299_s17 = smov 40  }
 0x239   : > { %608 = vrot.lane.b32.xlu0 %v1738_v28, %s2291_s19  ;;  %588 = vrot.lane.b32.xlu1 %v555_v27, %s2292_s22 }
 0x23c   : > { %v2464_v29 = vld [vmem:[#allocation2] sm:$0xf] }
 0x23d   : > { %562 = vrot.lane.b32.xlu1 %v1738_v28, %s2293_s24 }
 0x241   : > { %566 = vrot.lane.b32.xlu1 %v1738_v28, %s2294_s14 }
 0x245   : > { %578 = vrot.lane.b32.xlu1 %v1738_v28, %s2295_s1  ;;  %s445_s1 = scalar_lea.vmem [#allocation5], %s2444_s23 }
 0x249   : > { %583 = vrot.lane.b32.xlu1 %v1738_v28, %s2296_s2  ;;  %s2508_s2 = smov 0  }
 0x24d   : > { %593 = vrot.lane.b32.xlu1 %v1738_v28, %s2297_s3 }
 0x251   : > { %598 = vrot.lane.b32.xlu1 %v1738_v28, %s2298_s0 }
 0x255   : > { %613 = vrot.lane.b32.xlu1 %v1738_v28, %s2299_s17 }
 0x2a7   : > { %v604_v30 = vpop.permute.xlu0 %603  ;;  %v574_v31 = vpop.permute.xlu1 %573 }
 0x2a8   : > { %607 = vst.msk [vmem:[#allocation2 + $0xc] sm:$0xf] %vm556_vm2, %v604_v30  ;;  %577 = vst.msk [vmem:[#allocation2 + $0x4] sm:$0xf] %vm556_vm2, %v574_v31 }
 0x2ab   : > { %v609_v32 = vpop.permute.xlu0 %608  ;;  %v589_v33 = vpop.permute.xlu1 %588 }
 0x2ac   : > { %612 = vst.msk [vmem:[#allocation3 + $0xc] sm:$0xf] %vm556_vm2, %v609_v32  ;;  %592 = vst.msk [vmem:[#allocation2 + $0x8] sm:$0xf] %vm556_vm2, %v589_v33 }
 0x2af   : > { %v2470_v34 = vld [vmem:[#allocation2 + $0xc] sm:$0xf]  ;;  %v2472_v35 = vld [vmem:[#allocation2 + $0x4] sm:$0xf]  ;;  %v563_v36 = vpop.permute.xlu1 %562 }
 0x2b0   : > { %565 = vst.msk [vmem:[#allocation3] sm:$0xf] %vm556_vm2, %v563_v36 }
 0x2b3   : > { %v2475_v37 = vld [vmem:[#allocation2 + $0x8] sm:$0xf]  ;;  %v567_v38 = vpop.permute.xlu1 %566 }
 0x2b4   : > { %569 = vst.msk [vmem:[#allocation4] sm:$0xf] %vm556_vm2, %v567_v38 }
 0x2b7   : > { %v579_v39 = vpop.permute.xlu1 %578 }
 0x2b8   : > { %582 = vst.msk [vmem:[#allocation3 + $0x4] sm:$0xf] %vm556_vm2, %v579_v39 }
 0x2bb   : > { %v584_v40 = vpop.permute.xlu1 %583 }
 0x2bc   : > { %587 = vst.msk [vmem:[#allocation4 + $0x4] sm:$0xf] %vm556_vm2, %v584_v40 }
 0x2bf   : > { %v594_v41 = vpop.permute.xlu1 %593 }
 0x2c0   : > { %597 = vst.msk [vmem:[#allocation3 + $0x8] sm:$0xf] %vm556_vm2, %v594_v41 }
 0x2c3   : > { %v599_v42 = vpop.permute.xlu1 %598 }
 0x2c4   : > { %602 = vst.msk [vmem:[#allocation4 + $0x8] sm:$0xf] %vm556_vm2, %v599_v42 }
 0x2c7   : > { %v614_v43 = vpop.permute.xlu1 %613 }
 0x2c8   : > { %617 = vst.msk [vmem:[#allocation4 + $0xc] sm:$0xf] %vm556_vm2, %v614_v43 }
 0x2c9 LB: >> { %v2300_v56 = vmov 0.0   ;;  %s1700_s3 = sshll.u32 %s2285_s2, 3  ;;  %vm2301_vm3 = vmmov 0   ;;  %vm661_vm4 = vcmask 64512   ;;  %v846_v1 = vlaneseq  ;;  %s631_s2 = sadd.s32 1, %s2285_s2   ;;  %s2285_s2 = sphi %s2508_s2, %s631_s2   ;;  %v2281_v55 = vphi %v2506_v55, %v2891_v55   ;;  %v2277_v54 = vphi %v2504_v54, %v2890_v54   ;;  %v2273_v53 = vphi %v2502_v53, %v2889_v53   ;;  %v2269_v52 = vphi %v2500_v52, %v2888_v52   ;;  %v2265_v51 = vphi %v2498_v51, %v2887_v51   ;;  %v2261_v50 = vphi %v2496_v50, %v2886_v50   ;;  %v2257_v49 = vphi %v2494_v49, %v2885_v49   ;;  %v2253_v48 = vphi %v2492_v48, %v2884_v48   ;;  %v2249_v47 = vphi %v2490_v47, %v2883_v47   ;;  %v2245_v46 = vphi %v2488_v46, %v2882_v46   ;;  %v2241_v45 = vphi %v2486_v45, %v2881_v45   ;;  %v2237_v44 = vphi %v2484_v44, %v2880_v44  }
 0x2ca   : >> { %1787 = vmatprep.subr.bf16.mxu0 %v2300_v56  ;;  %1793 = vmatprep.subr.bf16.mxu1 %v2300_v56  ;;  %s2558_s19 = sshra.s32 %s1700_s3, 3  ;;  %v852_v3 = vstv %s1700_s3  ;;  %vm932_vm6 = vcmask 1043456   ;;  %p2654_p12 = scmp.ge.s32.totalorder %s631_s2, 1 }
 0x2cb   : >> { %1789 = vmatprep.mubr.msk.bf16.mxu0 %vm2301_vm3, %v2300_v56  ;;  %1795 = vmatprep.mubr.msk.bf16.mxu1 %vm2301_vm3, %v2300_v56  ;;  %s1701_s22 = sshll.u32 %s2558_s19, 2  ;;  %v851_v2 = vand.u32 127, %v846_v1  ;;  %v847_v4 = vshrl.u32 %v846_v1, 7  ;;  %s2302_s3 = smov (%p2654_p12), [#allocation5]  }
 0x2cc   : >> { %s650_s24 = scalar_lea.vmem [#allocation3], %s1701_s22  ;;  %s656_s14 = scalar_lea.vmem [#allocation4], %s1701_s22 }
 0x2cd   : >> { %v651_v57 = vld [vmem:[%s650_s24] sm:$0xf]  ;;  %v652_v58 = vld [vmem:[%s650_s24 + $0x4] sm:$0xf]  ;;  %v653_v61 = vld [vmem:[%s650_s24 + $0x8] sm:$0xf]  ;;  %v853_v5 = vadd.s32 %v852_v3, %v851_v2 }
 0x2ce   : >> { %v666_v59 = vsel %vm661_vm4, %v651_v57, 0  ;;  %v712_v60 = vsel %vm661_vm4, %v652_v58, 0  ;;  %v654_v62 = vld [vmem:[%s650_s24 + $0xc] sm:$0xf]  ;;  %v758_v63 = vsel %vm661_vm4, %v653_v61, 0  ;;  %s1735_s22 = sshll.u32 (%p2654_p12), %s2225_s28, 7 }
 0x2cf   : >> { %1788 = vmatpush3.bf16.xpose.msra.mxu0 %v666_v59  ;;  %1794 = vmatpush3.bf16.xpose.msra.mxu1 %v712_v60  ;;  %v804_v0 = vsel %vm661_vm4, %v654_v62, 0  ;;  %vm854_vm5 = vcmp.le.s32.totalorder %v853_v5, %v847_v4  ;;  %v657_v32 = vld [vmem:[%s656_s14] sm:$0xf]  ;;  %v658_v36 = vld [vmem:[%s656_s14 + $0x4] sm:$0xf]  ;;  %s2892_s28 = sand.u32 (%p2654_p12), 1, %s2217_s26  }
 0x2d0   : >> { %1799 = vmatprep.subr.bf16.mxu0 %v2300_v56  ;;  %1805 = vmatprep.subr.bf16.mxu1 %v2300_v56  ;;  %v934_v33 = vsel %vm932_vm6, %v657_v32, 0  ;;  %v980_v38 = vsel %vm932_vm6, %v658_v36, 0  ;;  %v659_v39 = vld [vmem:[%s656_s14 + $0x8] sm:$0xf]  ;;  %v660_v41 = vld [vmem:[%s656_s14 + $0xc] sm:$0xf]  ;;  %s2800_s14 = scalar_lea.hbm (%p2654_p12), %s2865_s13, %s1735_s22 }
 0x2d1   : >> { %v1026_v40 = vsel %vm932_vm6, %v659_v39, 0  ;;  %v1072_v42 = vsel %vm932_vm6, %v660_v41, 0  ;;  %s1554_s0 = scalar_lea.sflag (%p2654_p12), [#allocation6], %s2892_s28  ;;  %s2107_s19 = sshll.u32 (%p2654_p12), %s2302_s3, 4  ;;  %s2108_s19 = int_to_ptr.vmem [resolvable:$false] %s2107_s19 }
 0x2d2   : > { %s2109_s22 = scalar_lea.vmem (%p2654_p12), %s2108_s19, 256 }
 0x2d6   : >> { %1790 = vmatmul.mubr.msk.bf16.vlgmr.msra.gmra.mrb[0].mxu0 %vm661_vm4, %v2464_v29  ;;  %1796 = vmatmul.mubr.msk.bf16.vlgmr.msra.gmra.mrb[0].mxu1 %vm661_vm4, %v2472_v35  ;;  %v1130_v35 = vld [vmem:[%s2857_s5] sm:$0xf] (%p2654_p12) }
 0x2d7   : >> { %1800 = vmatpush3.bf16.xpose.msra.mxu0 %v758_v63  ;;  %1806 = vmatpush3.bf16.xpose.msra.mxu1 %v804_v0 }
 0x2d8   : >> { %1801 = vmatprep.mubr.msk.bf16.mxu0 %vm2301_vm3, %v2300_v56  ;;  %1807 = vmatprep.mubr.msk.bf16.mxu1 %vm2301_vm3, %v2300_v56 }
 0x2d9   : >> { %1811 = vmatprep.subr.bf16.mxu0 %v2300_v56  ;;  %1817 = vmatprep.subr.bf16.mxu1 %v2300_v56 }
 0x2de   : >> { %1802 = vmatmul.mubr.msk.bf16.vlgmr.msra.gmra.mrb[4].mxu0 %vm661_vm4, %v2475_v37  ;;  %1808 = vmatmul.mubr.msk.bf16.vlgmr.msra.gmra.mrb[4].mxu1 %vm661_vm4, %v2470_v34 }
 0x2df   : >> { %1813 = vmatprep.mubr.msk.bf16.mxu0 %vm2301_vm3, %v2300_v56  ;;  %1819 = vmatprep.mubr.msk.bf16.mxu1 %vm2301_vm3, %v2300_v56 }
 0x2e0   : >> { %1812 = vmatpush3.bf16.msra.mxu0 %v934_v33  ;;  %1818 = vmatpush3.bf16.msra.mxu1 %v980_v38 }
 0x2e1   : >> { %1823 = vmatprep.subr.bf16.mxu0 %v2300_v56  ;;  %1829 = vmatprep.subr.bf16.mxu1 %v2300_v56 }
 0x3a9   : >> { %v702_v6 = vpop.f32.mrb[0].mxu0  ;;  %v748_v7 = vpop.f32.mrb[0].mxu1 }
 0x3aa   : >> { %v857_v9 = vsel %vm854_vm5, %v702_v6, -1e+30  ;;  %v1791_v10 = vpop.f32.mrb[1].mxu0  ;;  %v858_v11 = vsel %vm854_vm5, %v748_v7, -1e+30  ;;  %v1797_v12 = vpop.f32.mrb[1].mxu1 }
 0x3ab   : >> { %v705_v13 = vpop.f32.mrb[2].mxu0  ;;  %v861_v14 = vsel %vm661_vm4, %v857_v9, -inf  ;;  %v751_v15 = vpop.f32.mrb[2].mxu1  ;;  %v864_v18 = vsel %vm661_vm4, %v858_v11, -inf }
 0x3ac   : >> { %862 = vmax.xlane.f32.xlu0 %v861_v14  ;;  %v1792_v16 = vpop.f32.mrb[3].mxu0  ;;  %v1798_v17 = vpop.f32.mrb[3].mxu1 }
 0x3b0   : >> { %865 = vmax.xlane.f32.xlu0 %v864_v18 }
 0x3b1   : >> { %v794_v19 = vpop.f32.mrb[4].mxu0  ;;  %v840_v20 = vpop.f32.mrb[4].mxu1 }
 0x3b2   : >> { %v859_v21 = vsel %vm854_vm5, %v794_v19, -1e+30  ;;  %v1803_v22 = vpop.f32.mrb[5].mxu0  ;;  %v860_v23 = vsel %vm854_vm5, %v840_v20, -1e+30  ;;  %v1809_v24 = vpop.f32.mrb[5].mxu1 }
 0x3b3   : >> { %v797_v25 = vpop.f32.mrb[6].mxu0  ;;  %v867_v26 = vsel %vm661_vm4, %v859_v21, -inf  ;;  %v843_v27 = vpop.f32.mrb[6].mxu1  ;;  %v870_v31 = vsel %vm661_vm4, %v860_v23, -inf }
 0x3b4   : >> { %868 = vmax.xlane.f32.xlu1 %v867_v26  ;;  %v1804_v28 = vpop.f32.mrb[7].mxu0  ;;  %v1810_v30 = vpop.f32.mrb[7].mxu1 }
 0x3b8   : >> { %871 = vmax.xlane.f32.xlu1 %v870_v31 }
 0x439   : >> { %v863_v43 = vpop.xlane.xlu0 %862 }
 0x43a   : >> { %v2606_v57 = vmax.f32 %v2281_v55, %v863_v43  }
 0x43c   : >> { %v877_v58 = vsub.f32 %v2281_v55, %v2606_v57  ;;  %v889_v59 = vsub.f32 %v857_v9, %v2606_v57 }
 0x43d   : >> { %v866_v60 = vpop.xlane.xlu0 %865 }
 0x43e   : >> { %v893_v61 = vmul.f32 1.442695, %v889_v59  ;;  %v2612_v62 = vmax.f32 %v2277_v54, %v866_v60  }
 0x440   : >> { %v878_v63 = vsub.f32 %v2277_v54, %v2612_v62  ;;  %v890_v0 = vsub.f32 %v858_v11, %v2612_v62  ;;  %2065 = vpow2.f32 %v893_v61 }
 0x441   : >> { %v869_v1 = vpop.xlane.xlu1 %868 }
 0x442   : >> { %v895_v2 = vmul.f32 1.442695, %v890_v0  ;;  %v2618_v3 = vmax.f32 %v2273_v53, %v869_v1   ;;  %v883_v22 = vmul.f32 1.442695, %v878_v63 }
 0x444   : >> { %v879_v55 = vsub.f32 %v2273_v53, %v2618_v3  ;;  %v891_v4 = vsub.f32 %v859_v21, %v2618_v3  ;;  %2067 = vpow2.f32 %v895_v2  ;;  %v881_v21 = vmul.f32 1.442695, %v877_v58 }
 0x445   : >> { %v872_v5 = vpop.xlane.xlu1 %871 }
 0x446   : >> { %v897_v6 = vmul.f32 1.442695, %v891_v4  ;;  %v2624_v7 = vmax.f32 %v2269_v52, %v872_v5  }
 0x448   : >> { %v880_v54 = vsub.f32 %v2269_v52, %v2624_v7  ;;  %v892_v9 = vsub.f32 %v860_v23, %v2624_v7  ;;  %2069 = vpow2.f32 %v897_v6  ;;  %v885_v23 = vmul.f32 1.442695, %v879_v55 }
 0x44a   : >> { %v899_v10 = vmul.f32 1.442695, %v892_v9  ;;  %v2066_v11 = vpop.eup %2065 }
 0x44b   : >> { %v905_v12 = vsel %vm661_vm4, %v2066_v11, 0.0  ;;  %v925_v13 = vpack.c.bf16 %v2066_v11, %v2066_v11 }
 0x44c   : >> { %2071 = vpow2.f32 %v899_v10  ;;  %906 = vadd.xlane.f32.xlu0 %v905_v12 }
 0x44d   : >> { %1814 = vmatmul.mubr.msk.bf16.vlgmr.msra.gmra.mrb[8].mxu0 %vm661_vm4, %v925_v13  ;;  %2073 = vpow2.f32 %v881_v21 }
 0x44e   : >> { %v2068_v53 = vpop.eup %2067  ;;  %1824 = vmatpush3.bf16.msra.mxu0 %v1026_v40  ;;  %1825 = vmatprep.mubr.msk.bf16.mxu0 %vm2301_vm3, %v2300_v56  ;;  %2075 = vpow2.f32 %v883_v22 }
 0x44f   : >> { %v908_v14 = vsel %vm661_vm4, %v2068_v53, 0.0  ;;  %v926_v52 = vpack.c.bf16 %v2068_v53, %v2068_v53  ;;  %2077 = vpow2.f32 %v885_v23  ;;  %v2889_v53 = vmov %v2618_v3  ;;  %1835 = vmatprep.subr.bf16.mxu0 (%p2654_p12), %v2287_v8 }
 0x450   : >> { %909 = vadd.xlane.f32.xlu1 %v908_v14  ;;  %v1711_v14 = vld [vmem:[%s2857_s5 + $0x4] sm:$0xf] (%p2654_p12) }
 0x451   : >> { %1820 = vmatmul.mubr.msk.bf16.vlgmr.msra.gmra.mrb[8].mxu1 %vm661_vm4, %v926_v52  ;;  %v2888_v52 = vmov %v2624_v7  ;;  %v1139_v3 = vsel (%p2654_p12), %vm932_vm6, %v1711_v14, 0  ;;  %v1185_v7 = vsel (%p2654_p12), %vm932_vm6, %v1130_v35, 0  ;;  %v2090_v35 = vld [vmem:[%s2863_s11 + $0x38] sm:$0xff] (%p2654_p12)  }
 0x452   : >> { %v2070_v15 = vpop.eup %2069  ;;  %1830 = vmatpush3.bf16.msra.mxu1 %v1072_v42  ;;  %1831 = vmatprep.mubr.msk.bf16.mxu1 %vm2301_vm3, %v2300_v56  ;;  %v887_v56 = vmul.f32 1.442695, %v880_v54 }
 0x453   : >> { %v911_v16 = vsel %vm661_vm4, %v2070_v15, 0.0  ;;  %v927_v17 = vpack.c.bf16 %v2070_v15, %v2070_v15  ;;  %1853 = vmatprep.subr.bf16.mxu1 (%p2654_p12), %v2287_v8 }
 0x454   : >> { %912 = vadd.xlane.f32.xlu0 %v911_v16  ;;  %2079 = vpow2.f32 %v887_v56  ;;  %v1714_v16 = vld [vmem:[%s2857_s5 + $0x8] sm:$0xf] (%p2654_p12) }
 0x455   : >> { %1826 = vmatmul.mubr.msk.bf16.vlgmr.msra.gmra.mrb[12].mxu0 %vm661_vm4, %v927_v17 }
 0x456   : >> { %v2072_v18 = vpop.eup %2071  ;;  %1837 = vmatprep.mubr.msk.bf16.mxu0 (%p2654_p12), %vm2288_vm1, %v2287_v8  ;;  %1836 = vmatpush3.bf16.msra.mxu0 (%p2654_p12), %v1139_v3  ;;  %v2086_v3 = vld [vmem:[%s2863_s11 + $0x18] sm:$0xff] (%p2654_p12)  }
 0x457   : >> { %v914_v19 = vsel %vm661_vm4, %v2072_v18, 0.0  ;;  %v928_v20 = vpack.c.bf16 %v2072_v18, %v2072_v18  ;;  %v2074_v24 = vpop.eup %2073  ;;  %1841 = vmatprep.subr.bf16.mxu0 (%p2654_p12), %v2287_v8 }
 0x458   : >> { %915 = vadd.xlane.f32.xlu1 %v914_v19  ;;  %v901_v25 = vmul.f32 %v2265_v51, %v2074_v24  ;;  %v2076_v26 = vpop.eup %2075  ;;  %v921_v58 = vmul.f32 %v2249_v47, %v2074_v24  ;;  %v1233_v19 = vsel (%p2654_p12), %vm932_vm6, %v1714_v16, 0 }
 0x459   : >> { %1832 = vmatmul.mubr.msk.bf16.vlgmr.msra.gmra.mrb[12].mxu1 %vm661_vm4, %v928_v20  ;;  %v902_v30 = vmul.f32 %v2261_v50, %v2076_v26  ;;  %v2078_v31 = vpop.eup %2077  ;;  %v922_v63 = vmul.f32 %v2245_v46, %v2076_v26 }
 0x45a   : >> { %v903_v36 = vmul.f32 %v2257_v49, %v2078_v31  ;;  %v923_v4 = vmul.f32 %v2241_v45, %v2078_v31  ;;  %1855 = vmatprep.mubr.msk.bf16.mxu1 (%p2654_p12), %vm2288_vm1, %v2287_v8 }
 0x45e   : >> { %v2080_v38 = vpop.eup %2079 }
 0x45f   : >> { %v904_v41 = vmul.f32 %v2253_v48, %v2080_v38 }
 0x4d9   : >> { %v907_v27 = vpop.xlane.xlu0 %906 }
 0x4da   : >> { %v917_v28 = vadd.f32 %v907_v27, %v901_v25  }
 0x4dd   : >> { %v910_v32 = vpop.xlane.xlu1 %909 }
 0x4de   : >> { %v918_v33 = vadd.f32 %v910_v32, %v902_v30  }
 0x4e0   : > { %2091 = vrcp.f32 (%p2654_p12), %v918_v33 }
 0x4e1   : >> { %v913_v39 = vpop.xlane.xlu0 %912  ;;  %2093 = vrcp.f32 (%p2654_p12), %v917_v28 }
 0x4e2   : >> { %v919_v40 = vadd.f32 %v913_v39, %v903_v36  }
 0x4e5   : >> { %v916_v42 = vpop.xlane.xlu1 %915 }
 0x4e6   : >> { %v920_v43 = vadd.f32 %v916_v42, %v904_v41   ;;  %v1718_v41 = vld [vmem:[%s2858_s6] ss:$0 sm:$0xff] (%p2654_p12) }
 0x4e8   : > { %2095 = vrcp.f32 (%p2654_p12), %v920_v43 }
 0x4e9   : > { %2097 = vrcp.f32 (%p2654_p12), %v919_v40 }
 0x4ea   : > { %v2092_v34 = vpop.eup (%p2654_p12), %2091 }
 0x4eb   : > { %v2094_v37 = vpop.eup (%p2654_p12), %2093 }
 0x520   : >> { %v970_v51 = vpop.f32.mrb[8].mxu0 }
 0x521   : >> { %v2646_v47 = vadd.f32 %v970_v51, %v921_v58   ;;  %v1815_v60 = vpop.f32.mrb[9].mxu0  ;;  %v2887_v51 = vmov %v917_v28 }
 0x522   : >> { %v973_v61 = vpop.f32.mrb[10].mxu0  ;;  %v1334_v51 = vld [vmem:[%s2433_s15] sm:$0xff] (%p2654_p12)  ;;  %s1568_s15 = sshll.u32 (%p2654_p12), %s445_s1, 4  ;;  %s2802_s15 = int_to_ptr.vmem [resolvable:$true] %s1568_s15 }
 0x523   : >> { %v2877_v59 = vmov %v2646_v47  ;;  %v1816_v50 = vpop.f32.mrb[11].mxu0  ;;  %v924_v47 = vmul.f32 %v2237_v44, %v2080_v38  ;;  %s2103_s17 = scalar_lea.vmem (%p2654_p12), %s2802_s15, 128  ;;  %p2110_p2 = scmp.lt.s32.totalorder (%p2654_p12), %s2802_s15, %s2108_s19 }
 0x524   : >> { %v1016_v0 = vpop.f32.mrb[8].mxu1  ;;  %v2886_v50 = vmov %v918_v33  ;;  %v1122_v52 = vmul.f32 (%p2654_p12), %v2094_v37, %v2877_v59  ;;  %v1721_v37 = vld [vmem:[%s2862_s10] ss:$0 sm:$0xff] (%p2654_p12)  ;;  %p2104_p13 = scmp.ne.s32.totalorder (%p2654_p12), %s2802_s15, %s2103_s17  ;;  %p2111_p3 = scmp.lt.s32.totalorder (%p2654_p12), %s2109_s22, %s2103_s17 }
 0x525   : >> { %v1115_v1 = vadd.f32 %v1016_v0, %v922_v63   ;;  %v1821_v49 = vpop.f32.mrb[9].mxu1 }
 0x526   : >> { %v1019_v2 = vpop.f32.mrb[10].mxu1  ;;  %v2885_v49 = vmov %v919_v40  ;;  %v1126_v17 = vpack.c.bf16 (%p2654_p12), %v1122_v52, %v1122_v52  ;;  %p2105_p0 = pnand (%p2654_p12), %p2104_p13, %p2413_p4  ;;  %p2112_p5 = por (%p2654_p12), %p2111_p3, %p2110_p2 }
 0x527   : >> { %v1822_v55 = vpop.f32.mrb[11].mxu1  ;;  %v2081_v2 = vld [vmem:[%s2861_s9] sm:$0xff] (%p2654_p12)  }
 0x528   : >> { %v1062_v48 = vpop.f32.mrb[12].mxu0  ;;  %v2891_v55 = vmov %v2606_v57  ;;  %v1716_v57 = vld [vmem:[%s2857_s5 + $0xc] sm:$0xf] (%p2654_p12)  ;;  %p2106_p1 = pneg (%p2654_p12), %p2105_p0 }
 0x529   : >> { %v2650_v45 = vadd.f32 %v1062_v48, %v923_v4   ;;  %v1827_v6 = vpop.f32.mrb[13].mxu0  ;;  %v2884_v48 = vmov %v920_v43  ;;  %v1282_v29 = vsel (%p2654_p12), %vm932_vm6, %v1716_v57, 0  ;;  %v2082_v55 = vld [vmem:[%s2861_s9 + $0x8] sm:$0xff] (%p2654_p12)   ;;  %v2083_v4 = vld [vmem:[%s2863_s11] sm:$0xff] (%p2654_p12)  }
 0x52a   : >> { %v1065_v54 = vpop.f32.mrb[14].mxu0  ;;  %633 = sbr.rel (!%p2654_p12) target bundleno = 713 (0x2c9), region = 134  ;;  %1854 = vmatpush3.bf16.msra.mxu1 (%p2654_p12), %v1282_v29  ;;  %v2084_v48 = vld [vmem:[%s2863_s11 + $0x8] sm:$0xff] (%p2654_p12)   ;;  %v2087_v57 = vld [vmem:[%s2863_s11 + $0x20] sm:$0xff] (%p2654_p12)   ;;  %p2113_p6 = pnand (%p2654_p12), %p2112_p5, %p2106_p1 }
 0x52b   : >> { %v2878_v5 = vmov %v2650_v45  ;;  %v1828_v9 = vpop.f32.mrb[15].mxu0  ;;  %v2890_v54 = vmov %v2612_v62  ;;  %1867 = vmatprep.subr.bf16.mxu1 (%p2654_p12), %v2287_v8  ;;  %v2088_v29 = vld [vmem:[%s2863_s11 + $0x28] sm:$0xff] (%p2654_p12)  }
 0x52c   : >> { %v1108_v10 = vpop.f32.mrb[12].mxu1  ;;  %v2881_v45 = vmov %v2878_v5 }
 0x52d   : >> { %v1117_v11 = vadd.f32 %v1108_v10, %v924_v47   ;;  %v1833_v12 = vpop.f32.mrb[13].mxu1  ;;  %v2883_v47 = vmov %v2877_v59  ;;  %v2096_v45 = vpop.eup (%p2654_p12), %2095  ;;  %v1719_v10 = vld [vmem:[%s2859_s7] ss:$0 sm:$0xff] (%p2654_p12) }
 0x52e   : >> { %v1111_v13 = vpop.f32.mrb[14].mxu1  ;;  %v2098_v18 = vpop.eup (%p2654_p12), %2097  ;;  %v1720_v12 = vld [vmem:[%s2860_s8] ss:$0 sm:$0xff] (%p2654_p12) }
 0x52f   : >> { %v1834_v46 = vpop.f32.mrb[15].mxu1  ;;  %v2880_v44 = vmov %v1117_v11  ;;  %v1125_v53 = vmul.f32 (%p2654_p12), %v2096_v45, %v1117_v11  ;;  %v1124_v20 = vmul.f32 (%p2654_p12), %v2098_v18, %v2878_v5  ;;  %v2085_v5 = vld [vmem:[%s2863_s11 + $0x10] sm:$0xff] (%p2654_p12)  }
 0x530   : >> { %v2882_v46 = vmov %v1115_v1  ;;  %v1123_v44 = vmul.f32 (%p2654_p12), %v2092_v34, %v1115_v1  ;;  %v2089_v34 = vld [vmem:[%s2863_s11 + $0x30] sm:$0xff] (%p2654_p12)  }
 0x531   : > { %v1129_v15 = vpack.c.bf16 %v1125_v53, %v1125_v53  ;;  %v1128_v21 = vpack.c.bf16 %v1124_v20, %v1124_v20 }
 0x532   : > { %v1127_v62 = vpack.c.bf16 %v1123_v44, %v1123_v44 }
 0x533   : > { %1856 = vmatmul.mubr.msk.bf16.vlgmr.msra.gmra.mrb[0].mxu1 %vm661_vm4, %v1129_v15 }
 0x534   : > { %1838 = vmatmul.mubr.msk.bf16.vlgmr.msra.gmra.mrb[0].mxu0 %vm661_vm4, %v1127_v62  ;;  %1883 = vmatprep.mubr.msk.bf16.mxu1 %vm2288_vm1, %v2287_v8 }
 0x535   : > { %1842 = vmatpush3.bf16.msra.mxu0 %v1185_v7  ;;  %1843 = vmatprep.mubr.msk.bf16.mxu0 %vm2288_vm1, %v2287_v8 }
 0x536   : > { %1847 = vmatprep.subr.bf16.mxu0 %v2287_v8  ;;  %1868 = vmatpush3.bf16.msra.mxu1 %v2083_v4 }
 0x537   : > { %1869 = vmatprep.subr.bf16.mxu1 %v2287_v8 }
 0x53a   : > { %1870 = vmatpush3.bf16.msra.mxu1 %v2084_v48 }
 0x53b   : > { %1871 = vmatprep.subr.bf16.mxu1 %v2287_v8 }
 0x53c   : > { %1844 = vmatmul.mubr.msk.bf16.vlgmr.msra.gmra.mrb[4].mxu0 %vm661_vm4, %v1126_v17 }
 0x53d   : > { %1848 = vmatpush3.bf16.msra.mxu0 %v1233_v19  ;;  %1849 = vmatprep.mubr.msk.bf16.mxu0 %vm2288_vm1, %v2287_v8  ;;  %v1725_v19 = vld [vmem:[%s2864_s12] ss:$0 sm:$0xff] }
 0x53e   : > { %1859 = vmatprep.subr.bf16.mxu0 %v2287_v8  ;;  %1872 = vmatpush3.bf16.msra.mxu1 %v2085_v5 }
 0x53f   : > { %1873 = vmatprep.subr.bf16.mxu1 %v2287_v8 }
 0x542   : > { %1874 = vmatpush3.bf16.msra.mxu1 %v2086_v3 }
 0x543   : > { %1875 = vmatprep.subr.bf16.mxu1 %v2287_v8 }
 0x544   : > { %1850 = vmatmul.mubr.msk.bf16.vlgmr.msra.gmra.mrb[8].mxu0 %vm661_vm4, %v1128_v21 }
 0x545   : > { %1863 = vmatprep.mubr.msk.bf16.mxu0 %vm2288_vm1, %v2287_v8  ;;  %1860 = vmatpush3.bf16.msra.mxu0 %v2081_v2 }
 0x546   : > { %1861 = vmatprep.subr.bf16.mxu0 %v2287_v8  ;;  %1876 = vmatpush3.bf16.msra.mxu1 %v2087_v57 }
 0x547   : > { %1877 = vmatprep.subr.bf16.mxu1 %v2287_v8 }
 0x549   : > { %1862 = vmatpush3.bf16.msra.mxu0 %v2082_v55 }
 0x54a   : > { %1878 = vmatpush3.bf16.msra.mxu1 %v2088_v29 }
 0x54b   : > { %1879 = vmatprep.subr.bf16.mxu1 %v2287_v8 }
 0x54e   : > { %1880 = vmatpush3.bf16.msra.mxu1 %v2089_v34 }
 0x54f   : > { %1881 = vmatprep.subr.bf16.mxu1 %v2287_v8 }
 0x552   : > { %1882 = vmatpush3.bf16.msra.mxu1 %v2090_v35 }
 0x606   : > { %v1318_v24 = vpop.f32.mrb[0].mxu1 }
 0x607   : > { %v1175_v22 = vpop.f32.mrb[0].mxu0  ;;  %v1857_v26 = vpop.f32.mrb[1].mxu1 }
 0x608   : > { %v1839_v23 = vpop.f32.mrb[1].mxu0  ;;  %v1321_v27 = vpop.f32.mrb[2].mxu1 }
 0x609   : > { %v1178_v56 = vpop.f32.mrb[2].mxu0  ;;  %v1858_v28 = vpop.f32.mrb[3].mxu1 }
 0x60a   : > { %v1840_v25 = vpop.f32.mrb[3].mxu0 }
 0x60f   : > { %v1221_v30 = vpop.f32.mrb[4].mxu0 }
 0x610   : > { %v1222_v31 = vadd.f32 %v1221_v30, %v1175_v22  ;;  %v1845_v32 = vpop.f32.mrb[5].mxu0 }
 0x611   : > { %v1224_v33 = vpop.f32.mrb[6].mxu0 }
 0x612   : > { %v1846_v36 = vpop.f32.mrb[7].mxu0 }
 0x617   : > { %v1269_v38 = vpop.f32.mrb[8].mxu0 }
 0x618   : > { %v1275_v39 = vadd.f32 %v1269_v38, %v1222_v31  ;;  %v1851_v40 = vpop.f32.mrb[9].mxu0 }
 0x619   : > { %v1272_v42 = vpop.f32.mrb[10].mxu0 }
 0x61a   : > { %v1324_v43 = vadd.f32 %v1318_v24, %v1275_v39  ;;  %v1852_v58 = vpop.f32.mrb[11].mxu0 }
 0x61c   : > { %v1332_v59 = vadd.f32 %v1718_v41, %v1324_v43 }
 0x61e   : > { %v2736_v60 = vadd.f32 %v1334_v51, %v1332_v59 }
 0x620   : > { %v1339_v61 = vsel %vm458_vm0, %v2736_v60, 0.0 }
 0x621   : > { %1340 = vadd.xlane.f32.xlu0 %v1339_v61 }
 0x6ae   : > { %v1341_v50 = vpop.xlane.xlu0 %1340 }
 0x6af   : > { %v1343_v63 = vmul.f32 0.03125, %v1341_v50 }
 0x6b1   : > { %v1344_v0 = vsub.f32 %v2736_v60, %v1343_v63 }
 0x6b3   : > { %v1345_v1 = vmul.f32 %v1344_v0, %v1344_v0 }
 0x6b5   : > { %v1346_v49 = vsel %vm458_vm0, %v1345_v1, 0.0 }
 0x6b6   : > { %1347 = vadd.xlane.f32.xlu0 %v1346_v49 }
 0x743   : > { %v1348_v6 = vpop.xlane.xlu0 %1347 }
 0x744   : > { %v1349_v54 = vmul.f32 0.03125, %v1348_v6 }
 0x746   : > { %v1350_v9 = vadd.f32 1e-05, %v1349_v54 }
 0x748   : > { %2099 = vrsqrt.f32 %v1350_v9 }
 0x752   : > { %v2100_v47 = vpop.eup %2099 }
 0x753   : > { %v1352_v11 = vmul.f32 %v2100_v47, %v1344_v0 }
 0x755   : > { %v1359_v13 = vmul.f32 %v1719_v10, %v1352_v11 }
 0x757   : > { %v1366_v46 = vadd.f32 %v1720_v12, %v1359_v13 }
 0x759   : > { %v1367_v14 = vpack.c.bf16 %v1366_v46, %v1366_v46 }
 0x75b   : > { %1864 = vmatmul.mubr.msk.bf16.vlgmr.msra.gmra.mrb[12].mxu0 %vm458_vm0, %v1367_v14 }
 0x82e   : > { %v1428_v44 = vpop.f32.mrb[12].mxu0 }
 0x82f   : > { %v1429_v45 = vadd.f32 %v1721_v37, %v1428_v44  ;;  %v1865_v62 = vpop.f32.mrb[13].mxu0 }
 0x830   : > { %v1431_v7 = vpop.f32.mrb[14].mxu0 }
 0x831   : > { %v1435_v53 = vmul.f32 0.70710677, %v1429_v45  ;;  %v1866_v52 = vpop.f32.mrb[15].mxu0  ;;  %v1434_v8 = vmul.f32 0.5, %v1429_v45 }
 0x833   : > { %2101 = verf.f32 %v1435_v53 }
 0x83d   : > { %v2102_v15 = vpop.eup %2101 }
 0x83e   : > { %v1437_v16 = vadd.f32 1.0, %v2102_v15 }
 0x840   : > { %v1438_v17 = vmul.f32 %v1437_v16, %v1434_v8 }
 0x842   : > { %v1439_v18 = vpack.c.bf16 %v1438_v17, %v1438_v17 }
 0x844   : > { %1884 = vmatmul.mubr.bf16.vlgmr.msra.gmra.mrb[4].mxu1 %v1439_v18 }
 0x917   : > { %v1545_v20 = vpop.f32.mrb[4].mxu1 }
 0x918   : > { %v1546_v21 = vadd.f32 %v1725_v19, %v1545_v20  ;;  %v1885_v22 = vpop.f32.mrb[5].mxu1 }
 0x919   : > { %v1548_v23 = vpop.f32.mrb[6].mxu1 }
 0x91a   : > { %v1551_v56 = vadd.f32 %v1546_v21, %v2736_v60  ;;  %v1886_v24 = vpop.f32.mrb[7].mxu1 }
 0x91c   : > { %1552 = vst.msk [vmem:[%s445_s1] sm:$0xff] %vm458_vm0, %v1551_v56 }
 0x91d   : > { %2116 = shalt.err (!%p2113_p6)
}
 0x91e   : > { %s2117_s23 = scalar_lea.hbm %s2800_s14, 128  ;;  %s2121_s24 = scalar_lea.hbm %s2865_s13, 256 }
 0x91f   : > { %p2118_p7 = scmp.ne.s32.totalorder %s2800_s14, %s2117_s23  ;;  %p2122_p11 = scmp.lt.u32.totalorder %s2800_s14, %s2865_s13 }
 0x920   : > { %p2123_p12 = scmp.lt.u32.totalorder %s2121_s24, %s2117_s23  ;;  %p2125_p0 = scmp.lt.u32.totalorder %s2117_s23, %s2800_s14 }
 0x921   : > { %p2119_p9 = pnand %p2118_p7, %p2413_p4 }
 0x922   : > { %p2124_p13 = por %p2123_p12, %p2122_p11 }
 0x923   : > { %p2120_p10 = pneg %p2119_p9 }
 0x924   : > { %p2126_p1 = por %p2125_p0, %p2124_p13 }
 0x926   : > { %p2127_p2 = pnand %p2126_p1, %p2120_p10 }
 0x928   : > { %2130 = shalt.err (!%p2127_p2)
}
 0x929   : > { %1887 = dma.vmem_to_hbm [thread:$0]  (%p2413_p4), %s2802_s15, 128, %s2800_s14, %s1554_s0  }
 0x92a PF: > { %p1893_p3 = scmp.ge.s32.totalorder %s2233_s30, 2  ;;  %s1580_s17 = sand.u32 1, %s2213_s25  }
 0x92b   : > { %s1581_s19 = scalar_lea.sflag [#allocation6], %s1580_s17 }
 0x92c   : > { %p1890_p5 = pnand %p1893_p3, %p2420_p8 }
 0x92e   : > { %2208 = dma.done.wait (!%p1890_p5), %s1581_s19, 128  }
 0x92f   : > { %2210 = vsyncadd (!%p1890_p5), %s1581_s19, 4294967168  ;;  %s26_s30 = sadd.s32 1, %s2233_s30   ;;  %s2893_s25 = smov %s2217_s26 }
 0x930   : > { %p23_p6 = scmp.ge.s32.totalorder %s26_s30, 4   ;;  %s2894_s26 = smov %s2221_s27 }
 0x931   : > { %s2895_s27 = smov %s2426_s21  ;;  %s2896_s28 = smov %s2229_s29 }
 0x932   : > { %s2897_s29 = smov %s2899_s16  ;;  %25 = sbr.rel (!%p23_p6) target bundleno = 9 (0x9), region = 145 }
 0x939   :  { %1586 = vsyncpa [#allocation6], 1 }
 0x93a   :  { %1588 = vsyncpa [#allocation6 + $0x1], 1 }

</bundles_post_ra>
